<compile_context>
chip_gen: v7x
topology: tpu7x:2x2x1
jax: 0.10.0
libtpu: 0.0.40
codegen_flags: <defaults>
</compile_context>

<pallas_src>
import math

import jax
import jax.numpy as jnp
from jax.experimental import pallas as pl
from jax.experimental.pallas import tpu as pltpu

# ----------------------------- static config --------------------------------
N_FREQ        = 4
N_POS_FEATS   = 16                      # config.input_feature_dim
N_DIR_FEATS   = 3 * 2 * N_FREQ          # 24
N_ROUGH_FEATS = 1 * 2 * N_FREQ          # 8
N_MAT_FEATS   = 5                       # use_transparency = False
AO_CH         = 6                       # average_ao = False
HIDDEN        = 32
HID3          = 3 * HIDDEN              # fused (diffuse|spec|local) hidden width
BRDF_H        = 16
BRDF_W        = 16
IN_DIM        = 24                      # packed input rows: feat(16)|vdir(3)|N(3)|pad(2)
OUT_DIM       = 32                      # packed output rows, row map below
N_ENC_IN      = 10                      # base-angle rows: N(3)|R(3)|vdir(3)|rough(1)
SLAB_LANES    = 128
TB_MAX        = 1024                    # lane tile; sweep 512..2048 on v6e/v5e

# output slab row map (becomes column map after the wrapper transpose):
#  0:3 raw_color | 3:6 color | 6:12 ao | 12:13 roughness | 13:14 metallic
# 14:17 albedo | 17:20 KdA | 20:23 F0 | 23:26 N(flipped) | 26:29 R | 29:32 local


def _round_up(x, m):
    return (x + m - 1) // m * m


# ------------------------ weight slab layout (static) -------------------------
_SLAB_BLOCKS = [
    ("w_ma1", (2 * HIDDEN, N_POS_FEATS)),          # fused material+AO first layer
    ("b_ma1", (2 * HIDDEN, 1)),
    ("w_ma2", (N_MAT_FEATS + AO_CH, 2 * HIDDEN)),  # block-diag second layer
    ("b_ma2", (N_MAT_FEATS + AO_CH, 1)),
    ("w_feat", (HID3, N_POS_FEATS)),               # fused enc-MLPs: feature part
    ("a_enc", (2 * N_FREQ * HID3, N_ENC_IN)),      # per-octave sin/cos blocks
    ("b_h",   (HID3, 1)),
    ("w2",    (9, HID3)),                          # block-diag second layer
    ("b2",    (9, 1)),
    ("brdf",  (2 * BRDF_H, BRDF_W)),               # stacked BRDF LUT channels
]


def _build_slab_layout():
    layout, r = {}, 0
    for name, shape in _SLAB_BLOCKS:
        layout[name] = (r, shape)
        r += _round_up(shape[0], 8)                # every block 8-row aligned
    return layout, _round_up(r, 8)


_SLAB_LAYOUT, _SLAB_ROWS = _build_slab_layout()


def _w(w_ref, name, row_off=0, rows=None):
    """Static slice of one weight block out of the packed slab."""
    r0, (nrows, ncols) = _SLAB_LAYOUT[name]
    rows = nrows if rows is None else rows
    return w_ref[r0 + row_off:r0 + row_off + rows, 0:ncols]


# ----------------------------- shared math -----------------------------------
def _freq_enc_host(x):
    """Batch-major [s0,c0,s1,c1,...] encoding (wrapper-side only, for enc(1) fold)."""
    s = jnp.sin(math.pi * x)
    c = jnp.cos(math.pi * x)
    outs = [s, c]
    for _ in range(N_FREQ - 1):
        s, c = 2.0 * s * c, 2.0 * c * c - 1.0
        outs += [s, c]
    return jnp.concatenate(outs, axis=-1)


def _bilinear_weights(coord01, size):
    """Channels-first per-sample hat weights over `size` texels: (size, TB).

    Reproduces F.grid_sample(align_corners=False, padding_mode='border'):
    ix = coord01*size - 0.5, clamped to the border texel centers.
    """
    ix = jnp.clip(coord01 * float(size) - 0.5, 0.0, float(size - 1))     # (1, TB)
    idx = jax.lax.broadcasted_iota(jnp.int32, (size, 1), 0).astype(jnp.float32)
    return jnp.maximum(0.0, 1.0 - jnp.abs(ix - idx))                     # (size, TB)


# ------------------------------- kernel --------------------------------------
def volume_splitsum_kernel(x_ref, w_ref, out_ref):
    mm = lambda a, b: jnp.dot(a, b, preferred_element_type=jnp.float32)
    sat = lambda v: jnp.clip(v, 0.0, 1.0)

    feats = x_ref[0:N_POS_FEATS, :]                                      # (16, TB)
    vdir  = x_ref[N_POS_FEATS:N_POS_FEATS + 3, :]                        # (3, TB)
    N     = x_ref[N_POS_FEATS + 3:N_POS_FEATS + 6, :]                    # (3, TB)

    # reflect(N, view_dir) with the PRE-flip normal, then flip N / NdV
    NdmV = jnp.sum(N * (-vdir), axis=0, keepdims=True)                   # (1, TB)
    R = vdir + 2.0 * NdmV * N
    sgn = jnp.where(NdmV < 0.0, -1.0, 1.0)
    N = sgn * N
    NdV = sat(sgn * NdmV)

    # fused material + AO MLP; ONE sigmoid over all 11 channels
    h_ma = jnp.maximum(mm(_w(w_ref, "w_ma1"), feats) + _w(w_ref, "b_ma1"), 0.0)
    ma = jax.nn.sigmoid(mm(_w(w_ref, "w_ma2"), h_ma) + _w(w_ref, "b_ma2"))
    roughness = ma[0:1, :]
    metallic  = ma[1:2, :]
    albedo    = ma[2:5, :]
    ao        = ma[5:5 + AO_CH, :]

    # Fresnel
    F0 = 0.04 * (1.0 - metallic) + albedo * metallic
    t = sat(1.0 - NdV)
    t2 = t * t
    t5 = t2 * t2 * t
    Fr = F0 + (jnp.maximum(1.0 - roughness, F0) - F0) * t5
    Kd = (1.0 - Fr) * (1.0 - metallic)

    # one batched base-octave sin/cos; higher octaves via double-angle on the VPU
    base = jnp.concatenate([N, R, vdir, roughness], axis=0)              # (10, TB)
    s = jnp.sin(math.pi * base)
    c = jnp.cos(math.pi * base)

    # fused first layer of the three encoding MLPs
    # hidden rows: 0:32 diffuse(enc N) | 32:64 spec(enc R, enc rough) | 64:96 local
    h = mm(_w(w_ref, "w_feat"), feats) + _w(w_ref, "b_h")                # (96, TB)
    for k in range(N_FREQ):
        if k:
            s, c = 2.0 * s * c, 2.0 * c * c - 1.0
        h = h + mm(_w(w_ref, "a_enc", row_off=(2 * k) * HID3, rows=HID3), s)
        h = h + mm(_w(w_ref, "a_enc", row_off=(2 * k + 1) * HID3, rows=HID3), c)
    h = jnp.maximum(h, 0.0)

    out2 = mm(_w(w_ref, "w2"), h) + _w(w_ref, "b2")                      # (9, TB)
    diffuse_irr = out2[0:3, :]            # illum(enc(N), enc(1)); *pi//pi cancelled
    spec_irr    = out2[3:6, :]
    local       = out2[6:9, :]

    diffuse = Kd * albedo * diffuse_irr

    # split-sum BRDF LUT == bilinear grid_sample at (x=NdV, y=1-roughness);
    # both channels stacked into one (2H, W) block -> single matmul lookup.
    wx = _bilinear_weights(NdV, BRDF_W)                                  # (16, TB)
    wy = _bilinear_weights(1.0 - roughness, BRDF_H)                      # (16, TB)
    cb = mm(_w(w_ref, "brdf"), wx)                                       # (32, TB)
    env0 = jnp.sum(wy * cb[0:BRDF_H, :], axis=0, keepdims=True)
    env1 = jnp.sum(wy * cb[BRDF_H:, :], axis=0, keepdims=True)
    specular = spec_irr * (Fr * env0 + env1)

    raw_color = diffuse * ao[0:3, :] + specular * ao[3:6, :] + local

    # saturate(linear_to_srgb(raw_color))
    srgb = jnp.where(
        raw_color <= 0.0031308,
        12.92 * raw_color,
        1.055 * jnp.power(jnp.maximum(raw_color, 1e-8), 1.0 / 2.4) - 0.055)
    color = sat(srgb)

    # direct slice stores (row map above); lane axis stays dense/unmasked
    out_ref[0:3, :]   = raw_color
    out_ref[3:6, :]   = color
    out_ref[6:12, :]  = ao
    out_ref[12:13, :] = roughness
    out_ref[13:14, :] = metallic
    out_ref[14:17, :] = albedo
    out_ref[17:20, :] = Kd * albedo
    out_ref[20:23, :] = F0
    out_ref[23:26, :] = N
    out_ref[26:29, :] = R
    out_ref[29:32, :] = local


# --------------------------- wrapper-side packing -----------------------------
def _pack_weights(params, brdf_map):
    """Re-block all weights (channels-first / transposed) into one lane-padded slab."""
    wm1, bm1, wm2, bm2 = params["mat"]
    wa1, ba1, wa2, ba2 = params["ao"]
    wi1, bi1, wi2, bi2 = params["illum"]
    wl1, bl1, wl2, bl2 = params["local"]
    H = HIDDEN
    blocks = {}

    # fused material + AO MLP
    blocks["w_ma1"] = jnp.concatenate([wm1, wa1], axis=1).T              # (64, 16)
    blocks["b_ma1"] = jnp.concatenate([bm1, ba1], axis=1).T              # (64, 1)
    w_ma2 = jnp.zeros((N_MAT_FEATS + AO_CH, 2 * H), jnp.float32)
    w_ma2 = w_ma2.at[:N_MAT_FEATS, :H].set(wm2.T)
    w_ma2 = w_ma2.at[N_MAT_FEATS:, H:].set(wa2.T)
    blocks["w_ma2"] = w_ma2                                              # (11, 64)
    blocks["b_ma2"] = jnp.concatenate([bm2, ba2], axis=1).T              # (11, 1)

    # fused enc-MLPs (diffuse | specular | local): feature part
    w_feat = jnp.zeros((HID3, N_POS_FEATS), jnp.float32)
    w_feat = w_feat.at[2 * H:, :].set(wl1[:N_POS_FEATS].T)
    blocks["w_feat"] = w_feat                                            # (96, 16)

    # per-octave sin/cos blocks; input cols: N 0:3 | R 3:6 | vdir 6:9 | rough 9
    a_parts = []
    for k in range(N_FREQ):
        for trig in range(2):                                            # 0=sin, 1=cos
            A = jnp.zeros((HID3, N_ENC_IN), jnp.float32)
            dir_rows = wi1[6 * k + 3 * trig: 6 * k + 3 * trig + 3]       # (3, 32)
            rough_row = wi1[N_DIR_FEATS + 2 * k + trig:
                            N_DIR_FEATS + 2 * k + trig + 1]              # (1, 32)
            loc_rows = wl1[N_POS_FEATS + 6 * k + 3 * trig:
                           N_POS_FEATS + 6 * k + 3 * trig + 3]           # (3, 32)
            A = A.at[0:H, 0:3].set(dir_rows.T)                           # diffuse: enc(N)
            A = A.at[H:2 * H, 3:6].set(dir_rows.T)                       # spec: enc(R)
            A = A.at[H:2 * H, 9:10].set(rough_row.T)                     # spec: enc(rough)
            A = A.at[2 * H:, 6:9].set(loc_rows.T)                        # local: enc(vdir)
            a_parts.append(A)
    blocks["a_enc"] = jnp.concatenate(a_parts, axis=0)                   # (768, 10)

    # biases; the constant enc(1) of the diffuse call is folded into its bias
    enc_one = _freq_enc_host(jnp.ones((1, 1), jnp.float32))              # (1, 8)
    bi1_diff = bi1 + jnp.dot(enc_one, wi1[N_DIR_FEATS:])                 # (1, 32)
    blocks["b_h"] = jnp.concatenate([bi1_diff, bi1, bl1], axis=1).T      # (96, 1)

    # block-diagonal fused second layer: diffuse_irr(3) | spec_irr(3) | local(3)
    w2 = jnp.zeros((9, HID3), jnp.float32)
    w2 = w2.at[0:3, 0:H].set(wi2.T)
    w2 = w2.at[3:6, H:2 * H].set(wi2.T)
    w2 = w2.at[6:9, 2 * H:].set(wl2.T)
    blocks["w2"] = w2                                                    # (9, 96)
    blocks["b2"] = jnp.concatenate([bi2, bi2, bl2], axis=1).T            # (9, 1)

    # (1,3,H,W)-style BRDF LUT: channels 0/1 stacked along rows -> (2H, W)
    blocks["brdf"] = jnp.concatenate([brdf_map[0], brdf_map[1]], axis=0)

    slab = jnp.zeros((_SLAB_ROWS, SLAB_LANES), jnp.float32)
    for name, (r0, shape) in _SLAB_LAYOUT.items():
        assert blocks[name].shape == shape, (name, blocks[name].shape, shape)
        slab = slab.at[r0:r0 + shape[0], 0:shape[1]].set(blocks[name])
    return slab


def _choose_tiling(B):
    """Pick (b_pad, tb): lane-tile-aligned, grid even (>=4 when possible) for v7x."""
    b_pad = _round_up(max(B, 1), 256)

    def pick(min_steps):
        for cand in range(TB_MAX, 127, -128):
            if b_pad % cand == 0:
                steps = b_pad // cand
                if steps % 2 == 0 and steps >= min_steps:
                    return cand
        return None

    tb = pick(4) or pick(2) or 128
    return b_pad, tb


@jax.jit
def volume_splitsum_forward(features, view_dir, N, brdf_map, params):
    """features: (B, 16), view_dir/N: (B, 3), brdf_map: (3, H, W)."""
    B = features.shape[0]
    b_pad, tb = _choose_tiling(B)
    grid = (b_pad // tb,)

    # channels-first input slab: one concatenate + pad (one lane-dense DMA/tile)
    x = jnp.concatenate(
        [features.T, view_dir.T, N.T,
         jnp.zeros((IN_DIM - (N_POS_FEATS + 6), B), jnp.float32)], axis=0)   # (24, B)
    x = jnp.pad(x, ((0, 0), (0, b_pad - B)))

    slab = _pack_weights(params, brdf_map)

    flops_per_pt = 2 * (2 * HIDDEN * N_POS_FEATS
                        + (N_MAT_FEATS + AO_CH) * 2 * HIDDEN
                        + HID3 * N_POS_FEATS
                        + 2 * N_FREQ * HID3 * N_ENC_IN
                        + 9 * HID3
                        + 2 * BRDF_H * BRDF_W)
    cost = pl.CostEstimate(
        flops=flops_per_pt * b_pad,
        transcendentals=(2 * N_ENC_IN + (N_MAT_FEATS + AO_CH) + 3) * b_pad,
        bytes_accessed=4 * (b_pad * (IN_DIM + OUT_DIM)
                            + _SLAB_ROWS * SLAB_LANES))   # weights resident, one DMA

    out = pl.pallas_call(
        volume_splitsum_kernel,
        out_shape=jax.ShapeDtypeStruct((OUT_DIM, b_pad), jnp.float32),
        grid_spec=pltpu.PrefetchScalarGridSpec(
            num_scalar_prefetch=0,
            grid=grid,
            in_specs=[pl.BlockSpec((IN_DIM, tb), lambda i: (0, i)),
                      pl.BlockSpec((_SLAB_ROWS, SLAB_LANES), lambda i: (0, 0))],
            out_specs=pl.BlockSpec((OUT_DIM, tb), lambda i: (0, i)),
        ),
        compiler_params=pltpu.CompilerParams(
            dimension_semantics=("parallel",)),
        cost_estimate=cost,
    )(x, slab)

    packed = out[:, :B].T                                  # back to (B, 32)
    return {
        "raw_color": packed[:, 0:3], "color": packed[:, 3:6], "ao": packed[:, 6:12],
        "roughness": packed[:, 12:13], "metallic": packed[:, 13:14],
        "albedo": packed[:, 14:17], "KdA": packed[:, 17:20], "F0": packed[:, 20:23],
        "N": packed[:, 23:26], "R": packed[:, 26:29], "local": packed[:, 29:32],
        "view_dir": view_dir,
        "_packed": packed,
    }


# ------------------- naive reference (validates the fused algebra) ------------
def reference_forward(features, view_dir, N, brdf_map, params):
    wm1, bm1, wm2, bm2 = params["mat"]
    wa1, ba1, wa2, ba2 = params["ao"]
    wi1, bi1, wi2, bi2 = params["illum"]
    wl1, bl1, wl2, bl2 = params["local"]

    def enc(x):
        outs = []
        for k in range(N_FREQ):
            a = (2.0 ** k) * math.pi * x
            outs += [jnp.sin(a), jnp.cos(a)]
        return jnp.concatenate(outs, axis=-1)

    def mlp(x, w1, b1, w2, b2):
        h = jnp.maximum(jnp.dot(x, w1) + b1, 0.0)
        return jnp.dot(h, w2) + b2

    def dot3(a, b): return jnp.sum(a * b, axis=-1, keepdims=True)
    def saturate(v): return jnp.clip(v, 0.0, 1.0)
    sigm = jax.nn.sigmoid

    vdir = view_dir
    NdmV = dot3(N, -vdir)
    R = vdir + 2.0 * NdmV * N
    flip = NdmV < 0.0
    Nf = jnp.where(flip, -N, N)
    NdV = saturate(jnp.where(flip, -NdmV, NdmV))

    materials = mlp(features, wm1, bm1, wm2, bm2)
    roughness = sigm(materials[:, 0:1])
    metallic = sigm(materials[:, 1:2])
    albedo = sigm(materials[:, 2:5])
    ao = sigm(mlp(features, wa1, ba1, wa2, ba2))

    F0 = 0.04 * (1.0 - metallic) + albedo * metallic
    t = saturate(1.0 - NdV)
    t5 = t ** 5
    Fr = F0 + (jnp.maximum(1.0 - roughness, F0) - F0) * t5
    Kd = (1.0 - Fr) * (1.0 - metallic)

    diffuse_irr = mlp(jnp.concatenate([enc(Nf), enc(jnp.ones_like(roughness))], -1),
                      wi1, bi1, wi2, bi2) * math.pi
    diffuse = Kd * albedo * diffuse_irr / math.pi
    spec_irr = mlp(jnp.concatenate([enc(R), enc(roughness)], -1), wi1, bi1, wi2, bi2)

    def bil(c, size):
        ix = jnp.clip(c * size - 0.5, 0.0, size - 1.0)
        idx = jnp.arange(size, dtype=jnp.float32)[None, :]
        return jnp.maximum(0.0, 1.0 - jnp.abs(ix - idx))

    wx = bil(NdV, BRDF_W)
    wy = bil(1.0 - roughness, BRDF_H)
    brdf0 = jnp.transpose(brdf_map[0], (1, 0))
    brdf1 = jnp.transpose(brdf_map[1], (1, 0))
    env0 = jnp.sum(wy * (wx @ brdf0), -1, keepdims=True)
    env1 = jnp.sum(wy * (wx @ brdf1), -1, keepdims=True)
    specular = spec_irr * (Fr * env0 + env1)

    raw_color = diffuse * ao[:, 0:3] + specular * ao[:, 3:6]
    local = mlp(jnp.concatenate([features, enc(vdir)], -1), wl1, bl1, wl2, bl2)
    raw_color = raw_color + local
    srgb = jnp.where(raw_color <= 0.0031308, 12.92 * raw_color,
                     1.055 * jnp.power(jnp.maximum(raw_color, 1e-8), 1.0 / 2.4) - 0.055)
    color = saturate(srgb)
    return jnp.concatenate([raw_color, color, ao, roughness, metallic, albedo,
                            Kd * albedo, F0, Nf, R, local], axis=-1)


# --------------------------- deterministic params -----------------------------
def init_params(key):
    def linear(k, fan_in, fan_out):
        k1, k2 = jax.random.split(k)
        w = jax.random.normal(k1, (fan_in, fan_out), jnp.float32) / jnp.sqrt(
            jnp.float32(fan_in))
        b = 0.01 * jax.random.normal(k2, (1, fan_out), jnp.float32)
        return w, b

    ks = jax.random.split(key, 8)
    return {
        "mat":   linear(ks[0], N_POS_FEATS, HIDDEN) + linear(ks[1], HIDDEN, N_MAT_FEATS),
        "ao":    linear(ks[2], N_POS_FEATS, HIDDEN) + linear(ks[3], HIDDEN, AO_CH),
        "illum": linear(ks[4], N_DIR_FEATS + N_ROUGH_FEATS, HIDDEN) + linear(ks[5], HIDDEN, 3),
        "local": linear(ks[6], N_POS_FEATS + N_DIR_FEATS, HIDDEN) + linear(ks[7], HIDDEN, 3),
    }


# ----------------------------------- main -------------------------------------
if __name__ == "__main__":
    import numpy as np

    key = jax.random.PRNGKey(0)
    k_feat, k_dir, k_n, k_brdf, k_param = jax.random.split(key, 5)

    B = 2048                               # -> grid = 4 tiles of TB=512
    features = jax.random.normal(k_feat, (B, N_POS_FEATS), jnp.float32)
    view_dir = jax.random.normal(k_dir, (B, 3), jnp.float32)
    view_dir = view_dir / jnp.linalg.norm(view_dir, axis=-1, keepdims=True)
    N = jax.random.normal(k_n, (B, 3), jnp.float32)
    N = N / jnp.linalg.norm(N, axis=-1, keepdims=True)

    # synthetic split-sum BRDF LUT (stand-in for the (1,3,H,W) HDR buffer)
    brdf_map = jax.random.uniform(k_brdf, (3, BRDF_H, BRDF_W), jnp.float32)

    params = init_params(k_param)

    out = volume_splitsum_forward(features, view_dir, N, brdf_map, params)
    out = jax.block_until_ready(out)

    packed = np.asarray(out["_packed"])
    assert packed.shape == (B, OUT_DIM)
    assert np.all(np.isfinite(packed))

    ref = np.asarray(reference_forward(features, view_dir, N, brdf_map, params))
    # loose tolerance: MXU f32 passes, fused-layer summation order, double-angle
    # recurrence, and the cancelled *pi//pi pair vs the straightforward reference
    np.testing.assert_allclose(packed, ref, rtol=2e-2, atol=2e-2)

    print("KERNEL_OK")
</pallas_src>

<mosaic_0001>
module attributes {stable_mosaic.version = 11 : i64} {
  func.func @volume_splitsum_kernel(%arg0: i32, %arg1: memref<24x512xf32, #tpu.memory_space<vmem>>, %arg2: memref<1184x128xf32, #tpu.memory_space<vmem>>, %arg3: memref<32x512xf32, #tpu.memory_space<vmem>>) attributes {dimension_semantics = [#tpu.dimension_semantics<parallel>], iteration_bounds = array<i64: 4>, scalar_prefetch = 0 : i64, scratch_operands = 0 : i64, tpu.core_type = #tpu.core_type<tc>, window_params = [{transform_indices = @transform_0, window_bounds = array<i64: 24, 512>}, {pipeline_mode = #tpu.pipeline_mode<synchronous>, transform_indices = @transform_1, window_bounds = array<i64: 1184, 128>}, {transform_indices = @transform_2, window_bounds = array<i64: 32, 512>}]} {
    %c0 = arith.constant 0 : index
    %c0_0 = arith.constant 0 : index
    %0 = vector.load %arg1[%c0, %c0_0] : memref<24x512xf32, #tpu.memory_space<vmem>>, vector<16x512xf32>
    %c16 = arith.constant 16 : index
    %c0_1 = arith.constant 0 : index
    %1 = vector.load %arg1[%c16, %c0_1] : memref<24x512xf32, #tpu.memory_space<vmem>>, vector<3x512xf32>
    %c19 = arith.constant 19 : index
    %c0_2 = arith.constant 0 : index
    %2 = vector.load %arg1[%c19, %c0_2] : memref<24x512xf32, #tpu.memory_space<vmem>>, vector<3x512xf32>
    %cst = arith.constant 0.000000e+00 : f32
    %3 = vector.broadcast %cst : f32 to vector<3x512xf32>
    %4 = arith.subf %3, %1 : vector<3x512xf32>
    %5 = arith.mulf %2, %4 : vector<3x512xf32>
    %cst_3 = arith.constant dense<0.000000e+00> : vector<512xf32>
    %6 = vector.multi_reduction <add>, %5, %cst_3 [0] : vector<3x512xf32> to vector<512xf32>
    %7 = vector.shape_cast %6 : vector<512xf32> to vector<1x512xf32>
    %cst_4 = arith.constant 2.000000e+00 : f32
    %8 = vector.broadcast %cst_4 : f32 to vector<1x512xf32>
    %9 = arith.mulf %8, %7 : vector<1x512xf32>
    %10 = vector.broadcast %9 : vector<1x512xf32> to vector<3x512xf32>
    %11 = arith.mulf %10, %2 : vector<3x512xf32>
    %12 = arith.addf %1, %11 : vector<3x512xf32>
    %cst_5 = arith.constant 0.000000e+00 : f32
    %13 = vector.broadcast %cst_5 : f32 to vector<1x512xf32>
    %14 = arith.cmpf olt, %7, %13 : vector<1x512xf32>
    %cst_6 = arith.constant -1.000000e+00 : f32
    %cst_7 = arith.constant 1.000000e+00 : f32
    %15 = vector.broadcast %cst_6 : f32 to vector<1x512xf32>
    %16 = vector.broadcast %cst_7 : f32 to vector<1x512xf32>
    %17 = arith.select %14, %15, %16 : vector<1x512xi1>, vector<1x512xf32>
    %18 = vector.broadcast %17 : vector<1x512xf32> to vector<3x512xf32>
    %19 = arith.mulf %18, %2 : vector<3x512xf32>
    %20 = arith.mulf %17, %7 : vector<1x512xf32>
    %cst_8 = arith.constant 0.000000e+00 : f32
    %cst_9 = arith.constant 1.000000e+00 : f32
    %21 = vector.broadcast %cst_8 : f32 to vector<1x512xf32>
    %22 = arith.maximumf %21, %20 : vector<1x512xf32>
    %23 = vector.broadcast %cst_9 : f32 to vector<1x512xf32>
    %24 = arith.minimumf %23, %22 : vector<1x512xf32>
    %c0_10 = arith.constant 0 : index
    %c0_11 = arith.constant 0 : index
    %25 = vector.load %arg2[%c0_10, %c0_11] : memref<1184x128xf32, #tpu.memory_space<vmem>>, vector<64x16xf32>
    %cst_12 = arith.constant dense<0.000000e+00> : vector<64x512xf32>
    %26 = tpu.matmul %25, %0, %cst_12 {dimension_numbers = #tpu.dot_dimension_numbers<[1], [0], [0], [1], [0, 0, 1, 1], [], []>} : vector<64x16xf32>, vector<16x512xf32>, vector<64x512xf32> -> vector<64x512xf32>
    %c64 = arith.constant 64 : index
    %c0_13 = arith.constant 0 : index
    %27 = vector.load %arg2[%c64, %c0_13] : memref<1184x128xf32, #tpu.memory_space<vmem>>, vector<64x1xf32>
    %28 = vector.broadcast %27 : vector<64x1xf32> to vector<64x512xf32>
    %29 = arith.addf %26, %28 : vector<64x512xf32>
    %cst_14 = arith.constant 0.000000e+00 : f32
    %30 = vector.broadcast %cst_14 : f32 to vector<64x512xf32>
    %31 = arith.maximumf %29, %30 : vector<64x512xf32>
    %c128 = arith.constant 128 : index
    %c0_15 = arith.constant 0 : index
    %32 = vector.load %arg2[%c128, %c0_15] : memref<1184x128xf32, #tpu.memory_space<vmem>>, vector<11x64xf32>
    %cst_16 = arith.constant dense<0.000000e+00> : vector<11x512xf32>
    %33 = tpu.matmul %32, %31, %cst_16 {dimension_numbers = #tpu.dot_dimension_numbers<[1], [0], [0], [1], [0, 0, 1, 1], [], []>} : vector<11x64xf32>, vector<64x512xf32>, vector<11x512xf32> -> vector<11x512xf32>
    %c144 = arith.constant 144 : index
    %c0_17 = arith.constant 0 : index
    %34 = vector.load %arg2[%c144, %c0_17] : memref<1184x128xf32, #tpu.memory_space<vmem>>, vector<11x1xf32>
    %35 = vector.broadcast %34 : vector<11x1xf32> to vector<11x512xf32>
    %36 = arith.addf %33, %35 : vector<11x512xf32>
    %37 = arith.negf %36 : vector<11x512xf32>
    %38 = math.exp %37 : vector<11x512xf32>
    %cst_18 = arith.constant 1.000000e+00 : f32
    %39 = vector.broadcast %cst_18 : f32 to vector<11x512xf32>
    %40 = arith.addf %39, %38 : vector<11x512xf32>
    %41 = arith.divf %39, %40 : vector<11x512xf32>
    %42 = vector.extract_strided_slice %41 {offsets = [0, 0], sizes = [1, 512], strides = [1, 1]} : vector<11x512xf32> to vector<1x512xf32>
    %43 = vector.extract_strided_slice %41 {offsets = [1, 0], sizes = [1, 512], strides = [1, 1]} : vector<11x512xf32> to vector<1x512xf32>
    %44 = vector.extract_strided_slice %41 {offsets = [2, 0], sizes = [3, 512], strides = [1, 1]} : vector<11x512xf32> to vector<3x512xf32>
    %45 = vector.extract_strided_slice %41 {offsets = [5, 0], sizes = [6, 512], strides = [1, 1]} : vector<11x512xf32> to vector<6x512xf32>
    %cst_19 = arith.constant 1.000000e+00 : f32
    %46 = vector.broadcast %cst_19 : f32 to vector<1x512xf32>
    %47 = arith.subf %46, %43 : vector<1x512xf32>
    %cst_20 = arith.constant 4.000000e-02 : f32
    %48 = vector.broadcast %cst_20 : f32 to vector<1x512xf32>
    %49 = arith.mulf %48, %47 : vector<1x512xf32>
    %50 = vector.broadcast %43 : vector<1x512xf32> to vector<3x512xf32>
    %51 = arith.mulf %44, %50 : vector<3x512xf32>
    %52 = vector.broadcast %49 : vector<1x512xf32> to vector<3x512xf32>
    %53 = arith.addf %52, %51 : vector<3x512xf32>
    %cst_21 = arith.constant 1.000000e+00 : f32
    %54 = vector.broadcast %cst_21 : f32 to vector<1x512xf32>
    %55 = arith.subf %54, %24 : vector<1x512xf32>
    %cst_22 = arith.constant 0.000000e+00 : f32
    %cst_23 = arith.constant 1.000000e+00 : f32
    %56 = vector.broadcast %cst_22 : f32 to vector<1x512xf32>
    %57 = arith.maximumf %56, %55 : vector<1x512xf32>
    %58 = vector.broadcast %cst_23 : f32 to vector<1x512xf32>
    %59 = arith.minimumf %58, %57 : vector<1x512xf32>
    %60 = arith.mulf %59, %59 : vector<1x512xf32>
    %61 = arith.mulf %60, %60 : vector<1x512xf32>
    %62 = arith.mulf %61, %59 : vector<1x512xf32>
    %cst_24 = arith.constant 1.000000e+00 : f32
    %63 = vector.broadcast %cst_24 : f32 to vector<1x512xf32>
    %64 = arith.subf %63, %42 : vector<1x512xf32>
    %65 = vector.broadcast %64 : vector<1x512xf32> to vector<3x512xf32>
    %66 = arith.maximumf %65, %53 : vector<3x512xf32>
    %67 = arith.subf %66, %53 : vector<3x512xf32>
    %68 = vector.broadcast %62 : vector<1x512xf32> to vector<3x512xf32>
    %69 = arith.mulf %67, %68 : vector<3x512xf32>
    %70 = arith.addf %53, %69 : vector<3x512xf32>
    %cst_25 = arith.constant 1.000000e+00 : f32
    %71 = vector.broadcast %cst_25 : f32 to vector<3x512xf32>
    %72 = arith.subf %71, %70 : vector<3x512xf32>
    %cst_26 = arith.constant 1.000000e+00 : f32
    %73 = vector.broadcast %cst_26 : f32 to vector<1x512xf32>
    %74 = arith.subf %73, %43 : vector<1x512xf32>
    %75 = vector.broadcast %74 : vector<1x512xf32> to vector<3x512xf32>
    %76 = arith.mulf %72, %75 : vector<3x512xf32>
    %77 = tpu.concatenate %19, %12, %1, %42 in 0 : vector<3x512xf32>, vector<3x512xf32>, vector<3x512xf32>, vector<1x512xf32> -> vector<10x512xf32>
    %cst_27 = arith.constant 3.14159274 : f32
    %78 = vector.broadcast %cst_27 : f32 to vector<10x512xf32>
    %79 = arith.mulf %78, %77 : vector<10x512xf32>
    %80 = math.sin %79 : vector<10x512xf32>
    %cst_28 = arith.constant 3.14159274 : f32
    %81 = vector.broadcast %cst_28 : f32 to vector<10x512xf32>
    %82 = arith.mulf %81, %77 : vector<10x512xf32>
    %83 = math.cos %82 : vector<10x512xf32>
    %c160 = arith.constant 160 : index
    %c0_29 = arith.constant 0 : index
    %84 = vector.load %arg2[%c160, %c0_29] : memref<1184x128xf32, #tpu.memory_space<vmem>>, vector<96x16xf32>
    %cst_30 = arith.constant dense<0.000000e+00> : vector<96x512xf32>
    %85 = tpu.matmul %84, %0, %cst_30 {dimension_numbers = #tpu.dot_dimension_numbers<[1], [0], [0], [1], [0, 0, 1, 1], [], []>} : vector<96x16xf32>, vector<16x512xf32>, vector<96x512xf32> -> vector<96x512xf32>
    %c1024 = arith.constant 1024 : index
    %c0_31 = arith.constant 0 : index
    %86 = vector.load %arg2[%c1024, %c0_31] : memref<1184x128xf32, #tpu.memory_space<vmem>>, vector<96x1xf32>
    %87 = vector.broadcast %86 : vector<96x1xf32> to vector<96x512xf32>
    %88 = arith.addf %85, %87 : vector<96x512xf32>
    %c256 = arith.constant 256 : index
    %c0_32 = arith.constant 0 : index
    %89 = vector.load %arg2[%c256, %c0_32] : memref<1184x128xf32, #tpu.memory_space<vmem>>, vector<96x10xf32>
    %cst_33 = arith.constant dense<0.000000e+00> : vector<96x512xf32>
    %90 = tpu.matmul %89, %80, %cst_33 {dimension_numbers = #tpu.dot_dimension_numbers<[1], [0], [0], [1], [0, 0, 1, 1], [], []>} : vector<96x10xf32>, vector<10x512xf32>, vector<96x512xf32> -> vector<96x512xf32>
    %91 = arith.addf %88, %90 : vector<96x512xf32>
    %c352 = arith.constant 352 : index
    %c0_34 = arith.constant 0 : index
    %92 = vector.load %arg2[%c352, %c0_34] : memref<1184x128xf32, #tpu.memory_space<vmem>>, vector<96x10xf32>
    %cst_35 = arith.constant dense<0.000000e+00> : vector<96x512xf32>
    %93 = tpu.matmul %92, %83, %cst_35 {dimension_numbers = #tpu.dot_dimension_numbers<[1], [0], [0], [1], [0, 0, 1, 1], [], []>} : vector<96x10xf32>, vector<10x512xf32>, vector<96x512xf32> -> vector<96x512xf32>
    %94 = arith.addf %91, %93 : vector<96x512xf32>
    %cst_36 = arith.constant 2.000000e+00 : f32
    %95 = vector.broadcast %cst_36 : f32 to vector<10x512xf32>
    %96 = arith.mulf %95, %80 : vector<10x512xf32>
    %97 = arith.mulf %96, %83 : vector<10x512xf32>
    %cst_37 = arith.constant 2.000000e+00 : f32
    %98 = vector.broadcast %cst_37 : f32 to vector<10x512xf32>
    %99 = arith.mulf %98, %83 : vector<10x512xf32>
    %100 = arith.mulf %99, %83 : vector<10x512xf32>
    %cst_38 = arith.constant 1.000000e+00 : f32
    %101 = vector.broadcast %cst_38 : f32 to vector<10x512xf32>
    %102 = arith.subf %100, %101 : vector<10x512xf32>
    %c448 = arith.constant 448 : index
    %c0_39 = arith.constant 0 : index
    %103 = vector.load %arg2[%c448, %c0_39] : memref<1184x128xf32, #tpu.memory_space<vmem>>, vector<96x10xf32>
    %cst_40 = arith.constant dense<0.000000e+00> : vector<96x512xf32>
    %104 = tpu.matmul %103, %97, %cst_40 {dimension_numbers = #tpu.dot_dimension_numbers<[1], [0], [0], [1], [0, 0, 1, 1], [], []>} : vector<96x10xf32>, vector<10x512xf32>, vector<96x512xf32> -> vector<96x512xf32>
    %105 = arith.addf %94, %104 : vector<96x512xf32>
    %c544 = arith.constant 544 : index
    %c0_41 = arith.constant 0 : index
    %106 = vector.load %arg2[%c544, %c0_41] : memref<1184x128xf32, #tpu.memory_space<vmem>>, vector<96x10xf32>
    %cst_42 = arith.constant dense<0.000000e+00> : vector<96x512xf32>
    %107 = tpu.matmul %106, %102, %cst_42 {dimension_numbers = #tpu.dot_dimension_numbers<[1], [0], [0], [1], [0, 0, 1, 1], [], []>} : vector<96x10xf32>, vector<10x512xf32>, vector<96x512xf32> -> vector<96x512xf32>
    %108 = arith.addf %105, %107 : vector<96x512xf32>
    %cst_43 = arith.constant 2.000000e+00 : f32
    %109 = vector.broadcast %cst_43 : f32 to vector<10x512xf32>
    %110 = arith.mulf %109, %97 : vector<10x512xf32>
    %111 = arith.mulf %110, %102 : vector<10x512xf32>
    %cst_44 = arith.constant 2.000000e+00 : f32
    %112 = vector.broadcast %cst_44 : f32 to vector<10x512xf32>
    %113 = arith.mulf %112, %102 : vector<10x512xf32>
    %114 = arith.mulf %113, %102 : vector<10x512xf32>
    %cst_45 = arith.constant 1.000000e+00 : f32
    %115 = vector.broadcast %cst_45 : f32 to vector<10x512xf32>
    %116 = arith.subf %114, %115 : vector<10x512xf32>
    %c640 = arith.constant 640 : index
    %c0_46 = arith.constant 0 : index
    %117 = vector.load %arg2[%c640, %c0_46] : memref<1184x128xf32, #tpu.memory_space<vmem>>, vector<96x10xf32>
    %cst_47 = arith.constant dense<0.000000e+00> : vector<96x512xf32>
    %118 = tpu.matmul %117, %111, %cst_47 {dimension_numbers = #tpu.dot_dimension_numbers<[1], [0], [0], [1], [0, 0, 1, 1], [], []>} : vector<96x10xf32>, vector<10x512xf32>, vector<96x512xf32> -> vector<96x512xf32>
    %119 = arith.addf %108, %118 : vector<96x512xf32>
    %c736 = arith.constant 736 : index
    %c0_48 = arith.constant 0 : index
    %120 = vector.load %arg2[%c736, %c0_48] : memref<1184x128xf32, #tpu.memory_space<vmem>>, vector<96x10xf32>
    %cst_49 = arith.constant dense<0.000000e+00> : vector<96x512xf32>
    %121 = tpu.matmul %120, %116, %cst_49 {dimension_numbers = #tpu.dot_dimension_numbers<[1], [0], [0], [1], [0, 0, 1, 1], [], []>} : vector<96x10xf32>, vector<10x512xf32>, vector<96x512xf32> -> vector<96x512xf32>
    %122 = arith.addf %119, %121 : vector<96x512xf32>
    %cst_50 = arith.constant 2.000000e+00 : f32
    %123 = vector.broadcast %cst_50 : f32 to vector<10x512xf32>
    %124 = arith.mulf %123, %111 : vector<10x512xf32>
    %125 = arith.mulf %124, %116 : vector<10x512xf32>
    %cst_51 = arith.constant 2.000000e+00 : f32
    %126 = vector.broadcast %cst_51 : f32 to vector<10x512xf32>
    %127 = arith.mulf %126, %116 : vector<10x512xf32>
    %128 = arith.mulf %127, %116 : vector<10x512xf32>
    %cst_52 = arith.constant 1.000000e+00 : f32
    %129 = vector.broadcast %cst_52 : f32 to vector<10x512xf32>
    %130 = arith.subf %128, %129 : vector<10x512xf32>
    %c832 = arith.constant 832 : index
    %c0_53 = arith.constant 0 : index
    %131 = vector.load %arg2[%c832, %c0_53] : memref<1184x128xf32, #tpu.memory_space<vmem>>, vector<96x10xf32>
    %cst_54 = arith.constant dense<0.000000e+00> : vector<96x512xf32>
    %132 = tpu.matmul %131, %125, %cst_54 {dimension_numbers = #tpu.dot_dimension_numbers<[1], [0], [0], [1], [0, 0, 1, 1], [], []>} : vector<96x10xf32>, vector<10x512xf32>, vector<96x512xf32> -> vector<96x512xf32>
    %133 = arith.addf %122, %132 : vector<96x512xf32>
    %c928 = arith.constant 928 : index
    %c0_55 = arith.constant 0 : index
    %134 = vector.load %arg2[%c928, %c0_55] : memref<1184x128xf32, #tpu.memory_space<vmem>>, vector<96x10xf32>
    %cst_56 = arith.constant dense<0.000000e+00> : vector<96x512xf32>
    %135 = tpu.matmul %134, %130, %cst_56 {dimension_numbers = #tpu.dot_dimension_numbers<[1], [0], [0], [1], [0, 0, 1, 1], [], []>} : vector<96x10xf32>, vector<10x512xf32>, vector<96x512xf32> -> vector<96x512xf32>
    %136 = arith.addf %133, %135 : vector<96x512xf32>
    %cst_57 = arith.constant 0.000000e+00 : f32
    %137 = vector.broadcast %cst_57 : f32 to vector<96x512xf32>
    %138 = arith.maximumf %136, %137 : vector<96x512xf32>
    %c1120 = arith.constant 1120 : index
    %c0_58 = arith.constant 0 : index
    %139 = vector.load %arg2[%c1120, %c0_58] : memref<1184x128xf32, #tpu.memory_space<vmem>>, vector<9x96xf32>
    %cst_59 = arith.constant dense<0.000000e+00> : vector<9x512xf32>
    %140 = tpu.matmul %139, %138, %cst_59 {dimension_numbers = #tpu.dot_dimension_numbers<[1], [0], [0], [1], [0, 0, 1, 1], [], []>} : vector<9x96xf32>, vector<96x512xf32>, vector<9x512xf32> -> vector<9x512xf32>
    %c1136 = arith.constant 1136 : index
    %c0_60 = arith.constant 0 : index
    %141 = vector.load %arg2[%c1136, %c0_60] : memref<1184x128xf32, #tpu.memory_space<vmem>>, vector<9x1xf32>
    %142 = vector.broadcast %141 : vector<9x1xf32> to vector<9x512xf32>
    %143 = arith.addf %140, %142 : vector<9x512xf32>
    %144 = vector.extract_strided_slice %143 {offsets = [0, 0], sizes = [3, 512], strides = [1, 1]} : vector<9x512xf32> to vector<3x512xf32>
    %145 = vector.extract_strided_slice %143 {offsets = [3, 0], sizes = [3, 512], strides = [1, 1]} : vector<9x512xf32> to vector<3x512xf32>
    %146 = vector.extract_strided_slice %143 {offsets = [6, 0], sizes = [3, 512], strides = [1, 1]} : vector<9x512xf32> to vector<3x512xf32>
    %147 = arith.mulf %76, %44 : vector<3x512xf32>
    %148 = arith.mulf %147, %144 : vector<3x512xf32>
    %cst_61 = arith.constant 1.600000e+01 : f32
    %149 = vector.broadcast %cst_61 : f32 to vector<1x512xf32>
    %150 = arith.mulf %24, %149 : vector<1x512xf32>
    %cst_62 = arith.constant 5.000000e-01 : f32
    %151 = vector.broadcast %cst_62 : f32 to vector<1x512xf32>
    %152 = arith.subf %150, %151 : vector<1x512xf32>
    %cst_63 = arith.constant 0.000000e+00 : f32
    %cst_64 = arith.constant 1.500000e+01 : f32
    %153 = vector.broadcast %cst_63 : f32 to vector<1x512xf32>
    %154 = arith.maximumf %153, %152 : vector<1x512xf32>
    %155 = vector.broadcast %cst_64 : f32 to vector<1x512xf32>
    %156 = arith.minimumf %155, %154 : vector<1x512xf32>
    %157 = tpu.iota {dimensions = array<i32: 0>} : vector<16x1xi32>
    %158 = arith.sitofp %157 : vector<16x1xi32> to vector<16x1xf32>
    %159 = vector.broadcast %156 : vector<1x512xf32> to vector<16x512xf32>
    %160 = vector.broadcast %158 : vector<16x1xf32> to vector<16x512xf32>
    %161 = arith.subf %159, %160 : vector<16x512xf32>
    %162 = math.absf %161 : vector<16x512xf32>
    %cst_65 = arith.constant 1.000000e+00 : f32
    %163 = vector.broadcast %cst_65 : f32 to vector<16x512xf32>
    %164 = arith.subf %163, %162 : vector<16x512xf32>
    %cst_66 = arith.constant 0.000000e+00 : f32
    %165 = vector.broadcast %cst_66 : f32 to vector<16x512xf32>
    %166 = arith.maximumf %165, %164 : vector<16x512xf32>
    %cst_67 = arith.constant 1.000000e+00 : f32
    %167 = vector.broadcast %cst_67 : f32 to vector<1x512xf32>
    %168 = arith.subf %167, %42 : vector<1x512xf32>
    %cst_68 = arith.constant 1.600000e+01 : f32
    %169 = vector.broadcast %cst_68 : f32 to vector<1x512xf32>
    %170 = arith.mulf %168, %169 : vector<1x512xf32>
    %cst_69 = arith.constant 5.000000e-01 : f32
    %171 = vector.broadcast %cst_69 : f32 to vector<1x512xf32>
    %172 = arith.subf %170, %171 : vector<1x512xf32>
    %cst_70 = arith.constant 0.000000e+00 : f32
    %cst_71 = arith.constant 1.500000e+01 : f32
    %173 = vector.broadcast %cst_70 : f32 to vector<1x512xf32>
    %174 = arith.maximumf %173, %172 : vector<1x512xf32>
    %175 = vector.broadcast %cst_71 : f32 to vector<1x512xf32>
    %176 = arith.minimumf %175, %174 : vector<1x512xf32>
    %177 = tpu.iota {dimensions = array<i32: 0>} : vector<16x1xi32>
    %178 = arith.sitofp %177 : vector<16x1xi32> to vector<16x1xf32>
    %179 = vector.broadcast %176 : vector<1x512xf32> to vector<16x512xf32>
    %180 = vector.broadcast %178 : vector<16x1xf32> to vector<16x512xf32>
    %181 = arith.subf %179, %180 : vector<16x512xf32>
    %182 = math.absf %181 : vector<16x512xf32>
    %cst_72 = arith.constant 1.000000e+00 : f32
    %183 = vector.broadcast %cst_72 : f32 to vector<16x512xf32>
    %184 = arith.subf %183, %182 : vector<16x512xf32>
    %cst_73 = arith.constant 0.000000e+00 : f32
    %185 = vector.broadcast %cst_73 : f32 to vector<16x512xf32>
    %186 = arith.maximumf %185, %184 : vector<16x512xf32>
    %c1152 = arith.constant 1152 : index
    %c0_74 = arith.constant 0 : index
    %187 = vector.load %arg2[%c1152, %c0_74] : memref<1184x128xf32, #tpu.memory_space<vmem>>, vector<32x16xf32>
    %cst_75 = arith.constant dense<0.000000e+00> : vector<32x512xf32>
    %188 = tpu.matmul %187, %166, %cst_75 {dimension_numbers = #tpu.dot_dimension_numbers<[1], [0], [0], [1], [0, 0, 1, 1], [], []>} : vector<32x16xf32>, vector<16x512xf32>, vector<32x512xf32> -> vector<32x512xf32>
    %189 = vector.extract_strided_slice %188 {offsets = [0, 0], sizes = [16, 512], strides = [1, 1]} : vector<32x512xf32> to vector<16x512xf32>
    %190 = arith.mulf %186, %189 : vector<16x512xf32>
    %cst_76 = arith.constant dense<0.000000e+00> : vector<512xf32>
    %191 = vector.multi_reduction <add>, %190, %cst_76 [0] : vector<16x512xf32> to vector<512xf32>
    %192 = vector.shape_cast %191 : vector<512xf32> to vector<1x512xf32>
    %193 = vector.extract_strided_slice %188 {offsets = [16, 0], sizes = [16, 512], strides = [1, 1]} : vector<32x512xf32> to vector<16x512xf32>
    %194 = arith.mulf %186, %193 : vector<16x512xf32>
    %cst_77 = arith.constant dense<0.000000e+00> : vector<512xf32>
    %195 = vector.multi_reduction <add>, %194, %cst_77 [0] : vector<16x512xf32> to vector<512xf32>
    %196 = vector.shape_cast %195 : vector<512xf32> to vector<1x512xf32>
    %197 = vector.broadcast %192 : vector<1x512xf32> to vector<3x512xf32>
    %198 = arith.mulf %70, %197 : vector<3x512xf32>
    %199 = vector.broadcast %196 : vector<1x512xf32> to vector<3x512xf32>
    %200 = arith.addf %198, %199 : vector<3x512xf32>
    %201 = arith.mulf %145, %200 : vector<3x512xf32>
    %202 = vector.extract_strided_slice %45 {offsets = [0, 0], sizes = [3, 512], strides = [1, 1]} : vector<6x512xf32> to vector<3x512xf32>
    %203 = arith.mulf %148, %202 : vector<3x512xf32>
    %204 = vector.extract_strided_slice %45 {offsets = [3, 0], sizes = [3, 512], strides = [1, 1]} : vector<6x512xf32> to vector<3x512xf32>
    %205 = arith.mulf %201, %204 : vector<3x512xf32>
    %206 = arith.addf %203, %205 : vector<3x512xf32>
    %207 = arith.addf %206, %146 : vector<3x512xf32>
    %cst_78 = arith.constant 3.130800e-03 : f32
    %208 = vector.broadcast %cst_78 : f32 to vector<3x512xf32>
    %209 = arith.cmpf ole, %207, %208 : vector<3x512xf32>
    %cst_79 = arith.constant 1.292000e+01 : f32
    %210 = vector.broadcast %cst_79 : f32 to vector<3x512xf32>
    %211 = arith.mulf %210, %207 : vector<3x512xf32>
    %cst_80 = arith.constant 9.99999993E-9 : f32
    %212 = vector.broadcast %cst_80 : f32 to vector<3x512xf32>
    %213 = arith.maximumf %207, %212 : vector<3x512xf32>
    %cst_81 = arith.constant 0.416666657 : f32
    %214 = vector.broadcast %cst_81 : f32 to vector<3x512xf32>
    %215 = math.powf %213, %214 : vector<3x512xf32>
    %cst_82 = arith.constant 1.055000e+00 : f32
    %216 = vector.broadcast %cst_82 : f32 to vector<3x512xf32>
    %217 = arith.mulf %216, %215 : vector<3x512xf32>
    %cst_83 = arith.constant 5.500000e-02 : f32
    %218 = vector.broadcast %cst_83 : f32 to vector<3x512xf32>
    %219 = arith.subf %217, %218 : vector<3x512xf32>
    %220 = arith.select %209, %211, %219 : vector<3x512xi1>, vector<3x512xf32>
    %cst_84 = arith.constant 0.000000e+00 : f32
    %cst_85 = arith.constant 1.000000e+00 : f32
    %221 = vector.broadcast %cst_84 : f32 to vector<3x512xf32>
    %222 = arith.maximumf %221, %220 : vector<3x512xf32>
    %223 = vector.broadcast %cst_85 : f32 to vector<3x512xf32>
    %224 = arith.minimumf %223, %222 : vector<3x512xf32>
    %c0_86 = arith.constant 0 : index
    %c0_87 = arith.constant 0 : index
    %225 = vector.load %arg3[%c0_86, %c0_87] : memref<32x512xf32, #tpu.memory_space<vmem>>, vector<3x512xf32>
    tpu.vector_store %arg3[%c0_86, %c0_87], %207 {strides = array<i32>} : memref<32x512xf32, #tpu.memory_space<vmem>>, vector<3x512xf32>,
    %c3 = arith.constant 3 : index
    %c0_88 = arith.constant 0 : index
    %226 = vector.load %arg3[%c3, %c0_88] : memref<32x512xf32, #tpu.memory_space<vmem>>, vector<3x512xf32>
    tpu.vector_store %arg3[%c3, %c0_88], %224 {strides = array<i32>} : memref<32x512xf32, #tpu.memory_space<vmem>>, vector<3x512xf32>,
    %c6 = arith.constant 6 : index
    %c0_89 = arith.constant 0 : index
    %227 = vector.load %arg3[%c6, %c0_89] : memref<32x512xf32, #tpu.memory_space<vmem>>, vector<6x512xf32>
    tpu.vector_store %arg3[%c6, %c0_89], %45 {strides = array<i32>} : memref<32x512xf32, #tpu.memory_space<vmem>>, vector<6x512xf32>,
    %c12 = arith.constant 12 : index
    %c0_90 = arith.constant 0 : index
    %228 = vector.load %arg3[%c12, %c0_90] : memref<32x512xf32, #tpu.memory_space<vmem>>, vector<1x512xf32>
    tpu.vector_store %arg3[%c12, %c0_90], %42 {strides = array<i32>} : memref<32x512xf32, #tpu.memory_space<vmem>>, vector<1x512xf32>,
    %c13 = arith.constant 13 : index
    %c0_91 = arith.constant 0 : index
    %229 = vector.load %arg3[%c13, %c0_91] : memref<32x512xf32, #tpu.memory_space<vmem>>, vector<1x512xf32>
    tpu.vector_store %arg3[%c13, %c0_91], %43 {strides = array<i32>} : memref<32x512xf32, #tpu.memory_space<vmem>>, vector<1x512xf32>,
    %c14 = arith.constant 14 : index
    %c0_92 = arith.constant 0 : index
    %230 = vector.load %arg3[%c14, %c0_92] : memref<32x512xf32, #tpu.memory_space<vmem>>, vector<3x512xf32>
    tpu.vector_store %arg3[%c14, %c0_92], %44 {strides = array<i32>} : memref<32x512xf32, #tpu.memory_space<vmem>>, vector<3x512xf32>,
    %231 = arith.mulf %76, %44 : vector<3x512xf32>
    %c17 = arith.constant 17 : index
    %c0_93 = arith.constant 0 : index
    %232 = vector.load %arg3[%c17, %c0_93] : memref<32x512xf32, #tpu.memory_space<vmem>>, vector<3x512xf32>
    tpu.vector_store %arg3[%c17, %c0_93], %231 {strides = array<i32>} : memref<32x512xf32, #tpu.memory_space<vmem>>, vector<3x512xf32>,
    %c20 = arith.constant 20 : index
    %c0_94 = arith.constant 0 : index
    %233 = vector.load %arg3[%c20, %c0_94] : memref<32x512xf32, #tpu.memory_space<vmem>>, vector<3x512xf32>
    tpu.vector_store %arg3[%c20, %c0_94], %53 {strides = array<i32>} : memref<32x512xf32, #tpu.memory_space<vmem>>, vector<3x512xf32>,
    %c23 = arith.constant 23 : index
    %c0_95 = arith.constant 0 : index
    %234 = vector.load %arg3[%c23, %c0_95] : memref<32x512xf32, #tpu.memory_space<vmem>>, vector<3x512xf32>
    tpu.vector_store %arg3[%c23, %c0_95], %19 {strides = array<i32>} : memref<32x512xf32, #tpu.memory_space<vmem>>, vector<3x512xf32>,
    %c26 = arith.constant 26 : index
    %c0_96 = arith.constant 0 : index
    %235 = vector.load %arg3[%c26, %c0_96] : memref<32x512xf32, #tpu.memory_space<vmem>>, vector<3x512xf32>
    tpu.vector_store %arg3[%c26, %c0_96], %12 {strides = array<i32>} : memref<32x512xf32, #tpu.memory_space<vmem>>, vector<3x512xf32>,
    %c29 = arith.constant 29 : index
    %c0_97 = arith.constant 0 : index
    %236 = vector.load %arg3[%c29, %c0_97] : memref<32x512xf32, #tpu.memory_space<vmem>>, vector<3x512xf32>
    tpu.vector_store %arg3[%c29, %c0_97], %146 {strides = array<i32>} : memref<32x512xf32, #tpu.memory_space<vmem>>, vector<3x512xf32>,
    return
  }
  func.func @transform_0(%arg0: i32) -> (i32, i32) {
    %c0_i32 = arith.constant 0 : i32
    %c0_i32_0 = arith.constant 0 : i32
    return %c0_i32, %arg0 : i32, i32
  }
  func.func @transform_1(%arg0: i32) -> (i32, i32) {
    %c0_i32 = arith.constant 0 : i32
    %c0_i32_0 = arith.constant 0 : i32
    %c0_i32_1 = arith.constant 0 : i32
    return %c0_i32, %c0_i32_0 : i32, i32
  }
  func.func @transform_2(%arg0: i32) -> (i32, i32) {
    %c0_i32 = arith.constant 0 : i32
    %c0_i32_0 = arith.constant 0 : i32
    return %c0_i32, %arg0 : i32, i32
  }
}

</mosaic_0001>

<bundles_post_ra>
// kernel: volume_splitsum_forward.1
= control target key start
LH: loop header
LB: loop body
LE: loop exit
PB: predicated region body
PF: predicated region fallthrough
CT: control target
= control target key end

     0   :  { %s8698_s9 = smov 0   ;;  %s8700_s10 = smov 0   ;;  %s12016_s0 = inlined_call_operand.vmem [shape: f32[24,2048], index: 0, kind: input, shape index: {}]   ;;  %s12017_s1 = inlined_call_operand.vmem [shape: f32[1184,128], index: 1, kind: input, shape index: {}]   ;;  %s12018_s2 = inlined_call_operand.vmem [shape: f32[32,2048], index: 2, kind: output, shape index: {}]  }
   0x1   :  { %s8702_s11 = smov 0  }
   0x2 LB: > { %s7356_s12 = sadd.s32 4294967295, %s8670_s11   ;;  %s8715_s13 = sadd.s32 1, %s8670_s11   ;;  %s8670_s11 = sphi %s8702_s11, %s12278_s11   ;;  %s8666_s10 = sphi %s8700_s10, %s12277_s10   ;;  %s8662_s9 = sphi %s8698_s9, %s12276_s9  }
   0x3   : > { %s16_s14 = ssub.s32 %s8670_s11, %s8715_s13  ;;  %s19_s15 = sadd.s32 1, %s8666_s10 }
   0x4   : > { %p17_p0 = scmp.eq.s32.totalorder %s16_s14, 0  ;;  %p26_p1 = scmp.ne.s32.totalorder %s8666_s10, %s8662_s9 }
   0x5   : > { %p27_p2 = scmp.eq.s32.totalorder %s8670_s11, 0  ;;  %p77_p3 = scmp.eq.s32.totalorder %s7356_s12, 3 }
   0x6   : > { %s8726_s16 = scalar_select %p17_p0, %s8666_s10, %s19_s15  }
   0x7   : > { %p28_p4 = por %p27_p2, %p26_p1  ;;  %p8728_p5 = por %p77_p3, %p26_p1 }
   0x8   : > { %p7359_p6 = scmp.ge.s32.totalorder %s8670_s11, 4 }
   0xa   : > { %102 = sbr.rel (%p7359_p6) target bundleno = 28 (0x1c), region = 20 }
  0x11   : > { %105 = sbr.rel (!%p28_p4) target bundleno = 28 (0x1c), region = 24  ;;  %s107_s18 = sand.u32 (%p28_p4), 1, %s8666_s10  }
  0x12   : > { %s7759_s19 = sshll.u32 (%p28_p4), %s8670_s11, 5  ;;  %s8393_s20 = smul.u32 (%p28_p4), 96, %s107_s18 }
  0x13   : > { %s112_s23 = scalar_lea.vmem (%p28_p4), %s12016_s0, %s7759_s19 }
  0x14   : > { %v125_v0 = vld [vmem:[%s112_s23] sm:$0xff] (%p28_p4)  ;;  %v127_v1 = vld [vmem:[%s112_s23 + $0x8] sm:$0xff] (%p28_p4)  ;;  %v129_v2 = vld [vmem:[%s112_s23 + $0x10] sm:$0xff] (%p28_p4)  ;;  %s109_s24 = scalar_lea.vmem (%p28_p4), [#allocation2], %s8393_s20 }
  0x15   : > { %v131_v3 = vld [vmem:[%s112_s23 + $0x18] sm:$0xff] (%p28_p4)  ;;  %v133_v4 = vld [vmem:[%s112_s23 + $0x80] sm:$0xff] (%p28_p4)  ;;  %v135_v5 = vld [vmem:[%s112_s23 + $0x88] sm:$0xff] (%p28_p4)  ;;  %126 = vst [vmem:[%s109_s24] sm:$0xff] (%p28_p4), %v125_v0 }
  0x16   : > { %128 = vst [vmem:[%s109_s24 + $0x8] sm:$0xff] (%p28_p4), %v127_v1  ;;  %130 = vst [vmem:[%s109_s24 + $0x10] sm:$0xff] (%p28_p4), %v129_v2  ;;  %v137_v6 = vld [vmem:[%s112_s23 + $0x90] sm:$0xff] (%p28_p4)  ;;  %v139_v7 = vld [vmem:[%s112_s23 + $0x98] sm:$0xff] (%p28_p4) }
  0x17   : > { %132 = vst [vmem:[%s109_s24 + $0x18] sm:$0xff] (%p28_p4), %v131_v3  ;;  %134 = vst [vmem:[%s109_s24 + $0x20] sm:$0xff] (%p28_p4), %v133_v4  ;;  %v141_v8 = vld [vmem:[%s112_s23 + $0x100] sm:$0xff] (%p28_p4)  ;;  %v143_v9 = vld [vmem:[%s112_s23 + $0x108] sm:$0xff] (%p28_p4) }
  0x18   : > { %136 = vst [vmem:[%s109_s24 + $0x28] sm:$0xff] %v135_v5  ;;  %138 = vst [vmem:[%s109_s24 + $0x30] sm:$0xff] %v137_v6  ;;  %v145_v10 = vld [vmem:[%s112_s23 + $0x110] sm:$0xff]  ;;  %v147_v11 = vld [vmem:[%s112_s23 + $0x118] sm:$0xff] }
  0x19   : > { %140 = vst [vmem:[%s109_s24 + $0x38] sm:$0xff] %v139_v7  ;;  %142 = vst [vmem:[%s109_s24 + $0x40] sm:$0xff] %v141_v8 }
  0x1a   : > { %144 = vst [vmem:[%s109_s24 + $0x48] sm:$0xff] %v143_v9  ;;  %146 = vst [vmem:[%s109_s24 + $0x50] sm:$0xff] %v145_v10 }
  0x1b   : > { %148 = vst [vmem:[%s109_s24 + $0x58] sm:$0xff] %v147_v11 }
  0x1c PF: > { %p7362_p7 = scmp.ge.s32.totalorder %s8670_s11, 1  ;;  %p153_p8 = scmp.lt.s32.totalorder %s8670_s11, 5 }
  0x1e   : > { %p154_p9 = pnand %p7362_p7, %p153_p8 }
  0x20   : > { %157 = sbr.rel (%p154_p9) target bundleno = 1656 (0x678), region = 47 }
  0x27   : > { %s160_s25 = sand.u32 1, %s8662_s9   ;;  %v12019_v12 = vmov 0.0   ;;  %v8673_v13 = vmov 0   ;;  %v315_v14 = vld [vmem:[%s12017_s1 + $0x40] sm:$0xff]  ;;  %v317_v15 = vld [vmem:[%s12017_s1 + $0x50] sm:$0xff]  ;;  %v316_v16 = vld [vmem:[%s12017_s1 + $0x48] sm:$0xff] }
  0x28   : > { %s8394_s26 = smul.u32 96, %s160_s25  ;;  %452 = vmatprep.mubr.f32.mxu0 %v12019_v12  ;;  %565 = vmatprep.mubr.f32.mxu1 %v12019_v12  ;;  %v318_v28 = vld [vmem:[%s12017_s1 + $0x58] sm:$0xff]  ;;  %v307_v30 = vld [vmem:[%s12017_s1] sm:$0xff]  ;;  %vm363_vm0 = vcmask 130048   ;;  %v320_v32 = vld [vmem:[%s12017_s1 + $0x68] sm:$0xff]  ;;  %vm660_vm1 = vcmask 523264  }
  0x29   : > { %8566 = vset.pattern.permute.xlu0 %v8673_v13  ;;  %8567 = vset.pattern.permute.xlu1 %v8673_v13  ;;  %v319_v31 = vld [vmem:[%s12017_s1 + $0x60] sm:$0xff]  ;;  %v308_v33 = vld [vmem:[%s12017_s1 + $0x8] sm:$0xff]  ;;  %v321_v34 = vld [vmem:[%s12017_s1 + $0x70] sm:$0xff]  ;;  %vm230_vm2 = vcmask 1042432   ;;  %vm1049_vm5 = vcmask 1045504   ;;  %s7363_s22 = sshll.u32 %s160_s25, 7 }
  0x2a   : > { %325 = vperm.xlu0 %8566, %v315_v14   ;;  %s8754_s5 = scalar_lea.vmem [#allocation2], %s8394_s26  ;;  %335 = vperm.xlu1 %8567, %v317_v15   ;;  %v322_v35 = vld [vmem:[%s12017_s1 + $0x78] sm:$0xff]  ;;  %v309_v36 = vld [vmem:[%s12017_s1 + $0x10] sm:$0xff]  ;;  %v2735_v38 = vld [vmem:[%s12017_s1 + $0x400] sm:$0xff]  ;;  %s9339_s9 = scalar_lea.vmem [#allocation3], %s7363_s22 }
  0x2b   : > { %v183_v17 = vld [vmem:[%s8754_s5 + $0x8] sm:$0xff]  ;;  %v185_v19 = vld [vmem:[%s8754_s5 + $0x18] sm:$0xff]  ;;  %v182_v22 = vld [vmem:[%s8754_s5] sm:$0xff]  ;;  %s7760_s15 = sshll.u32 (%p8728_p5), %s7356_s12, 5 }
  0x2c   : > { %v187_v18 = vld [vmem:[%s8754_s5 + $0x28] sm:$0xff]  ;;  %v189_v21 = vld [vmem:[%s8754_s5 + $0x38] sm:$0xff]  ;;  %v186_v23 = vld [vmem:[%s8754_s5 + $0x20] sm:$0xff]  ;;  %s7252_s17 = scalar_lea.vmem (%p8728_p5), %s12018_s2, %s7760_s15 }
  0x2d   : > { %v8759_v20 = vpack.c.bf16 %v187_v18, %v183_v17  ;;  %v8764_v24 = vpack.c.bf16 %v189_v21, %v185_v19  ;;  %v8766_v25 = vpack.c.bf16 %v186_v23, %v182_v22  ;;  %v184_v26 = vld [vmem:[%s8754_s5 + $0x10] sm:$0xff]  ;;  %v310_v39 = vld [vmem:[%s12017_s1 + $0x18] sm:$0xff]  ;;  %v2736_v40 = vld [vmem:[%s12017_s1 + $0x408] sm:$0xff] }
  0x2e   : > { %v188_v27 = vld [vmem:[%s8754_s5 + $0x30] sm:$0xff]  ;;  %330 = vperm.xlu0 %8566, %v316_v16   ;;  %340 = vperm.xlu1 %8567, %v318_v28   ;;  %v311_v42 = vld [vmem:[%s12017_s1 + $0x20] sm:$0xff]  ;;  %v2738_v43 = vld [vmem:[%s12017_s1 + $0x418] sm:$0xff] }
  0x2f   : > { %7762 = vmatprep.subr.bf16.mxu0 %v8759_v20  ;;  %v8774_v29 = vpack.c.bf16 %v188_v27, %v184_v26  ;;  %7766 = vmatprep.subr.bf16.mxu1 %v8764_v24  ;;  %v648_v37 = vld [vmem:[%s12017_s1 + $0x90] sm:$0xff]  ;;  %v2739_v44 = vld [vmem:[%s12017_s1 + $0x420] sm:$0xff]  ;;  %v312_v45 = vld [vmem:[%s12017_s1 + $0x28] sm:$0xff] }
  0x30   : > { %7764 = vmatpush1.bf16.msra.mxu0 %v8766_v25  ;;  %v2737_v41 = vld [vmem:[%s12017_s1 + $0x410] sm:$0xff]  ;;  %v2740_v46 = vld [vmem:[%s12017_s1 + $0x428] sm:$0xff]  ;;  %v2742_v49 = vld [vmem:[%s12017_s1 + $0x438] sm:$0xff] }
  0x31   : > { %7768 = vmatpush1.bf16.msra.mxu1 %v8774_v29  ;;  %v2741_v47 = vld [vmem:[%s12017_s1 + $0x430] sm:$0xff]  ;;  %v2743_v50 = vld [vmem:[%s12017_s1 + $0x440] sm:$0xff]  ;;  %v314_v51 = vld [vmem:[%s12017_s1 + $0x38] sm:$0xff] }
  0x32   : > { %345 = vperm.xlu0 %8566, %v319_v31   ;;  %350 = vperm.xlu1 %8567, %v320_v32   ;;  %v313_v48 = vld [vmem:[%s12017_s1 + $0x30] sm:$0xff]  ;;  %v2744_v52 = vld [vmem:[%s12017_s1 + $0x448] sm:$0xff]  ;;  %v2746_v54 = vld [vmem:[%s12017_s1 + $0x458] sm:$0xff] }
  0x33   : > { %7364 = vmatmul.mubr.msk.f32.vlgmr.msra.gmra.mrb[0].mxu0 %vm363_vm0, %v307_v30  ;;  %v2745_v53 = vld [vmem:[%s12017_s1 + $0x450] sm:$0xff]  ;;  %v649_v55 = vld [vmem:[%s12017_s1 + $0x98] sm:$0x7] }
  0x34   : > { %7372 = vmatmul.mubr.msk.f32.vlgmr.msra.gmra.mrb[0].mxu1 %vm363_vm0, %v307_v30  ;;  %458 = vmatprep.mubr.f32.mxu0 %v12019_v12  ;;  %v6345_v56 = vld [vmem:[%s12017_s1 + $0x470] sm:$0xff]  ;;  %v6346_v57 = vld [vmem:[%s12017_s1 + $0x478] sm:$0x1] }
  0x35   : > { %571 = vmatprep.mubr.f32.mxu1 %v12019_v12 }
  0x36   : > { %355 = vperm.xlu0 %8566, %v321_v34   ;;  %360 = vperm.xlu1 %8567, %v322_v35  }
  0x37   : > { %7365 = vmatmul.mubr.msk.f32.gmra.mrb[2].mxu0 %vm363_vm0, %v308_v33 }
  0x38   : > { %7373 = vmatmul.mubr.msk.f32.gmra.mrb[2].mxu1 %vm363_vm0, %v308_v33  ;;  %464 = vmatprep.mubr.f32.mxu0 %v12019_v12 }
  0x39   : > { %577 = vmatprep.mubr.f32.mxu1 %v12019_v12 }
  0x3a   : > { %652 = vperm.xlu0 %8566, %v648_v37   ;;  %2749 = vperm.xlu1 %8567, %v2735_v38  }
  0x3b   : > { %7366 = vmatmul.mubr.msk.f32.gmra.mrb[4].mxu0 %vm363_vm0, %v309_v36 }
  0x3c   : > { %7374 = vmatmul.mubr.msk.f32.gmra.mrb[4].mxu1 %vm363_vm0, %v309_v36  ;;  %470 = vmatprep.mubr.f32.mxu0 %v12019_v12 }
  0x3d   : > { %583 = vmatprep.mubr.f32.mxu1 %v12019_v12 }
  0x3e   : > { %2754 = vperm.xlu0 %8566, %v2736_v40   ;;  %2759 = vperm.xlu1 %8567, %v2737_v41  }
  0x3f   : > { %7367 = vmatmul.mubr.msk.f32.gmra.mrb[6].mxu0 %vm363_vm0, %v310_v39 }
  0x40   : > { %7375 = vmatmul.mubr.msk.f32.gmra.mrb[6].mxu1 %vm363_vm0, %v310_v39  ;;  %476 = vmatprep.mubr.f32.mxu0 %v12019_v12 }
  0x41   : > { %589 = vmatprep.mubr.f32.mxu1 %v12019_v12 }
  0x42   : > { %2764 = vperm.xlu0 %8566, %v2738_v43   ;;  %2769 = vperm.xlu1 %8567, %v2739_v44  }
  0x43   : > { %7368 = vmatmul.mubr.msk.f32.gmra.mrb[8].mxu0 %vm363_vm0, %v311_v42 }
  0x44   : > { %7376 = vmatmul.mubr.msk.f32.gmra.mrb[8].mxu1 %vm363_vm0, %v311_v42  ;;  %482 = vmatprep.mubr.f32.mxu0 %v12019_v12 }
  0x45   : > { %595 = vmatprep.mubr.f32.mxu1 %v12019_v12 }
  0x46   : > { %2774 = vperm.xlu0 %8566, %v2740_v46   ;;  %2779 = vperm.xlu1 %8567, %v2741_v47  }
  0x47   : > { %7369 = vmatmul.mubr.msk.f32.gmra.mrb[10].mxu0 %vm363_vm0, %v312_v45 }
  0x48   : > { %7377 = vmatmul.mubr.msk.f32.gmra.mrb[10].mxu1 %vm363_vm0, %v312_v45  ;;  %488 = vmatprep.mubr.f32.mxu0 %v12019_v12 }
  0x49   : > { %601 = vmatprep.mubr.f32.mxu1 %v12019_v12 }
  0x4a   : > { %2784 = vperm.xlu0 %8566, %v2742_v49   ;;  %2789 = vperm.xlu1 %8567, %v2743_v50  }
  0x4b   : > { %7370 = vmatmul.mubr.msk.f32.gmra.mrb[12].mxu0 %vm363_vm0, %v313_v48 }
  0x4c   : > { %7378 = vmatmul.mubr.msk.f32.gmra.mrb[12].mxu1 %vm363_vm0, %v313_v48  ;;  %494 = vmatprep.mubr.f32.mxu0 %v12019_v12 }
  0x4d   : > { %607 = vmatprep.mubr.f32.mxu1 %v12019_v12 }
  0x4e   : > { %2794 = vperm.xlu0 %8566, %v2744_v52   ;;  %2799 = vperm.xlu1 %8567, %v2745_v53  }
  0x4f   : > { %7371 = vmatmul.mubr.msk.f32.gmra.mrb[14].mxu0 %vm363_vm0, %v314_v51 }
  0x50   : > { %7379 = vmatmul.mubr.msk.f32.gmra.mrb[14].mxu1 %vm363_vm0, %v314_v51  ;;  %731 = vmatprep.mubr.f32.mxu0 %v12019_v12 }
  0x51   : > { %808 = vmatprep.mubr.f32.mxu1 %v12019_v12 }
  0x52   : > { %2804 = vperm.xlu0 %8566, %v2746_v54   ;;  %657 = vperm.xlu1 %8567, %v649_v55  }
  0x56   : > { %6349 = vperm.xlu0 %8566, %v6345_v56   ;;  %6354 = vperm.xlu1 %8567, %v6346_v57  }
  0xa9   : > { %v326_v58 = vpop.permute.xlu0 %325  ;;  %v336_v8 = vpop.permute.xlu1 %335 }
  0xad   : > { %v331_v0 = vpop.permute.xlu0 %330  ;;  %v341_v35 = vpop.permute.xlu1 %340 }
 0x106   : > { %v454_v59 = vpop.f32.mrb[0].mxu0 }
 0x107   : > { %v567_v60 = vpop.f32.mrb[0].mxu1  ;;  %v456_v61 = vpop.f32.mrb[1].mxu0  ;;  %v455_v63 = vadd.f32 %v454_v59, %v326_v58 }
 0x108   : > { %v569_v62 = vpop.f32.mrb[1].mxu1  ;;  %v568_v1 = vadd.f32 %v567_v60, %v326_v58  ;;  %v457_v2 = vadd.f32 %v456_v61, %v326_v58  ;;  %v346_v59 = vpop.permute.xlu0 %345 }
 0x109   : > { %v570_v4 = vadd.f32 %v569_v62, %v326_v58  ;;  %v614_v13 = vmax.f32 %v455_v63, 0.0 }
 0x10a   : > { %v460_v3 = vpop.f32.mrb[2].mxu0  ;;  %v616_v16 = vmax.f32 %v568_v1, 0.0  ;;  %v615_v17 = vmax.f32 %v457_v2, 0.0  ;;  %v351_v1 = vpop.permute.xlu1 %350 }
 0x10b   : > { %v461_v5 = vadd.f32 %v460_v3, %v331_v0  ;;  %v573_v6 = vpop.f32.mrb[2].mxu1  ;;  %v462_v7 = vpop.f32.mrb[3].mxu0  ;;  %v617_v22 = vmax.f32 %v570_v4, 0.0 }
 0x10c   : > { %v574_v9 = vadd.f32 %v573_v6, %v331_v0  ;;  %v463_v10 = vadd.f32 %v462_v7, %v331_v0  ;;  %v575_v11 = vpop.f32.mrb[3].mxu1 }
 0x10d   : > { %v618_v14 = vmax.f32 %v461_v5, 0.0  ;;  %v576_v15 = vadd.f32 %v575_v11, %v331_v0 }
 0x10e   : > { %v620_v18 = vmax.f32 %v574_v9, 0.0  ;;  %v619_v19 = vmax.f32 %v463_v10, 0.0  ;;  %v466_v21 = vpop.f32.mrb[4].mxu0 }
 0x10f   : > { %v7771_v23 = vpack.c.bf16 %v618_v14, %v614_v13  ;;  %v621_v26 = vmax.f32 %v576_v15, 0.0  ;;  %v579_v27 = vpop.f32.mrb[4].mxu1  ;;  %v468_v28 = vpop.f32.mrb[5].mxu0  ;;  %v467_v34 = vadd.f32 %v466_v21, %v336_v8 }
 0x110   : > { %v7787_v30 = vpack.c.bf16 %v620_v18, %v616_v16  ;;  %v7769_v31 = vpack.c.bf16 %v619_v19, %v615_v17  ;;  %v581_v32 = vpop.f32.mrb[5].mxu1  ;;  %v580_v36 = vadd.f32 %v579_v27, %v336_v8  ;;  %v469_v37 = vadd.f32 %v468_v28, %v336_v8 }
 0x111   : > { %v7785_v33 = vpack.c.bf16 %v621_v26, %v617_v22  ;;  %v582_v39 = vadd.f32 %v581_v32, %v336_v8  ;;  %v622_v46 = vmax.f32 %v467_v34, 0.0 }
 0x112   : > { %v472_v38 = vpop.f32.mrb[6].mxu0  ;;  %7770 = vmatprep.subr.bf16.mxu0 %v7769_v31  ;;  %v624_v49 = vmax.f32 %v580_v36, 0.0  ;;  %v623_v50 = vmax.f32 %v469_v37, 0.0  ;;  %v361_v36 = vpop.permute.xlu1 %360 }
 0x113   : > { %v473_v40 = vadd.f32 %v472_v38, %v341_v35  ;;  %v585_v41 = vpop.f32.mrb[6].mxu1  ;;  %7786 = vmatprep.subr.bf16.mxu1 %v7785_v33  ;;  %v474_v42 = vpop.f32.mrb[7].mxu0  ;;  %7772 = vmatpush1.bf16.msra.mxu0 %v7771_v23  ;;  %v625_v54 = vmax.f32 %v582_v39, 0.0 }
 0x114   : > { %v586_v43 = vadd.f32 %v585_v41, %v341_v35  ;;  %v475_v44 = vadd.f32 %v474_v42, %v341_v35  ;;  %v587_v45 = vpop.f32.mrb[7].mxu1  ;;  %7788 = vmatpush1.bf16.msra.mxu1 %v7787_v30  ;;  %v356_v30 = vpop.permute.xlu0 %355 }
 0x115   : > { %v626_v47 = vmax.f32 %v473_v40, 0.0  ;;  %v588_v48 = vadd.f32 %v587_v45, %v341_v35 }
 0x116   : > { %v628_v51 = vmax.f32 %v586_v43, 0.0  ;;  %v627_v52 = vmax.f32 %v475_v44, 0.0  ;;  %v478_v53 = vpop.f32.mrb[8].mxu0 }
 0x117   : > { %v7775_v55 = vpack.c.bf16 %v626_v47, %v622_v46  ;;  %v629_v56 = vmax.f32 %v588_v48, 0.0  ;;  %v591_v57 = vpop.f32.mrb[8].mxu1  ;;  %v480_v58 = vpop.f32.mrb[9].mxu0  ;;  %v479_v0 = vadd.f32 %v478_v53, %v346_v59 }
 0x118   : > { %v7791_v60 = vpack.c.bf16 %v628_v51, %v624_v49  ;;  %v7773_v61 = vpack.c.bf16 %v627_v52, %v623_v50  ;;  %v593_v62 = vpop.f32.mrb[9].mxu1  ;;  %v592_v2 = vadd.f32 %v591_v57, %v346_v59  ;;  %v481_v3 = vadd.f32 %v480_v58, %v346_v59 }
 0x119   : > { %v7789_v63 = vpack.c.bf16 %v629_v56, %v625_v54  ;;  %v594_v5 = vadd.f32 %v593_v62, %v346_v59  ;;  %v630_v13 = vmax.f32 %v479_v0, 0.0  ;;  %v195_v0 = vld [vmem:[%s8754_s5 + $0x48] sm:$0x38] }
 0x11a   : > { %v484_v4 = vpop.f32.mrb[10].mxu0  ;;  %7774 = vmatprep.subr.bf16.mxu0 %v7773_v61  ;;  %v632_v16 = vmax.f32 %v592_v2, 0.0  ;;  %v631_v17 = vmax.f32 %v481_v3, 0.0  ;;  %v647_v61 = vld [vmem:[%s12017_s1 + $0x88] sm:$0x7] }
 0x11b   : > { %v485_v6 = vadd.f32 %v484_v4, %v351_v1  ;;  %v597_v7 = vpop.f32.mrb[10].mxu1  ;;  %7790 = vmatprep.subr.bf16.mxu1 %v7789_v63  ;;  %v486_v8 = vpop.f32.mrb[11].mxu0  ;;  %7776 = vmatpush1.bf16.msra.mxu0 %v7775_v55  ;;  %v633_v22 = vmax.f32 %v594_v5, 0.0  ;;  %v8914_v63 = vld [vmem:[%s8754_s5 + $0x58] sm:$0x7] }
 0x11c   : > { %v598_v9 = vadd.f32 %v597_v7, %v351_v1  ;;  %v487_v10 = vadd.f32 %v486_v8, %v351_v1  ;;  %v599_v11 = vpop.f32.mrb[11].mxu1  ;;  %7792 = vmatpush1.bf16.msra.mxu1 %v7791_v60  ;;  %v646_v60 = vld [vmem:[%s12017_s1 + $0x80] sm:$0xff]  ;;  %v197_v3 = vld [vmem:[%s8754_s5 + $0x58] sm:$0x38] }
 0x11d   : > { %v634_v14 = vmax.f32 %v485_v6, 0.0  ;;  %v600_v15 = vadd.f32 %v599_v11, %v351_v1 }
 0x11e   : > { %v636_v18 = vmax.f32 %v598_v9, 0.0  ;;  %v635_v19 = vmax.f32 %v487_v10, 0.0  ;;  %v490_v21 = vpop.f32.mrb[12].mxu0 }
 0x11f   : > { %v7779_v23 = vpack.c.bf16 %v634_v14, %v630_v13  ;;  %v637_v26 = vmax.f32 %v600_v15, 0.0  ;;  %v603_v27 = vpop.f32.mrb[12].mxu1  ;;  %v492_v28 = vpop.f32.mrb[13].mxu0  ;;  %v491_v35 = vadd.f32 %v490_v21, %v356_v30  ;;  %v8922_v14 = vld [vmem:[%s8754_s5 + $0x40] sm:$0x7] }
 0x120   : > { %v7795_v31 = vpack.c.bf16 %v636_v18, %v632_v16  ;;  %v7777_v32 = vpack.c.bf16 %v635_v19, %v631_v17  ;;  %v605_v33 = vpop.f32.mrb[13].mxu1  ;;  %v604_v37 = vadd.f32 %v603_v27, %v356_v30  ;;  %v493_v38 = vadd.f32 %v492_v28, %v356_v30 }
 0x121   : > { %v7793_v34 = vpack.c.bf16 %v637_v26, %v633_v22  ;;  %v606_v40 = vadd.f32 %v605_v33, %v356_v30  ;;  %v638_v47 = vmax.f32 %v491_v35, 0.0  ;;  %v198_v16 = vsub.f32 0.0, %v8922_v14  ;;  %v8926_v22 = vld [vmem:[%s8754_s5 + $0x40] sm:$0x38] }
 0x122   : > { %v496_v39 = vpop.f32.mrb[14].mxu0  ;;  %7778 = vmatprep.subr.bf16.mxu0 %v7777_v32  ;;  %v640_v50 = vmax.f32 %v604_v37, 0.0  ;;  %v639_v51 = vmax.f32 %v493_v38, 0.0  ;;  %v8674_v37 = vmov 1.0  }
 0x123   : > { %v497_v41 = vadd.f32 %v496_v39, %v361_v36  ;;  %v609_v42 = vpop.f32.mrb[14].mxu1  ;;  %7794 = vmatprep.subr.bf16.mxu1 %v7793_v34  ;;  %v498_v43 = vpop.f32.mrb[15].mxu0  ;;  %7780 = vmatpush1.bf16.msra.mxu0 %v7779_v23  ;;  %v641_v54 = vmax.f32 %v606_v40, 0.0  ;;  %v206_v19 = vrot.slane %v198_v16, 5 }
 0x124   : > { %v610_v44 = vadd.f32 %v609_v42, %v361_v36  ;;  %v499_v45 = vadd.f32 %v498_v43, %v361_v36  ;;  %v611_v46 = vpop.f32.mrb[15].mxu1  ;;  %7796 = vmatpush1.bf16.msra.mxu1 %v7795_v31 }
 0x125   : > { %v642_v48 = vmax.f32 %v497_v41, 0.0  ;;  %v612_v49 = vadd.f32 %v611_v46, %v361_v36  ;;  %v214_v26 = vmul.f32 %v206_v19, %v8926_v22 }
 0x126   : > { %v644_v52 = vmax.f32 %v610_v44, 0.0  ;;  %v643_v53 = vmax.f32 %v499_v45, 0.0 }
 0x127   : > { %v7783_v55 = vpack.c.bf16 %v642_v48, %v638_v47  ;;  %v645_v56 = vmax.f32 %v612_v49, 0.0  ;;  %v222_v30 = vrot.slane %v214_v26, 3 }
 0x128   : > { %v7799_v57 = vpack.c.bf16 %v644_v52, %v640_v50  ;;  %v7781_v58 = vpack.c.bf16 %v643_v53, %v639_v51 }
 0x129   : > { %v7797_v59 = vpack.c.bf16 %v645_v56, %v641_v54  ;;  %v231_v33 = vsel %vm230_vm2, %v222_v30, 0.0  ;;  %v12021_v30 = vrot.slane %v8922_v14, 2 }
 0x12a   : > { %7782 = vmatprep.subr.bf16.mxu0 %v7781_v58  ;;  %v232_v35 = vrot.slane %v231_v33, 4 }
 0x12b   : > { %7798 = vmatprep.subr.bf16.mxu1 %v7797_v59  ;;  %7784 = vmatpush1.bf16.msra.mxu0 %v7783_v55  ;;  %v12024_v59 = vrot.slane %v8914_v63, 2 }
 0x12c   : > { %7800 = vmatpush1.bf16.msra.mxu1 %v7799_v57  ;;  %7802 = vmatprep.subr.bf16.mxu0 %v8759_v20  ;;  %v8910_v20 = vld [vmem:[%s8754_s5 + $0x48] sm:$0x7]  ;;  %v233_v40 = vadd.f32 %v232_v35, %v231_v33  ;;  %v12033_v33 = vmov 683565275   ;;  %v12022_v35 = vmov 2475754826  }
 0x12d   : > { %7806 = vmatprep.subr.bf16.mxu1 %v8764_v24  ;;  %v199_v24 = vsub.f32 0.0, %v8910_v20  ;;  %v12035_v47 = vrot.slane %v8910_v20, 2 }
 0x12e   : > { %7380 = vmatmul.mubr.msk.f32.vlgmr.msra.gmra.mrb[16].mxu0 %vm660_vm1, %v646_v60  ;;  %v234_v44 = vrot.slane %v233_v40, 2 }
 0x12f   : > { %7382 = vmatmul.mubr.msk.f32.vlgmr.msra.gmra.mrb[16].mxu1 %vm660_vm1, %v646_v60  ;;  %737 = vmatprep.mubr.f32.mxu0 %v12019_v12  ;;  %v207_v62 = vrot.slane %v199_v24, 5  ;;  %v2723_v24 = vld [vmem:[%s12017_s1 + $0xa0] sm:$0xff] }
 0x130   : > { %814 = vmatprep.mubr.f32.mxu1 %v12019_v12  ;;  %7804 = vmatpush1.bf16.msra.mxu0 %v8766_v25  ;;  %v201_v25 = vsub.f32 0.0, %v8914_v63  ;;  %v235_v52 = vadd.f32 %v234_v44, %v233_v40  ;;  %v12031_v40 = vmov 2131351028   ;;  %v12025_v44 = vmov 2102212464  }
 0x131   : > { %7808 = vmatpush1.bf16.msra.mxu1 %v8774_v29  ;;  %v215_v1 = vmul.f32 %v207_v62, %v195_v0 }
 0x132   : > { %7381 = vmatmul.mubr.msk.f32.gmra.mrb[18].mxu0 %vm660_vm1, %v647_v61  ;;  %v209_v2 = vrot.slane %v201_v25, 5  ;;  %v236_v57 = vrot.slane %v235_v52, 1 }
 0x133   : > { %7383 = vmatmul.mubr.msk.f32.gmra.mrb[18].mxu1 %vm660_vm1, %v647_v61  ;;  %2907 = vmatprep.mubr.f32.mxu0 %v12019_v12  ;;  %v223_v29 = vrot.slane %v215_v1, 3 }
 0x134   : > { %3044 = vmatprep.mubr.f32.mxu1 %v12019_v12  ;;  %v217_v4 = vmul.f32 %v209_v2, %v197_v3  ;;  %v8969_v60 = vadd.f32 %v236_v57, %v235_v52 }
 0x135   : > { %v238_v5 = vsel %vm230_vm2, %v223_v29, 0.0  ;;  %v2725_v29 = vld [vmem:[%s12017_s1 + $0xb0] sm:$0xff] }
 0x136   : > { %v239_v6 = vrot.slane %v238_v5, 4  ;;  %v225_v7 = vrot.slane %v217_v4, 3  ;;  %12106 = vst [vmem:[#allocation6_spill] sm:$0xff] %v8969_v60  ;;  %7456 = vmatmul.mubr.msk.f32.vlgmr.msra.gmra.mrb[20].mxu0 %vm363_vm0, %v2723_v24  ;;  %v259_v1 = vmul.f32 2.0, %v8969_v60  ;;  %vm283_vm6 = vcmp.lt.f32.partialorder %v8969_v60, 0.0 }
 0x137   : > { %7468 = vmatmul.mubr.msk.f32.vlgmr.msra.gmra.mrb[20].mxu1 %vm363_vm0, %v2723_v24  ;;  %2913 = vmatprep.mubr.f32.mxu0 %v12019_v12 }
 0x138   : > { %v240_v8 = vadd.f32 %v239_v6, %v238_v5  ;;  %v252_v9 = vsel %vm230_vm2, %v225_v7, 0.0  ;;  %3050 = vmatprep.mubr.f32.mxu1 %v12019_v12  ;;  %v263_v4 = vmul.f32 %v259_v1, %v8926_v22 }
 0x139   : > { %v253_v10 = vrot.slane %v252_v9, 4 }
 0x13a   : > { %v241_v11 = vrot.slane %v240_v8, 2 }
 0x13b   : > { %v254_v13 = vadd.f32 %v253_v10, %v252_v9  ;;  %v9001_v9 = vsel %vm283_vm6, -1.0, %v8674_v37  ;;  %v9004_v10 = vld [vmem:[%s8754_s5 + $0x50] sm:$0x7] }
 0x13c   : > { %v242_v15 = vadd.f32 %v241_v11, %v240_v8  ;;  %v271_v8 = vrot.slane %v263_v4, 3  ;;  %12107 = vst [vmem:[#allocation7_spill] sm:$0xff] %v9001_v9 }
 0x13d   : > { %v255_v17 = vrot.slane %v254_v13, 2 }
 0x13e   : > { %v243_v18 = vrot.slane %v242_v15, 1 }
 0x13f   : > { %v256_v21 = vadd.f32 %v255_v17, %v254_v13  ;;  %v9009_v13 = vmul.f32 %v9001_v9, %v8926_v22  ;;  %v9012_v17 = vadd.f32 %v271_v8, %v8922_v14  ;;  %v2726_v22 = vld [vmem:[%s12017_s1 + $0xb8] sm:$0xff] }
 0x140   : > { %v8928_v23 = vadd.f32 %v243_v18, %v242_v15 }
 0x141   : > { %v257_v27 = vrot.slane %v256_v21, 1 }
 0x142   : > { %v260_v28 = vmul.f32 2.0, %v8928_v23  ;;  %vm284_vm3 = vcmp.lt.f32.partialorder %v8928_v23, 0.0 }
 0x143   : > { %v8932_v31 = vadd.f32 %v257_v27, %v256_v21  ;;  %v8938_v38 = vsel %vm284_vm3, -1.0, %v8674_v37  ;;  %v200_v21 = vsub.f32 0.0, %v9004_v10 }
 0x144   : > { %v264_v32 = vmul.f32 %v260_v28, %v195_v0  ;;  %v8944_v42 = vmul.f32 %v8938_v38, %v195_v0  ;;  %v2724_v0 = vld [vmem:[%s12017_s1 + $0xa8] sm:$0xff]  ;;  %v1001_v28 = vrot.slane %v9009_v13, 3 }
 0x145   : > { %12104 = vst [vmem:[#allocation4_spill] sm:$0xff] %v8932_v31  ;;  %v262_v34 = vmul.f32 2.0, %v8932_v31  ;;  %vm286_vm4 = vcmp.lt.f32.partialorder %v8932_v31, 0.0  ;;  %7457 = vmatmul.mubr.msk.f32.gmra.mrb[22].mxu0 %vm363_vm0, %v2724_v0  ;;  %7469 = vmatmul.mubr.msk.f32.gmra.mrb[22].mxu1 %vm363_vm0, %v2724_v0 }
 0x146   : > { %v272_v36 = vrot.slane %v264_v32, 3  ;;  %v1002_v45 = vrot.slane %v8944_v42, 3  ;;  %v8954_v49 = vsel %vm286_vm4, -1.0, %v8674_v37  ;;  %2919 = vmatprep.mubr.f32.mxu0 %v12019_v12  ;;  %3056 = vmatprep.mubr.f32.mxu1 %v12019_v12 }
 0x147   : > { %v266_v39 = vmul.f32 %v262_v34, %v197_v3  ;;  %12105 = vst [vmem:[#allocation5_spill] sm:$0xff] %v8954_v49  ;;  %v8958_v51 = vmul.f32 %v8954_v49, %v197_v3 }
 0x148   : > { %v8941_v41 = vadd.f32 %v272_v36, %v8910_v20 }
 0x149   : > { %v274_v43 = vrot.slane %v266_v39, 3  ;;  %v1004_v56 = vrot.slane %v8958_v51, 3  ;;  %7458 = vmatmul.mubr.msk.f32.gmra.mrb[24].mxu0 %vm363_vm0, %v2725_v29  ;;  %7470 = vmatmul.mubr.msk.f32.gmra.mrb[24].mxu1 %vm363_vm0, %v2725_v29  ;;  %v1013_v39 = vrot.slane %v9012_v17, 5 }
 0x14a   : > { %v1014_v46 = vrot.slane %v8941_v41, 5  ;;  %2925 = vmatprep.mubr.f32.mxu0 %v12019_v12  ;;  %3062 = vmatprep.mubr.f32.mxu1 %v12019_v12 }
 0x14b   : > { %v8951_v48 = vadd.f32 %v274_v43, %v8914_v63 }
 0x14c   : > { %v1046_v50 = vsel %vm230_vm2, %v1002_v45, %v1014_v46  ;;  %v12029_v46 = vmov 920167782  }
 0x14d   : > { %v1051_v53 = vsel %vm1049_vm5, %v1046_v50, %v12035_v47  ;;  %v1016_v54 = vrot.slane %v8951_v48, 5  ;;  %7459 = vmatmul.mubr.msk.f32.gmra.mrb[26].mxu0 %vm363_vm0, %v2726_v22  ;;  %7471 = vmatmul.mubr.msk.f32.gmra.mrb[26].mxu1 %vm363_vm0, %v2726_v22 }
 0x14e   : > { %v8964_v55 = vmul.f32 3.1415927, %v1051_v53  ;;  %2931 = vmatprep.mubr.f32.mxu0 %v12019_v12  ;;  %3068 = vmatprep.mubr.f32.mxu1 %v12019_v12 }
 0x14f   : > { %v1048_v61 = vsel %vm230_vm2, %v1004_v56, %v1016_v54  ;;  %v2727_v56 = vld [vmem:[%s12017_s1 + $0xc0] sm:$0xff] }
 0x150   : > { %v1174_v58 = vand.u32 2139095040, %v8964_v55  ;;  %v1053_v25 = vsel %vm1049_vm5, %v1048_v61, %v12024_v59  ;;  %v1171_v3 = vand.u32 2147483647, %v8964_v55  ;;  %v12027_v61 = vmov 1326507024  }
 0x151   : > { %v8993_v6 = vmul.f32 3.1415927, %v1053_v25  ;;  %7460 = vmatmul.mubr.msk.f32.gmra.mrb[28].mxu0 %vm363_vm0, %v2727_v56  ;;  %7472 = vmatmul.mubr.msk.f32.gmra.mrb[28].mxu1 %vm363_vm0, %v2727_v56 }
 0x152   : > { %v1175_v62 = vshrl.u32 %v1174_v58, 23  ;;  %v1178_v7 = vand.u32 8388607, %v1171_v3  ;;  %2937 = vmatprep.mubr.f32.mxu0 %v12019_v12  ;;  %3074 = vmatprep.mubr.f32.mxu1 %v12019_v12 }
 0x153   : > { %v1382_v11 = vand.u32 2139095040, %v8993_v6  ;;  %v1379_v25 = vand.u32 2147483647, %v8993_v6 }
 0x154   : > { %v7396_v2 = vadd.s32 4294967169, %v1175_v62  ;;  %v1179_v15 = vor.u32 8388608, %v1178_v7 }
 0x155   : > { %v1383_v27 = vshrl.u32 %v1382_v11, 23  ;;  %v1386_v11 = vand.u32 8388607, %v1379_v25 }
 0x156   : > { %v1181_v5 = vadd.s32 1, %v7396_v2  ;;  %v9024_v26 = vshll.u32 %v1179_v15, 8 }
 0x157   : > { %v7404_v1 = vadd.s32 4294967169, %v1383_v27 }
 0x158   : > { %vm1182_vm7 = vcmp.gt.s32.totalorder %v1181_v5, 0 }
 0x159   : > { %v1183_v16 = vsel %vm1182_vm7, %v1181_v5, 0  ;;  %v2728_v5 = vld [vmem:[%s12017_s1 + $0xc8] sm:$0xff]  ;;  %v1389_v15 = vadd.s32 1, %v7404_v1 }
 0x15a   : > { %v9016_v18 = vshrl.u32 %v1183_v16, 5  ;;  %v1185_v19 = vand.u32 31, %v1183_v16  ;;  %7461 = vmatmul.mubr.msk.f32.gmra.mrb[30].mxu0 %vm363_vm0, %v2728_v5  ;;  %7473 = vmatmul.mubr.msk.f32.gmra.mrb[30].mxu1 %vm363_vm0, %v2728_v5 }
 0x15b   : > { %vm1390_vm12 = vcmp.gt.s32.totalorder %v1389_v15, 0  ;;  %2943 = vmatprep.mubr.f32.mxu0 %v12019_v12  ;;  %3080 = vmatprep.mubr.f32.mxu1 %v12019_v12 }
 0x15c   : > { %v1186_v32 = vsub.s32 32, %v1185_v19  ;;  %v1188_v34 = vshll.u32 %v12033_v33, %v1185_v19  ;;  %v1191_v36 = vshll.u32 %v12022_v35, %v1185_v19  ;;  %v1194_v43 = vshll.u32 %v12031_v40, %v1185_v19 }
 0x15d   : > { %v1197_v45 = vshll.u32 %v12025_v44, %v1185_v19  ;;  %v1200_v50 = vshll.u32 %v12029_v46, %v1185_v19  ;;  %vm1203_vm8 = vcmp.lt.s32.totalorder %v9016_v18, 1  ;;  %vm1204_vm9 = vcmp.lt.s32.totalorder %v9016_v18, 2 }
 0x15e   : > { %v1187_v52 = vshrl.u32 %v12033_v33, %v1186_v32  ;;  %v1189_v53 = vshrl.u32 %v12022_v35, %v1186_v32  ;;  %v1192_v54 = vshrl.u32 %v12031_v40, %v1186_v32  ;;  %v1195_v57 = vshrl.u32 %v12025_v44, %v1186_v32 }
 0x15f   : > { %v1198_v58 = vshrl.u32 %v12029_v46, %v1186_v32  ;;  %v1201_v24 = vshrl.u32 %v12027_v61, %v1186_v32  ;;  %vm1206_vm10 = vcmp.lt.s32.totalorder %v9016_v18, 4  ;;  %vm1205_vm11 = vcmp.lt.s32.totalorder %v9016_v18, 3  ;;  %v2729_v18 = vld [vmem:[%s12017_s1 + $0xd0] sm:$0xff] }
 0x160   : > { %v1190_v62 = vor.u32 %v1189_v53, %v1188_v34  ;;  %v1193_v0 = vor.u32 %v1192_v54, %v1191_v36  ;;  %v1196_v2 = vor.u32 %v1195_v57, %v1194_v43  ;;  %v1387_v43 = vor.u32 8388608, %v1386_v11  ;;  %7462 = vmatmul.mubr.msk.f32.gmra.mrb[32].mxu0 %vm363_vm0, %v2729_v18  ;;  %7474 = vmatmul.mubr.msk.f32.gmra.mrb[32].mxu1 %vm363_vm0, %v2729_v18 }
 0x161   : > { %v1199_v29 = vor.u32 %v1198_v58, %v1197_v45  ;;  %v1202_v4 = vor.u32 %v1201_v24, %v1200_v50  ;;  %v1391_v58 = vsel %vm1390_vm12, %v1389_v15, 0  ;;  %v1045_v24 = vsel %vm230_vm2, %v1001_v28, %v1013_v39  ;;  %2949 = vmatprep.mubr.f32.mxu0 %v12019_v12  ;;  %3086 = vmatprep.mubr.f32.mxu1 %v12019_v12 }
 0x162   : > { %v1207_v7 = vsel %vm1203_vm8, %v1187_v52, %v1190_v62  ;;  %v1211_v8 = vsel %vm1203_vm8, %v1190_v62, %v1193_v0  ;;  %v1208_v16 = vsel %vm1206_vm10, %v1196_v2, 2102212464  ;;  %v1215_v22 = vsel %vm1203_vm8, %v1193_v0, %v1196_v2 }
 0x163   : > { %v1212_v19 = vsel %vm1206_vm10, %v1199_v29, 920167782  ;;  %v1216_v27 = vsel %vm1206_vm10, %v1202_v4, 1326507024  ;;  %v1209_v32 = vsel %vm1205_vm11, %v1193_v0, %v1208_v16  ;;  %v9104_v62 = vshrl.u32 %v1391_v58, 5 }
 0x164   : > { %v1213_v34 = vsel %vm1205_vm11, %v1196_v2, %v1212_v19  ;;  %v1217_v36 = vsel %vm1205_vm11, %v1199_v29, %v1216_v27  ;;  %v1210_v45 = vsel %vm1204_vm9, %v1207_v7, %v1209_v32  ;;  %v1393_v0 = vand.u32 31, %v1391_v58  ;;  %v9147_v58 = vld [vmem:[%s8754_s5 + $0x50] sm:$0x38] }
 0x165   : > { %v1214_v50 = vsel %vm1204_vm9, %v1211_v8, %v1213_v34  ;;  %v1218_v52 = vsel %vm1204_vm9, %v1215_v22, %v1217_v36  ;;  %v1226_v1 = vmul.u32 %v9024_v26, %v1210_v45  ;;  %v9107_v2 = vshll.u32 %v1387_v43, 8 }
 0x166   : > { %v9088_v53 = vmul.u32.u64.low %v9024_v26, %v1218_v52  ;;  %v9089_v54 = vmul.u32.u64.high %v9024_v26, %v1218_v52, %v9088_v53  ;;  %v9092_v56 = vmul.u32.u64.low %v9024_v26, %v1214_v50  ;;  %v9093_v57 = vmul.u32.u64.high %v9024_v26, %v1214_v50, %v9092_v56  ;;  %v2731_v50 = vld [vmem:[%s12017_s1 + $0xe0] sm:$0xff] }
 0x167   : > { %v208_v29 = vrot.slane %v200_v21, 5  ;;  %v1394_v28 = vsub.s32 32, %v1393_v0  ;;  %v1050_v39 = vsel %vm1049_vm5, %v1045_v24, %v12021_v30  ;;  %v2730_v21 = vld [vmem:[%s12017_s1 + $0xd8] sm:$0xff]  ;;  %v1396_v26 = vshll.u32 %v12033_v33, %v1393_v0 }
 0x168   : > { %vm1228_vm13 = vc.u32 %v9089_v54, %v9092_v56  ;;  %v1229_v4 = vadd.s32 1, %v9093_v57  ;;  %v1399_v5 = vshll.u32 %v12022_v35, %v1393_v0  ;;  %v1402_v7 = vshll.u32 %v12031_v40, %v1393_v0  ;;  %7463 = vmatmul.mubr.msk.f32.gmra.mrb[34].mxu0 %vm363_vm0, %v2730_v21  ;;  %7475 = vmatmul.mubr.msk.f32.gmra.mrb[34].mxu1 %vm363_vm0, %v2730_v21 }
 0x169   : > { %vm1411_vm14 = vcmp.lt.s32.totalorder %v9104_v62, 1  ;;  %v1395_v11 = vshrl.u32 %v12033_v33, %v1394_v28  ;;  %v1397_v15 = vshrl.u32 %v12022_v35, %v1394_v28  ;;  %v1400_v16 = vshrl.u32 %v12031_v40, %v1394_v28  ;;  %2955 = vmatprep.mubr.f32.mxu0 %v12019_v12  ;;  %3092 = vmatprep.mubr.f32.mxu1 %v12019_v12 }
 0x16a   : > { %v1230_v8 = vsel %vm1228_vm13, %v1229_v4, %v9093_v57  ;;  %v1403_v22 = vshrl.u32 %v12025_v44, %v1394_v28  ;;  %v1405_v27 = vshll.u32 %v12025_v44, %v1393_v0  ;;  %v1406_v32 = vshrl.u32 %v12029_v46, %v1394_v28 }
 0x16b   : > { %v1231_v19 = vadd.s32 %v1230_v8, %v1226_v1  ;;  %v1398_v34 = vor.u32 %v1397_v15, %v1396_v26  ;;  %v1401_v36 = vor.u32 %v1400_v16, %v1399_v5  ;;  %v1408_v43 = vshll.u32 %v12029_v46, %v1393_v0  ;;  %v2732_v26 = vld [vmem:[%s12017_s1 + $0xe8] sm:$0xff] }
 0x16c   : > { %v9138_v45 = vmul.f32 3.1415927, %v1050_v39  ;;  %v1404_v53 = vor.u32 %v1403_v22, %v1402_v7  ;;  %v1407_v57 = vor.u32 %v1406_v32, %v1405_v27  ;;  %v1409_v18 = vshrl.u32 %v12027_v61, %v1394_v28  ;;  %7464 = vmatmul.mubr.msk.f32.gmra.mrb[36].mxu0 %vm363_vm0, %v2731_v50  ;;  %7476 = vmatmul.mubr.msk.f32.gmra.mrb[36].mxu1 %vm363_vm0, %v2731_v50 }
 0x16d   : > { %v1232_v52 = vadd.s32 536870912, %v1231_v19  ;;  %vm1412_vm15 = vcmp.lt.s32.totalorder %v9104_v62, 2  ;;  %vm1413_vm1 = vcmp.lt.s32.totalorder %v9104_v62, 3  ;;  %vm1414_vm3 = vcmp.lt.s32.totalorder %v9104_v62, 4  ;;  %2961 = vmatprep.mubr.f32.mxu0 %v12019_v12  ;;  %3098 = vmatprep.mubr.f32.mxu1 %v12019_v12 }
 0x16e   : > { %v1419_v24 = vsel %vm1411_vm14, %v1398_v34, %v1401_v36  ;;  %v1410_v1 = vor.u32 %v1409_v18, %v1408_v43  ;;  %v1416_v4 = vsel %vm1414_vm3, %v1404_v53, 2102212464  ;;  %v1420_v28 = vsel %vm1414_vm3, %v1407_v57, 920167782 }
 0x16f   : > { %v9154_v0 = vshrl.u32 %v1232_v52, 30  ;;  %v1421_v39 = vsel %vm1413_vm1, %v1404_v53, %v1420_v28  ;;  %v216_v21 = vmul.f32 %v208_v29, %v9147_v58  ;;  %v1415_v7 = vsel %vm1411_vm14, %v1395_v11, %v1398_v34 }
 0x170   : > { %v1422_v8 = vsel %vm1412_vm15, %v1419_v24, %v1421_v39  ;;  %v1423_v15 = vsel %vm1411_vm14, %v1401_v36, %v1404_v53  ;;  %v1417_v29 = vsel %vm1413_vm1, %v1401_v36, %v1416_v4  ;;  %v1424_v16 = vsel %vm1414_vm3, %v1410_v1, 1326507024  ;;  %7465 = vmatmul.mubr.msk.f32.gmra.mrb[38].mxu0 %vm363_vm0, %v2732_v26  ;;  %7477 = vmatmul.mubr.msk.f32.gmra.mrb[38].mxu1 %vm363_vm0, %v2732_v26 }
 0x171   : > { %v1234_v5 = vshll.u32 %v9154_v0, 30  ;;  %v9182_v22 = vmul.u32.u64.low %v9107_v2, %v1422_v8  ;;  %v9183_v27 = vmul.u32.u64.high %v9107_v2, %v1422_v8, %v9182_v22  ;;  %v1425_v11 = vsel %vm1413_vm1, %v1407_v57, %v1424_v16  ;;  %2967 = vmatprep.mubr.f32.mxu0 %v12019_v12  ;;  %3104 = vmatprep.mubr.f32.mxu1 %v12019_v12 }
 0x172   : > { %v1070_v34 = vand.u32 2139095040, %v9138_v45  ;;  %v1426_v36 = vsel %vm1412_vm15, %v1423_v15, %v1425_v11  ;;  %v224_v43 = vrot.slane %v216_v21, 3  ;;  %v1418_v52 = vsel %vm1412_vm15, %v1415_v7, %v1417_v29  ;;  %v2734_v21 = vld [vmem:[%s12017_s1 + $0xf8] sm:$0xff] }
 0x173   : > { %v9186_v32 = vsub.s32 %v1231_v19, %v1234_v5  ;;  %v2733_v19 = vld [vmem:[%s12017_s1 + $0xf0] sm:$0xff]  ;;  %v9204_v53 = vmul.u32.u64.low %v9107_v2, %v1426_v36  ;;  %v9205_v57 = vmul.u32.u64.high %v9107_v2, %v1426_v36, %v9204_v53  ;;  %v1437_v1 = vadd.s32 1, %v9183_v27 }
 0x174   : > { %v1071_v18 = vshrl.u32 %v1070_v34, 23  ;;  %v12036_v4 = vand.u32 2147483647, %v9138_v45  ;;  %7466 = vmatmul.mubr.msk.f32.gmra.mrb[40].mxu0 %vm363_vm0, %v2733_v19  ;;  %7478 = vmatmul.mubr.msk.f32.gmra.mrb[40].mxu1 %vm363_vm0, %v2733_v19  ;;  %v1434_v28 = vmul.u32 %v9107_v2, %v1418_v52  ;;  %v245_v62 = vsel %vm230_vm2, %v224_v43, 0.0 }
 0x175   : > { %v1237_v50 = vsub.s32 0, %v9186_v32  ;;  %2973 = vmatprep.mubr.f32.mxu0 %v12019_v12  ;;  %3110 = vmatprep.mubr.f32.mxu1 %v12019_v12  ;;  %vm1436_vm4 = vc.u32 %v9205_v57, %v9182_v22  ;;  %v246_v15 = vrot.slane %v245_v62, 4  ;;  %v1227_v16 = vadd.s32 %v9092_v56, %v9089_v54 }
 0x176   : > { %v7392_v39 = vadd.s32 4294967169, %v1071_v18  ;;  %v1438_v8 = vsel %vm1436_vm4, %v1437_v1, %v9183_v27  ;;  %v1074_v2 = vand.u32 8388607, %v12036_v4  ;;  %vm1173_vm13 = vcmp.lt.s32.totalorder %v8964_v55, 0 }
 0x177   : > { %v7397_v24 = vmin.u32 %v1237_v50, %v9186_v32  ;;  %v1439_v29 = vadd.s32 %v1438_v8, %v1434_v28  ;;  %v247_v52 = vadd.f32 %v246_v15, %v245_v62  ;;  %vm9282_vm15 = vcmp.le.f32.partialorder %v1171_v3, 0.7853982 }
 0x178   : > { %v1077_v5 = vadd.s32 1, %v7392_v39  ;;  %7467 = vmatmul.mubr.msk.f32.gmra.mrb[42].mxu0 %vm363_vm0, %v2734_v21  ;;  %7479 = vmatmul.mubr.msk.f32.gmra.mrb[42].mxu1 %vm363_vm0, %v2734_v21  ;;  %v1075_v50 = vor.u32 8388608, %v1074_v2  ;;  %v1257_v3 = vsub.s32 4, %v9154_v0  ;;  %vm1381_vm1 = vcmp.lt.s32.totalorder %v8993_v6, 0 }
 0x179   : > { %v1239_v26 = vclz %v7397_v24  ;;  %3243 = vmatprep.mubr.f32.mxu0 %v12019_v12  ;;  %3380 = vmatprep.mubr.f32.mxu1 %v12019_v12  ;;  %v1440_v34 = vadd.s32 536870912, %v1439_v29  ;;  %v248_v2 = vrot.slane %v247_v52, 2  ;;  %vm9300_vm3 = vcmp.le.f32.partialorder %v1379_v25, 0.7853982 }
 0x17a   : > { %vm1078_vm6 = vcmp.gt.s32.totalorder %v1077_v5, 0 }
 0x17b   : > { %v7398_v7 = vadd.s32 4294967294, %v1239_v26  ;;  %v1079_v11 = vsel %vm1078_vm6, %v1077_v5, 0  ;;  %v9231_v18 = vshrl.u32 %v1440_v34, 30 }
 0x17c   : > { %v1081_v36 = vand.u32 31, %v1079_v11  ;;  %v1080_v26 = vshrl.u32 %v1079_v11, 5 }
 0x17d   : > { %vm7399_vm7 = vcmp.lt.s32.totalorder %v7398_v7, 0  ;;  %v1442_v21 = vshll.u32 %v9231_v18, 30 }
 0x17e   : > { %v1242_v27 = vsel %vm7399_vm7, 0, %v7398_v7  ;;  %v1082_v24 = vsub.s32 32, %v1081_v36  ;;  %v1084_v54 = vshll.u32 %v12033_v33, %v1081_v36  ;;  %v1087_v28 = vshll.u32 %v12022_v35, %v1081_v36 }
 0x17f   : > { %v1243_v43 = vsub.s32 32, %v1242_v27  ;;  %v1247_v19 = vsub.s32 4294967266, %v1242_v27  ;;  %v1244_v53 = vshll.u32 %v9186_v32, %v1242_v27  ;;  %v1090_v39 = vshll.u32 %v12031_v40, %v1081_v36 }
 0x180   : > { %v1085_v5 = vshrl.u32 %v12022_v35, %v1082_v24  ;;  %v1093_v62 = vshll.u32 %v12025_v44, %v1081_v36  ;;  %v1088_v32 = vshrl.u32 %v12031_v40, %v1082_v24  ;;  %v1091_v8 = vshrl.u32 %v12025_v44, %v1082_v24 }
 0x181   : > { %v1245_v56 = vshrl.u32 %v1227_v16, %v1243_v43  ;;  %v1248_v1 = vadd.s32 127, %v1247_v19  ;;  %v1443_v16 = vsub.s32 %v1439_v29, %v1442_v21  ;;  %v1094_v27 = vshrl.u32 %v12029_v46, %v1082_v24 }
 0x182   : > { %v1096_v34 = vshll.u32 %v12029_v46, %v1081_v36  ;;  %v1086_v19 = vor.u32 %v1085_v5, %v1084_v54  ;;  %v1089_v12 = vor.u32 %v1088_v32, %v1087_v28  ;;  %v1092_v11 = vor.u32 %v1091_v8, %v1090_v39 }
 0x183   : > { %v1249_v7 = vshll.u32 %v1248_v1, 23  ;;  %v1246_v15 = vor.u32 %v1245_v56, %v1244_v53  ;;  %v1445_v30 = vsub.s32 0, %v1443_v16  ;;  %v1095_v35 = vor.u32 %v1094_v27, %v1093_v62  ;;  %v9245_v53 = vpop.permute.xlu1 %2749 }
 0x184   : > { %v1097_v59 = vshrl.u32 %v12027_v61, %v1082_v24  ;;  %vm1099_vm8 = vcmp.lt.s32.totalorder %v1080_v26, 1  ;;  %v1083_v1 = vshrl.u32 %v12033_v33, %v1082_v24  ;;  %vm1101_vm9 = vcmp.lt.s32.totalorder %v1080_v26, 3  ;;  %12108 = vst [vmem:[#allocation8_spill] sm:$0xff] %v9245_v53 }
 0x185   : > { %v1250_v43 = vor.u32 4788187, %v1249_v7  ;;  %vm1102_vm10 = vcmp.lt.s32.totalorder %v1080_v26, 4  ;;  %v1115_v44 = vshll.u32 %v1075_v50, 8  ;;  %v7405_v29 = vmin.u32 %v1445_v30, %v1443_v16 }
 0x186   : > { %v1098_v56 = vor.u32 %v1097_v59, %v1096_v34  ;;  %vm1100_vm11 = vcmp.lt.s32.totalorder %v1080_v26, 2  ;;  %v1104_v36 = vsel %vm1102_vm10, %v1092_v11, 2102212464  ;;  %v1253_v54 = vcvt.s32.f32 %v1246_v15 }
 0x187   : > { %v1107_v28 = vsel %vm1099_vm8, %v1086_v19, %v1089_v12  ;;  %v1108_v39 = vsel %vm1102_vm10, %v1095_v35, 920167782  ;;  %v249_v21 = vadd.f32 %v248_v2, %v247_v52  ;;  %v1251_v5 = vand.u32 2147483647, %v1250_v43  ;;  %v9262_v43 = vpop.permute.xlu1 %2759 }
 0x188   : > { %v1447_v62 = vclz %v7405_v29  ;;  %v1109_v24 = vsel %vm1101_vm9, %v1092_v11, %v1108_v39  ;;  %v1111_v7 = vsel %vm1099_vm8, %v1089_v12, %v1092_v11  ;;  %v1103_v50 = vsel %vm1099_vm8, %v1083_v1, %v1086_v19  ;;  %12109 = vst [vmem:[#allocation9_spill] sm:$0xff] %v9262_v43 }
 0x189   : > { %v1105_v30 = vsel %vm1101_vm9, %v1089_v12, %v1104_v36  ;;  %v1110_v59 = vsel %vm1100_vm11, %v1107_v28, %v1109_v24  ;;  %v1112_v32 = vsel %vm1102_vm10, %v1098_v56, 1326507024  ;;  %v250_v2 = vrot.slane %v249_v21, 1 }
 0x18a   : > { %v7406_v8 = vadd.s32 4294967294, %v1447_v62  ;;  %v1113_v15 = vsel %vm1101_vm9, %v1095_v35, %v1112_v32  ;;  %v9257_v27 = vmul.u32.u64.low %v1115_v44, %v1110_v59  ;;  %v9258_v34 = vmul.u32.u64.high %v1115_v44, %v1110_v59, %v9257_v27 }
 0x18b   : > { %v1114_v52 = vsel %vm1100_vm11, %v1111_v7, %v1113_v15  ;;  %v1254_v11 = vmul.f32 %v1253_v54, %v1251_v5  ;;  %v1435_v12 = vadd.s32 %v9182_v22, %v9205_v57  ;;  %v1106_v19 = vsel %vm1100_vm11, %v1103_v50, %v1105_v30  ;;  %v9276_v22 = vpop.permute.xlu1 %2769 }
 0x18c   : > { %vm7407_vm12 = vcmp.lt.s32.totalorder %v7406_v8, 0  ;;  %v9267_v29 = vmul.u32.u64.low %v1115_v44, %v1114_v52  ;;  %v9268_v56 = vmul.u32.u64.high %v1115_v44, %v1114_v52, %v9267_v29  ;;  %v1122_v39 = vmul.u32 %v1115_v44, %v1106_v19  ;;  %12111 = vst [vmem:[#allocation11_spill] sm:$0xff] %v9276_v22 }
 0x18d   : > { %v1450_v1 = vsel %vm7407_vm12, 0, %v7406_v8  ;;  %v1125_v62 = vadd.s32 1, %v9258_v34  ;;  %v9271_v24 = vadd.f32 %v250_v2, %v249_v21  ;;  %v1255_v7 = vxor.u32 2147483648, %v1254_v11 }
 0x18e   : > { %v1451_v35 = vsub.s32 32, %v1450_v1  ;;  %v1452_v36 = vshll.u32 %v1443_v16, %v1450_v1  ;;  %v1455_v28 = vsub.s32 4294967266, %v1450_v1  ;;  %vm1124_vm14 = vc.u32 %v9268_v56, %v9257_v27 }
 0x18f   : > { %12110 = vst [vmem:[#allocation10_spill] sm:$0xff] %v9271_v24  ;;  %v1126_v16 = vsel %vm1124_vm14, %v1125_v62, %v9258_v34  ;;  %v261_v44 = vmul.f32 2.0, %v9271_v24  ;;  %v1256_v30 = vsel %vm1173_vm13, %v1255_v7, %v1254_v11  ;;  %v9292_v2 = vpop.permute.xlu1 %2779  ;;  %vm285_vm4 = vcmp.lt.f32.partialorder %v9271_v24, 0.0 }
 0x190   : > { %v1453_v54 = vshrl.u32 %v1435_v12, %v1451_v35  ;;  %v1456_v5 = vadd.s32 127, %v1455_v28  ;;  %v1127_v50 = vadd.s32 %v1126_v16, %v1122_v39  ;;  %v1259_v34 = vsel %vm9282_vm15, %v8964_v55, %v1256_v30  ;;  %12114 = vst [vmem:[#allocation12_spill] sm:$0xff] %v9292_v2 }
 0x191   : > { %v265_v52 = vmul.f32 %v261_v44, %v9147_v58  ;;  %8568 = vcosq.f32 %v1259_v34  ;;  %v1258_v35 = vsel %vm1173_vm13, %v1257_v3, %v9154_v0  ;;  %v1465_v39 = vsub.s32 4, %v9231_v18 }
 0x192   : > { %v1454_v57 = vor.u32 %v1453_v54, %v1452_v36  ;;  %v1457_v26 = vshll.u32 %v1456_v5, 23  ;;  %v1128_v8 = vadd.s32 536870912, %v1127_v50  ;;  %8570 = vsinq.f32 %v1259_v34 }
 0x193   : > { %v273_v29 = vrot.slane %v265_v52, 3  ;;  %v9315_v62 = vpop.permute.xlu1 %2789  ;;  %v9318_v7 = vsel %vm285_vm4, -1.0, %v8674_v37  ;;  %v1260_v0 = vsel %vm9282_vm15, 0, %v1258_v35  ;;  %v7211_v37 = vrot.slane %v8941_v41, 6 }
 0x194   : > { %v1458_v59 = vor.u32 4788187, %v1457_v26  ;;  %v1461_v32 = vcvt.s32.f32 %v1454_v57  ;;  %v9295_v19 = vshrl.u32 %v1128_v8, 30  ;;  %12117 = vst [vmem:[#allocation13_spill] sm:$0xff] %v9315_v62  ;;  %12118 = vst [vmem:[#allocation14_spill] sm:$0xff] %v9318_v7  ;;  %v9329_v5 = vmul.f32 %v9318_v7, %v9147_v58 }
 0x195   : > { %v9325_v54 = vadd.f32 %v273_v29, %v9004_v10  ;;  %v7195_v26 = vrot.slane %v8944_v42, 4  ;;  %v1466_v16 = vsel %vm1381_vm1, %v1465_v39, %v9231_v18  ;;  %v1264_v44 = vadd.s32 3, %v1260_v0  ;;  %7219 = vst [vmem:[%s9339_s9 + $0x68] sm:$0x1c] %v7211_v37 }
 0x196   : > { %v1459_v15 = vand.u32 2147483647, %v1458_v59  ;;  %v1130_v28 = vshll.u32 %v9295_v19, 30  ;;  %v1003_v58 = vrot.slane %v9329_v5, 3  ;;  %v9351_v18 = vsel %vm9300_vm3, 0, %v1466_v16 }
 0x197   : > { %7203 = vst [vmem:[%s9339_s9 + $0x68] ss:$-28 sps:$4 sm:$0x83] %v7195_v26   ;;  %v9347_v41 = vpop.permute.xlu1 %2799  ;;  %v2301_v8 = vand.u32 3, %v9351_v18  ;;  %v9359_v52 = vand.u32 3, %v1264_v44  ;;  %v1027_v3 = vrot.slane %v9004_v10, 2  ;;  %v9365_v35 = vadd.s32 %v9257_v27, %v9268_v56 }
 0x198   : > { %v1462_v12 = vmul.f32 %v1461_v32, %v1459_v15  ;;  %v9331_v57 = vsub.s32 %v1127_v50, %v1130_v28  ;;  %v1015_v50 = vrot.slane %v9325_v54, 5  ;;  %12119 = vst [vmem:[#allocation15_spill] sm:$0xff] %v9347_v41  ;;  %v9356_v32 = vand.u32 3, %v1260_v0  ;;  %v653_v15 = vpop.permute.xlu0 %652 }
 0x199   : > { %vm2302_vm8 = vcmp.lt.s32.totalorder %v2301_v8, 2  ;;  %vm2303_vm9 = vcmp.eq.s32.totalorder %v2301_v8, 0  ;;  %vm1267_vm11 = vcmp.eq.s32.totalorder %v9359_v52, 0  ;;  %vm1270_vm12 = vcmp.eq.s32.totalorder %v9359_v52, 2 }
 0x19a   : > { %v1463_v1 = vxor.u32 2147483648, %v1462_v12  ;;  %v1133_v21 = vsub.s32 0, %v9331_v57  ;;  %vm2097_vm6 = vcmp.eq.s32.totalorder %v9356_v32, 0  ;;  %vm2100_vm7 = vcmp.eq.s32.totalorder %v9356_v32, 2 }
 0x19b   : > { %v9345_v42 = vpop.eup %8568  ;;  %v658_v27 = vpop.permute.xlu1 %657  ;;  %vm2096_vm13 = vcmp.lt.s32.totalorder %v9356_v32, 2  ;;  %vm1263_vm14 = vweird.f32 %v8964_v55  ;;  %vm1266_vm15 = vcmp.lt.s32.totalorder %v9359_v52, 2  ;;  %v12139_v41 = vmov 2131351028  }
 0x19c   : > { %v1464_v36 = vsel %vm1381_vm1, %v1463_v1, %v1462_v12  ;;  %v7393_v30 = vmin.u32 %v1133_v21, %v9331_v57  ;;  %v9354_v59 = vpop.eup %8570  ;;  %v1271_v11 = vxor.u32 2147483648, %v9345_v42  ;;  %vm1069_vm1 = vcmp.lt.s32.totalorder %v9138_v45, 0 }
 0x19d   : > { %v1467_v25 = vsel %vm9300_vm3, %v8993_v6, %v1464_v36  ;;  %v1047_v36 = vsel %vm230_vm2, %v1003_v58, %v1015_v50  ;;  %v1268_v26 = vxor.u32 2147483648, %v9354_v59  ;;  %vm2306_vm2 = vcmp.eq.s32.totalorder %v2301_v8, 2 }
 0x19e   : > { %8572 = vcosq.f32 %v1467_v25  ;;  %v1135_v37 = vclz %v7393_v30  ;;  %v1052_v30 = vsel %vm1049_vm5, %v1047_v36, %v1027_v3  ;;  %vm1471_vm5 = vweird.f32 %v8993_v6 }
 0x19f   : > { %8574 = vsinq.f32 %v1467_v25  ;;  %v1272_v32 = vsel %vm1270_vm12, %v1271_v11, %v9354_v59  ;;  %vm1054_vm3 = vcmask 1040384   ;;  %v12140_v62 = vmov 2102212464  }
 0x1a0   : > { %v7394_v33 = vadd.s32 4294967294, %v1135_v37 }
 0x1a2   : > { %vm7395_vm10 = vcmp.lt.s32.totalorder %v7394_v33, 0 }
 0x1a8   : > { %v9368_v28 = vpop.eup %8572 }
 0x1a9   : > { %v9371_v16 = vpop.eup %8574 }
 0x201   : > { %v733_v34 = vpop.f32.mrb[16].mxu0 }
 0x202   : > { %v734_v12 = vadd.f32 %v733_v34, %v653_v15  ;;  %v810_v1 = vpop.f32.mrb[16].mxu1  ;;  %v735_v29 = vpop.f32.mrb[17].mxu0  ;;  %v1479_v34 = vxor.u32 2147483648, %v9368_v28 }
 0x203   : > { %v811_v39 = vadd.f32 %v810_v1, %v653_v15  ;;  %v736_v25 = vadd.f32 %v735_v29, %v653_v15  ;;  %v812_v0 = vpop.f32.mrb[17].mxu1 }
 0x204   : > { %v7384_v44 = vmul.f32 -1.442695, %v734_v12  ;;  %v813_v21 = vadd.f32 %v812_v0, %v653_v15  ;;  %v1476_v0 = vxor.u32 2147483648, %v9371_v16 }
 0x205   : > { %v7386_v56 = vmul.f32 -1.442695, %v811_v39  ;;  %v7385_v58 = vmul.f32 -1.442695, %v736_v25  ;;  %v739_v50 = vpop.f32.mrb[18].mxu0 }
 0x206   : > { %8576 = vpow2.f32 %v7384_v44  ;;  %v7387_v1 = vmul.f32 -1.442695, %v813_v21  ;;  %v740_v12 = vadd.f32 %v739_v50, %v658_v27  ;;  %v816_v15 = vpop.f32.mrb[18].mxu1  ;;  %v741_v29 = vpop.f32.mrb[19].mxu0  ;;  %v2305_v44 = vsel %vm2303_vm9, %v9368_v28, %v1476_v0 }
 0x207   : > { %8578 = vpow2.f32 %v7386_v56  ;;  %v817_v61 = vadd.f32 %v816_v15, %v658_v27  ;;  %v742_v46 = vadd.f32 %v741_v29, %v658_v27  ;;  %v818_v40 = vpop.f32.mrb[19].mxu1  ;;  %v2308_v21 = vsel %vm2306_vm2, %v1479_v34, %v9371_v16 }
 0x208   : > { %8580 = vpow2.f32 %v7385_v58  ;;  %v7388_v39 = vmul.f32 -1.442695, %v740_v12  ;;  %v819_v25 = vadd.f32 %v818_v40, %v658_v27  ;;  %v2309_v40 = vsel %vm2302_vm8, %v2305_v44, %v2308_v21 }
 0x209   : > { %8582 = vpow2.f32 %v7387_v1  ;;  %v7390_v47 = vmul.f32 -1.442695, %v817_v61  ;;  %v7389_v4 = vmul.f32 -1.442695, %v742_v46  ;;  %v7197_v46 = vrot.slane %v8958_v51, 4 }
 0x20a   : > { %8584 = vpow2.f32 %v7388_v39  ;;  %v7391_v36 = vmul.f32 -1.442695, %v819_v25  ;;  %v9390_v61 = vmul.f32 3.1415927, %v1052_v30  ;;  %v9394_v37 = vsel %vm1471_vm5, nan, %v2309_v40 }
 0x20b   : > { %8586 = vpow2.f32 %v7390_v47  ;;  %v7213_v27 = vrot.slane %v8951_v48, 6  ;;  %7205 = vst [vmem:[%s9339_s9 + $0x78] ss:$-28 sps:$4 sm:$0x83] %v7197_v46   ;;  %v1138_v56 = vsel %vm7395_vm10, 0, %v7394_v33  ;;  %v2099_v48 = vsel %vm2097_vm6, %v9345_v42, %v1268_v26 }
 0x20c   : > { %8588 = vpow2.f32 %v7389_v4  ;;  %v1139_v47 = vsub.s32 32, %v1138_v56  ;;  %v1140_v51 = vshll.u32 %v9331_v57, %v1138_v56  ;;  %v1143_v8 = vsub.s32 4294967266, %v1138_v56 }
 0x20d   : > { %8590 = vpow2.f32 %v7391_v36  ;;  %7221 = vst [vmem:[%s9339_s9 + $0x78] sm:$0x1c] %v7213_v27  ;;  %v2102_v33 = vsel %vm2100_vm7, %v1271_v11, %v9354_v59  ;;  %v1278_v4 = vand.u32 2139095040, %v9390_v61  ;;  %v1269_v12 = vsel %vm1267_vm11, %v9345_v42, %v1268_v26 }
 0x20e   : > { %v1141_v57 = vshrl.u32 %v9365_v35, %v1139_v47  ;;  %v1144_v50 = vadd.s32 127, %v1143_v8  ;;  %v2103_v35 = vsel %vm2096_vm13, %v2099_v48, %v2102_v33  ;;  %v1472_v21 = vadd.s32 3, %v9351_v18 }
 0x20f   : > { %v1279_v40 = vshrl.u32 %v1278_v4, 23  ;;  %v1273_v59 = vsel %vm1266_vm15, %v1269_v12, %v1272_v32  ;;  %v9432_v11 = vsel %vm1263_vm14, nan, %v2103_v35  ;;  %v1153_v48 = vsub.s32 4, %v9295_v19 }
 0x210   : > { %v8577_v58 = vpop.eup %8576  ;;  %v1142_v39 = vor.u32 %v1141_v57, %v1140_v51  ;;  %v1145_v25 = vshll.u32 %v1144_v50, 23  ;;  %v9445_v12 = vmul.f32 %v8938_v38, %v8928_v23  ;;  %v12120_v23 = vand.u32 2147483647, %v9138_v45 }
 0x211   : > { %v8579_v30 = vpop.eup %8578  ;;  %v845_v1 = vadd.f32 1.0, %v8577_v58  ;;  %v9435_v58 = vand.u32 3, %v1472_v21  ;;  %v7400_v57 = vadd.s32 4294967169, %v1279_v40 }
 0x212   : > { %v8581_v15 = vpop.eup %8580  ;;  %v847_v29 = vadd.f32 1.0, %v8579_v30  ;;  %v1146_v27 = vor.u32 4788187, %v1145_v25  ;;  %v1149_v56 = vcvt.s32.f32 %v1142_v39  ;;  %v9440_v30 = vsel %vm1263_vm14, nan, %v1273_v59 }
 0x213   : > { %v8583_v36 = vpop.eup %8582  ;;  %8592 = vrcp.f32 %v845_v1  ;;  %v846_v44 = vadd.f32 1.0, %v8581_v15  ;;  %v3900_v1 = vmul.f32 2.0, %v9432_v11  ;;  %v1154_v15 = vsel %vm1069_vm1, %v1153_v48, %v9295_v19 }
 0x214   : > { %v8585_v46 = vpop.eup %8584  ;;  %8594 = vrcp.f32 %v847_v29  ;;  %v848_v26 = vadd.f32 1.0, %v8583_v36  ;;  %v1147_v18 = vand.u32 2147483647, %v1146_v27  ;;  %v12037_v29 = vand.u32 2147483647, %v9390_v61 }
 0x215   : > { %v8587_v42 = vpop.eup %8586  ;;  %8596 = vrcp.f32 %v846_v44  ;;  %v849_v47 = vadd.f32 1.0, %v8585_v46  ;;  %vm1478_vm4 = vcmp.eq.s32.totalorder %v9435_v58, 2  ;;  %v1285_v55 = vadd.s32 1, %v7400_v57 }
 0x216   : > { %v8589_v51 = vpop.eup %8588  ;;  %8598 = vrcp.f32 %v848_v26  ;;  %v851_v8 = vadd.f32 1.0, %v8587_v42  ;;  %v1150_v52 = vmul.f32 %v1149_v56, %v1147_v18  ;;  %v9453_v35 = vmul.f32 2.0, %v9440_v30 }
 0x217   : > { %v8591_v33 = vpop.eup %8590  ;;  %8600 = vrcp.f32 %v849_v47  ;;  %v850_v4 = vadd.f32 1.0, %v8589_v51  ;;  %vm1474_vm6 = vcmp.lt.s32.totalorder %v9435_v58, 2  ;;  %vm1475_vm7 = vcmp.eq.s32.totalorder %v9435_v58, 0 }
 0x218   : > { %8602 = vrcp.f32 %v851_v8  ;;  %v852_v50 = vadd.f32 1.0, %v8591_v33  ;;  %v1151_v32 = vxor.u32 2147483648, %v1150_v52  ;;  %vm9459_vm8 = vcmp.le.f32.partialorder %v12120_v23, 0.7853982 }
 0x219   : > { %8604 = vrcp.f32 %v850_v4  ;;  %v9466_v39 = vmul.f32 %v3900_v1, %v9432_v11  ;;  %v9472_v36 = vsel %vm9459_vm8, 0, %v1154_v15  ;;  %v300_v44 = vmax.f32 %v9445_v12, 0.0 }
 0x21a   : > { %8606 = vrcp.f32 %v852_v50  ;;  %v1152_v25 = vsel %vm1069_vm1, %v1151_v32, %v1150_v52  ;;  %v1480_v26 = vsel %vm1478_vm4, %v1479_v34, %v9371_v16  ;;  %v9484_v27 = vand.u32 8388607, %v12037_v29 }
 0x21b   : > { %v1477_v59 = vsel %vm1475_vm7, %v9368_v28, %v1476_v0  ;;  %vm1286_vm9 = vcmp.gt.s32.totalorder %v1285_v55, 0  ;;  %v1155_v18 = vsel %vm9459_vm8, %v9138_v45, %v1152_v25  ;;  %v7194_v16 = vrot.slane %v9009_v13, 4 }
 0x21c   : > { %v3902_v33 = vmul.f32 2.0, %v9394_v37  ;;  %v7210_v4 = vrot.slane %v9012_v17, 6  ;;  %v12129_v50 = vrot.slane %v8910_v20, 2  ;;  %v1287_v17 = vsel %vm1286_vm9, %v1285_v55, 0 }
 0x21d   : > { %v9463_v19 = vpop.eup %8592  ;;  %7202 = vst [vmem:[%s9339_s9 + $0x60] ss:$-28 sps:$4 sm:$0x83] %v7194_v16   ;;  %v12131_v20 = vrot.slane %v8914_v63, 2  ;;  %8608 = vcosq.f32 %v1155_v18  ;;  %v9560_v58 = vand.u32 31, %v1287_v17  ;;  %v9580_v6 = vmin.f32 %v300_v44, 1.0 }
 0x21e   : > { %12123 = vst [vmem:[#allocation16_spill] sm:$0xff] %v9463_v19  ;;  %v9475_v21 = vpop.eup %8594  ;;  %v7146_v40 = vrot.slane %v9463_v19, 4  ;;  %v1037_v46 = vrot.slane %v9463_v19, 7  ;;  %7218 = vst [vmem:[%s9339_s9 + $0x60] sm:$0x1c] %v7210_v4  ;;  %8610 = vsinq.f32 %v1155_v18  ;;  %v12133_v4 = vrot.slane %v8922_v14, 2 }
 0x21f   : > { %12124 = vst [vmem:[#allocation17_spill] sm:$0xff] %v9475_v21  ;;  %v9486_v56 = vpop.eup %8596  ;;  %v7148_v42 = vrot.slane %v9475_v21, 4  ;;  %v1039_v47 = vrot.slane %v9475_v21, 7  ;;  %12135 = vst [vmem:[#allocation25_spill] sm:$0xff] %v9580_v6 }
 0x220   : > { %12125 = vst [vmem:[#allocation18_spill] sm:$0xff] %v9486_v56  ;;  %v9493_v51 = vpop.eup %8598  ;;  %7154 = vst [vmem:[%s9339_s9 + $0x40] ss:$-28 sps:$4 sm:$0xc1] %v7146_v40   ;;  %v7147_v34 = vrot.slane %v9486_v56, 4  ;;  %v1038_v8 = vrot.slane %v9486_v56, 7  ;;  %v1055_v18 = vsel %vm1054_vm3, %v12133_v4, %v1037_v46 }
 0x221   : > { %12126 = vst [vmem:[#allocation19_spill] sm:$0xff] %v9493_v51  ;;  %7094 = vst [vmem:[%s9339_s9] sm:$0xc0] %v1037_v46  ;;  %v9503_v48 = vpop.eup %8600  ;;  %v7149_v28 = vrot.slane %v9493_v51, 4  ;;  %v1040_v0 = vrot.slane %v9493_v51, 7  ;;  %v9523_v1 = vsel %vm1054_vm3, %v1027_v3, %v1039_v47 }
 0x222   : > { %12127 = vst [vmem:[#allocation20_spill] sm:$0xff] %v9503_v48  ;;  %7156 = vst [vmem:[%s9339_s9 + $0x50] ss:$-28 sps:$4 sm:$0xc1] %v7148_v42   ;;  %v9511_v57 = vpop.eup %8602  ;;  %v7082_v13 = vrot.slane %v9503_v48, 7  ;;  %v1056_v52 = vsel %vm1054_vm3, %v12129_v50, %v1038_v8 }
 0x223   : > { %7096 = vst [vmem:[%s9339_s9 + $0x10] sm:$0xc0] %v1039_v47  ;;  %12128 = vst [vmem:[#allocation21_spill] sm:$0xff] %v9511_v57  ;;  %v9526_v32 = vpop.eup %8604  ;;  %v7086_v15 = vrot.slane %v9511_v57, 7  ;;  %v9531_v23 = vmul.f32 3.1415927, %v1056_v52  ;;  %v1058_v38 = vsel %vm1054_vm3, %v12131_v20, %v1040_v0  ;;  %v3910_v52 = vmul.f32 %v3902_v33, %v9394_v37 }
 0x224   : > { %7155 = vst [vmem:[%s9339_s9 + $0x48] ss:$-28 sps:$4 sm:$0xc1] %v7147_v34   ;;  %7095 = vst [vmem:[%s9339_s9 + $0x8] sm:$0xc0] %v1038_v8  ;;  %v9537_v10 = vpop.eup %8606  ;;  %v7083_v3 = vsel %vm1054_vm3, %v1037_v46, %v7082_v13  ;;  %v7084_v55 = vrot.slane %v9526_v32, 7  ;;  %v1481_v34 = vsel %vm1474_vm6, %v1477_v59, %v1480_v26 }
 0x225   : > { %12130 = vst [vmem:[#allocation22_spill] sm:$0xff] %v9526_v32  ;;  %7157 = vst [vmem:[%s9339_s9 + $0x58] ss:$-28 sps:$4 sm:$0xc1] %v7149_v28   ;;  %v9541_v25 = vmul.f32 3.1415927, %v1058_v38  ;;  %v7087_v40 = vsel %vm1054_vm3, %v1039_v47, %v7086_v15 }
 0x226   : > { %7097 = vst [vmem:[%s9339_s9 + $0x18] sm:$0xc0] %v1040_v0  ;;  %12132 = vst [vmem:[#allocation23_spill] sm:$0xff] %v9537_v10  ;;  %v7088_v63 = vrot.slane %v9537_v10, 7  ;;  %v12039_v42 = vand.u32 2147483647, %v9531_v23  ;;  %v7085_v16 = vsel %vm1054_vm3, %v1038_v8, %v7084_v55 }
 0x227   : > { %7098 = vst [vmem:[%s9339_s9 + $0x20] sm:$0xf] %v7083_v3  ;;  %7100 = vst [vmem:[%s9339_s9 + $0x30] sm:$0xf] %v7087_v40  ;;  %v1590_v28 = vand.u32 2139095040, %v9531_v23  ;;  %v1160_v13 = vadd.s32 3, %v9472_v36  ;;  %v9597_v12 = vpop.eup %8608 }
 0x228   : > { %7099 = vst [vmem:[%s9339_s9 + $0x28] sm:$0xf] %v7085_v16  ;;  %v7089_v47 = vsel %vm1054_vm3, %v1040_v0, %v7088_v63  ;;  %v12038_v50 = vand.u32 2147483647, %v9541_v25  ;;  %v9565_v59 = vsel %vm1471_vm5, nan, %v1481_v34  ;;  %v1798_v14 = vand.u32 2139095040, %v9541_v25 }
 0x229   : > { %7101 = vst [vmem:[%s9339_s9 + $0x38] sm:$0xf] %v7089_v47  ;;  %v1591_v26 = vshrl.u32 %v1590_v28, 23  ;;  %v1283_v46 = vor.u32 8388608, %v9484_v27  ;;  %v1594_v8 = vand.u32 8388607, %v12039_v42 }
 0x22a   : > { %v1802_v0 = vand.u32 8388607, %v12038_v50  ;;  %v9573_v15 = vmul.f32 3.1415927, %v1055_v18  ;;  %v9576_v20 = vadd.f32 -1.0, %v9466_v39  ;;  %v1799_v38 = vshrl.u32 %v1798_v14, 23 }
 0x22b   : > { %v7412_v33 = vadd.s32 4294967169, %v1591_v26  ;;  %v9583_v3 = vmul.f32 2.0, %v9565_v59  ;;  %v9585_v27 = vadd.f32 -1.0, %v3910_v52  ;;  %v9587_v55 = vand.u32 3, %v1160_v13  ;;  %v9602_v13 = vpop.eup %8610 }
 0x22c   : > { %12134 = vst [vmem:[#allocation24_spill] sm:$0xff] %v9576_v20  ;;  %v9590_v40 = vsub.s32 32, %v9560_v58  ;;  %v7420_v34 = vadd.s32 4294967169, %v1799_v38  ;;  %v9593_v39 = vand.u32 3, %v9472_v36  ;;  %v9595_v16 = vshll.u32 %v1283_v46, 8 }
 0x22d   : > { %12136 = vst [vmem:[#allocation26_spill] sm:$0xff] %v9585_v27  ;;  %v1597_v63 = vadd.s32 1, %v7412_v33  ;;  %v1595_v44 = vor.u32 8388608, %v1594_v8  ;;  %v1803_v28 = vor.u32 8388608, %v1802_v0  ;;  %v1486_v4 = vand.u32 2139095040, %v9573_v15 }
 0x22e   : > { %v9600_v18 = vshrl.u32 %v1287_v17, 5  ;;  %v1805_v47 = vadd.s32 1, %v7420_v34  ;;  %v12137_v52 = vmov 683565275   ;;  %v12138_v36 = vmov 2475754826  }
 0x22f   : > { %vm1598_vm2 = vcmp.gt.s32.totalorder %v1597_v63, 0  ;;  %v9606_v26 = vshll.u32 %v12137_v52, %v9560_v58  ;;  %v9610_v14 = vshll.u32 %v12138_v36, %v9560_v58  ;;  %v1487_v33 = vshrl.u32 %v1486_v4, 23 }
 0x230   : > { %v1599_v46 = vsel %vm1598_vm2, %v1597_v63, 0  ;;  %v9614_v8 = vshrl.u32 %v12137_v52, %v9590_v40  ;;  %v9618_v17 = vshrl.u32 %v12138_v36, %v9590_v40  ;;  %vm1806_vm5 = vcmp.gt.s32.totalorder %v1805_v47, 0 }
 0x231   : > { %v1600_v0 = vshrl.u32 %v1599_v46, 5  ;;  %v1601_v38 = vand.u32 31, %v1599_v46  ;;  %v9621_v29 = vshll.u32 %v1595_v44, 8  ;;  %v9623_v50 = vshll.u32 %v1803_v28, 8 }
 0x232   : > { %v1807_v57 = vsel %vm1806_vm5, %v1805_v47, 0  ;;  %v7408_v32 = vadd.s32 4294967169, %v1487_v33  ;;  %v12141_v34 = vmov 920167782   ;;  %v12142_v33 = vmov 1326507024  }
 0x233   : > { %v1602_v42 = vsub.s32 32, %v1601_v38  ;;  %v1604_v10 = vshll.u32 %v12137_v52, %v1601_v38  ;;  %v1607_v48 = vshll.u32 %v12138_v36, %v1601_v38  ;;  %v1610_v46 = vshll.u32 %v12139_v41, %v1601_v38 }
 0x234   : > { %v1613_v2 = vshll.u32 %v12140_v62, %v1601_v38  ;;  %v1616_v44 = vshll.u32 %v12141_v34, %v1601_v38  ;;  %vm1619_vm10 = vcmp.lt.s32.totalorder %v1600_v0, 1  ;;  %vm1620_vm11 = vcmp.lt.s32.totalorder %v1600_v0, 2 }
 0x235   : > { %v1605_v28 = vshrl.u32 %v12138_v36, %v1602_v42  ;;  %v1608_v22 = vshrl.u32 %v12139_v41, %v1602_v42  ;;  %v1611_v63 = vshrl.u32 %v12140_v62, %v1602_v42  ;;  %v1603_v4 = vshrl.u32 %v12137_v52, %v1602_v42 }
 0x236   : > { %v1614_v47 = vshrl.u32 %v12141_v34, %v1602_v42  ;;  %v1617_v43 = vshrl.u32 %v12142_v33, %v1602_v42  ;;  %vm1621_vm12 = vcmp.lt.s32.totalorder %v1600_v0, 3  ;;  %vm1622_vm13 = vcmp.lt.s32.totalorder %v1600_v0, 4 }
 0x237   : > { %v1606_v53 = vor.u32 %v1605_v28, %v1604_v10  ;;  %v1609_v7 = vor.u32 %v1608_v22, %v1607_v48  ;;  %v1612_v24 = vor.u32 %v1611_v63, %v1610_v46  ;;  %v1809_v60 = vand.u32 31, %v1807_v57 }
 0x238   : > { %v1615_v9 = vor.u32 %v1614_v47, %v1613_v2  ;;  %v1618_v38 = vor.u32 %v1617_v43, %v1616_v44  ;;  %v1808_v63 = vshrl.u32 %v1807_v57, 5  ;;  %v1493_v46 = vadd.s32 1, %v7408_v32 }
 0x239   : > { %v1623_v21 = vsel %vm1619_vm10, %v1603_v4, %v1606_v53  ;;  %v1624_v19 = vsel %vm1622_vm13, %v1612_v24, 2102212464  ;;  %v1627_v51 = vsel %vm1619_vm10, %v1606_v53, %v1609_v7  ;;  %v1631_v49 = vsel %vm1619_vm10, %v1609_v7, %v1612_v24 }
 0x23a   : > { %v1625_v31 = vsel %vm1621_vm12, %v1609_v7, %v1624_v19  ;;  %v1628_v6 = vsel %vm1622_vm13, %v1615_v9, 920167782  ;;  %v1632_v56 = vsel %vm1622_vm13, %v1618_v38, 1326507024  ;;  %v1810_v42 = vsub.s32 32, %v1809_v60 }
 0x23b   : > { %v1626_v10 = vsel %vm1620_vm11, %v1623_v21, %v1625_v31  ;;  %v1629_v22 = vsel %vm1621_vm12, %v1612_v24, %v1628_v6  ;;  %v1633_v48 = vsel %vm1621_vm12, %v1615_v9, %v1632_v56  ;;  %v1812_v4 = vshll.u32 %v12137_v52, %v1809_v60 }
 0x23c   : > { %v1630_v43 = vsel %vm1620_vm11, %v1627_v51, %v1629_v22  ;;  %v1634_v2 = vsel %vm1620_vm11, %v1631_v49, %v1633_v48  ;;  %v1642_v31 = vmul.u32 %v9621_v29, %v1626_v10  ;;  %v1813_v9 = vshrl.u32 %v12138_v36, %v1810_v42 }
 0x23d   : > { %v9646_v53 = vmul.u32.u64.low %v9621_v29, %v1634_v2  ;;  %v9647_v44 = vmul.u32.u64.high %v9621_v29, %v1634_v2, %v9646_v53  ;;  %v9650_v7 = vmul.u32.u64.low %v9621_v29, %v1630_v43  ;;  %v9651_v19 = vmul.u32.u64.high %v9621_v29, %v1630_v43, %v9650_v7 }
 0x23e   : > { %v1815_v24 = vshll.u32 %v12138_v36, %v1809_v60  ;;  %v1816_v49 = vshrl.u32 %v12139_v41, %v1810_v42  ;;  %vm1163_vm14 = vcmp.eq.s32.totalorder %v9587_v55, 0  ;;  %vm1166_vm15 = vcmp.eq.s32.totalorder %v9587_v55, 2 }
 0x23f   : > { %v1818_v21 = vshll.u32 %v12139_v41, %v1809_v60  ;;  %v1819_v56 = vshrl.u32 %v12140_v62, %v1810_v42  ;;  %v1821_v51 = vshll.u32 %v12140_v62, %v1809_v60  ;;  %v1822_v57 = vshrl.u32 %v12141_v34, %v1810_v42 }
 0x240   : > { %v1814_v32 = vor.u32 %v1813_v9, %v1812_v4  ;;  %v1817_v29 = vor.u32 %v1816_v49, %v1815_v24  ;;  %v1824_v6 = vshll.u32 %v12141_v34, %v1809_v60  ;;  %v1825_v0 = vshrl.u32 %v12142_v33, %v1810_v42 }
 0x241   : > { %vm1644_vm1 = vc.u32 %v9647_v44, %v9650_v7  ;;  %v1645_v28 = vadd.s32 1, %v9651_v19  ;;  %v1811_v47 = vshrl.u32 %v12137_v52, %v1810_v42  ;;  %v1820_v38 = vor.u32 %v1819_v56, %v1818_v21 }
 0x242   : > { %vm1162_vm3 = vcmp.lt.s32.totalorder %v9587_v55, 2  ;;  %v1823_v10 = vor.u32 %v1822_v57, %v1821_v51  ;;  %v1826_v22 = vor.u32 %v1825_v0, %v1824_v6  ;;  %vm1827_vm4 = vcmp.lt.s32.totalorder %v1808_v63, 1 }
 0x243   : > { %vm1828_vm6 = vcmp.lt.s32.totalorder %v1808_v63, 2  ;;  %vm1994_vm7 = vcmp.eq.s32.totalorder %v9593_v39, 0  ;;  %vm1997_vm8 = vcmp.eq.s32.totalorder %v9593_v39, 2  ;;  %v1646_v60 = vsel %vm1644_vm1, %v1645_v28, %v9651_v19 }
 0x244   : > { %vm1829_vm9 = vcmp.lt.s32.totalorder %v1808_v63, 3  ;;  %vm1830_vm2 = vcmp.lt.s32.totalorder %v1808_v63, 4  ;;  %v1835_v48 = vsel %vm1827_vm4, %v1814_v32, %v1817_v29  ;;  %v1647_v43 = vadd.s32 %v1646_v60, %v1642_v31 }
 0x245   : > { %v1832_v2 = vsel %vm1830_vm2, %v1820_v38, 2102212464  ;;  %v1836_v4 = vsel %vm1830_vm2, %v1823_v10, 920167782  ;;  %v1839_v42 = vsel %vm1827_vm4, %v1817_v29, %v1820_v38  ;;  %v1831_v53 = vsel %vm1827_vm4, %v1811_v47, %v1814_v32 }
 0x246   : > { %v1837_v9 = vsel %vm1829_vm9, %v1820_v38, %v1836_v4  ;;  %v1840_v24 = vsel %vm1830_vm2, %v1826_v22, 1326507024  ;;  %vm1494_vm5 = vcmp.gt.s32.totalorder %v1493_v46, 0  ;;  %vm1993_vm10 = vcmp.lt.s32.totalorder %v9593_v39, 2 }
 0x247   : > { %v1648_v49 = vadd.s32 536870912, %v1647_v43  ;;  %v1833_v21 = vsel %vm1829_vm9, %v1817_v29, %v1832_v2  ;;  %v1838_v56 = vsel %vm1828_vm6, %v1835_v48, %v1837_v9  ;;  %v1841_v51 = vsel %vm1829_vm9, %v1823_v10, %v1840_v24 }
 0x248   : > { %vm1159_vm11 = vweird.f32 %v9138_v45  ;;  %v1842_v19 = vsel %vm1828_vm6, %v1839_v42, %v1841_v51  ;;  %v9679_v31 = vmul.u32.u64.low %v9623_v50, %v1838_v56  ;;  %v9680_v57 = vmul.u32.u64.high %v9623_v50, %v1838_v56, %v9679_v31 }
 0x249   : > { %v1296_v32 = vshrl.u32 %v12139_v41, %v9590_v40  ;;  %v1649_v6 = vshrl.u32 %v1648_v49, 30  ;;  %v9685_v0 = vmul.u32.u64.low %v9623_v50, %v1842_v19  ;;  %v9686_v28 = vmul.u32.u64.high %v9623_v50, %v1842_v19, %v9685_v0 }
 0x24a   : > { %v1495_v29 = vsel %vm1494_vm5, %v1493_v46, 0  ;;  %v1834_v47 = vsel %vm1828_vm6, %v1831_v53, %v1833_v21  ;;  %v12143_v38 = vxor.u32 2147483648, %v9602_v13  ;;  %v12144_v22 = vxor.u32 2147483648, %v9597_v12 }
 0x24b   : > { %v12145_v48 = vand.u32 2147483647, %v9573_v15  ;;  %v1650_v4 = vshll.u32 %v1649_v6, 30  ;;  %v1497_v42 = vand.u32 31, %v1495_v29  ;;  %v1298_v63 = vshll.u32 %v12139_v41, %v9560_v58 }
 0x24c   : > { %v1165_v10 = vsel %vm1163_vm14, %v9597_v12, %v12143_v38  ;;  %v1168_v60 = vsel %vm1166_vm15, %v12144_v22, %v9602_v13  ;;  %v1299_v46 = vshrl.u32 %v12140_v62, %v9590_v40  ;;  %v1853_v53 = vadd.s32 1, %v9680_v57 }
 0x24d   : > { %v1490_v2 = vand.u32 8388607, %v12145_v48  ;;  %v9708_v9 = vor.u32 %v9618_v17, %v9606_v26  ;;  %v1301_v24 = vshll.u32 %v12140_v62, %v9560_v58  ;;  %v1302_v49 = vshrl.u32 %v12141_v34, %v9590_v40 }
 0x24e   : > { %v9714_v21 = vsub.s32 %v1647_v43, %v1650_v4  ;;  %v1850_v56 = vmul.u32 %v9623_v50, %v1834_v47  ;;  %vm1852_vm12 = vc.u32 %v9686_v28, %v9679_v31  ;;  %v1169_v51 = vsel %vm1162_vm3, %v1165_v10, %v1168_v60 }
 0x24f   : > { %v1854_v19 = vsel %vm1852_vm12, %v1853_v53, %v9680_v57  ;;  %v1491_v0 = vor.u32 8388608, %v1490_v2  ;;  %v12146_v26 = vmov %v12143_v38  ;;  %v12147_v43 = vmov %v12144_v22 }
 0x250   : > { %v1996_v17 = vsel %vm1994_vm7, %v9597_v12, %v12146_v26  ;;  %v1999_v50 = vsel %vm1997_vm8, %v12147_v43, %v9602_v13  ;;  %v1653_v47 = vsub.s32 0, %v9714_v21  ;;  %v1673_v38 = vsub.s32 4, %v1649_v6 }
 0x251   : > { %v1855_v55 = vadd.s32 %v1854_v19, %v1850_v56  ;;  %v1498_v10 = vsub.s32 32, %v1497_v42  ;;  %v9733_v57 = vor.u32 %v1296_v32, %v9610_v14  ;;  %v9735_v22 = vor.u32 %v1299_v46, %v1298_v63 }
 0x252   : > { %v9737_v60 = vor.u32 %v1302_v49, %v1301_v24  ;;  %v9741_v48 = vshll.u32 %v12141_v34, %v9560_v58  ;;  %v12148_v12 = vand.u32 2147483647, %v9531_v23  ;;  %vm1589_vm14 = vcmp.lt.s32.totalorder %v9531_v23, 0 }
 0x253   : > { %v7413_v2 = vmin.u32 %v1653_v47, %v9714_v21  ;;  %v2000_v14 = vsel %vm1993_vm10, %v1996_v17, %v1999_v50  ;;  %v1643_v32 = vadd.s32 %v9650_v7, %v9647_v44  ;;  %v1856_v4 = vadd.s32 536870912, %v1855_v55 }
 0x254   : > { %vm9745_vm13 = vcmp.le.f32.partialorder %v12148_v12, 0.7853982  ;;  %v9757_v58 = vsel %vm1159_vm11, nan, %v1169_v51  ;;  %v9759_v63 = vshll.u32 %v1491_v0, 8  ;;  %v1674_v53 = vsel %vm1589_vm14, %v1673_v38, %v1649_v6 }
 0x255   : > { %v1655_v46 = vclz %v7413_v2  ;;  %v9763_v24 = vshrl.u32 %v1495_v29, 5  ;;  %v1501_v49 = vshrl.u32 %v12138_v36, %v1498_v10  ;;  %v9766_v39 = vshrl.u32 %v1856_v4, 30 }
 0x256   : > { %v1500_v56 = vshll.u32 %v12137_v52, %v1497_v42  ;;  %v1507_v44 = vshrl.u32 %v12140_v62, %v1498_v10  ;;  %v9772_v7 = vsel %vm1159_vm11, nan, %v2000_v14  ;;  %v1503_v19 = vshll.u32 %v12138_v36, %v1497_v42 }
 0x257   : > { %v7414_v51 = vadd.s32 4294967294, %v1655_v46  ;;  %v1504_v0 = vshrl.u32 %v12139_v41, %v1498_v10  ;;  %v1510_v6 = vshrl.u32 %v12141_v34, %v1498_v10  ;;  %v1676_v29 = vsel %vm9745_vm13, 0, %v1674_v53 }
 0x258   : > { %v9780_v26 = vadd.s32 %v9679_v31, %v9686_v28  ;;  %v1858_v17 = vshll.u32 %v9766_v39, 30  ;;  %v1506_v43 = vshll.u32 %v12139_v41, %v1497_v42  ;;  %v1499_v45 = vshrl.u32 %v12137_v52, %v1498_v10 }
 0x259   : > { %vm7415_vm15 = vcmp.lt.s32.totalorder %v7414_v51, 0  ;;  %v1502_v50 = vor.u32 %v1501_v49, %v1500_v56  ;;  %v1509_v47 = vshll.u32 %v12140_v62, %v1497_v42  ;;  %v1513_v14 = vshrl.u32 %v12142_v33, %v1498_v10 }
 0x25a   : > { %v1658_v38 = vsel %vm7415_vm15, 0, %v7414_v51  ;;  %v9786_v12 = vsub.s32 %v1855_v55, %v1858_v17  ;;  %v1508_v2 = vor.u32 %v1507_v44, %v1506_v43  ;;  %v1505_v31 = vor.u32 %v1504_v0, %v1503_v19 }
 0x25b   : > { %v1659_v4 = vsub.s32 32, %v1658_v38  ;;  %v1663_v46 = vsub.s32 4294967266, %v1658_v38  ;;  %v1511_v28 = vor.u32 %v1510_v6, %v1509_v47  ;;  %v1680_v53 = vadd.s32 3, %v1676_v29 }
 0x25c   : > { %v1861_v20 = vsub.s32 0, %v9786_v12  ;;  %v1512_v27 = vshll.u32 %v12141_v34, %v1497_v42  ;;  %vm1515_vm1 = vcmp.lt.s32.totalorder %v9763_v24, 1  ;;  %v1660_v49 = vshll.u32 %v9714_v21, %v1658_v38 }
 0x25d   : > { %v1661_v56 = vshrl.u32 %v1643_v32, %v1659_v4  ;;  %v1664_v51 = vadd.s32 127, %v1663_v46  ;;  %vm1518_vm3 = vcmp.lt.s32.totalorder %v9763_v24, 4  ;;  %vm1797_vm4 = vcmp.lt.s32.totalorder %v9541_v25, 0 }
 0x25e   : > { %v7421_v55 = vmin.u32 %v1861_v20, %v9786_v12  ;;  %v1514_v10 = vor.u32 %v1513_v14, %v1512_v27  ;;  %vm1516_vm6 = vcmp.lt.s32.totalorder %v9763_v24, 2  ;;  %v1520_v44 = vsel %vm1518_vm3, %v1508_v2, 2102212464 }
 0x25f   : > { %v1662_v19 = vor.u32 %v1661_v56, %v1660_v49  ;;  %v1665_v42 = vshll.u32 %v1664_v51, 23  ;;  %v1523_v0 = vsel %vm1515_vm1, %v1502_v50, %v1505_v31  ;;  %v1524_v21 = vsel %vm1518_vm3, %v1511_v28, 920167782 }
 0x260   : > { %v1863_v32 = vclz %v7421_v55  ;;  %v1881_v6 = vsub.s32 4, %v9766_v39  ;;  %vm1517_vm7 = vcmp.lt.s32.totalorder %v9763_v24, 3  ;;  %v1519_v20 = vsel %vm1515_vm1, %v1499_v45, %v1502_v50 }
 0x261   : > { %v1666_v27 = vor.u32 4788187, %v1665_v42  ;;  %v1521_v17 = vsel %vm1517_vm7, %v1505_v31, %v1520_v44  ;;  %v1525_v43 = vsel %vm1517_vm7, %v1508_v2, %v1524_v21  ;;  %v1527_v47 = vsel %vm1515_vm1, %v1505_v31, %v1508_v2 }
 0x262   : > { %v1669_v38 = vcvt.s32.f32 %v1662_v19  ;;  %v12151_v14 = vand.u32 2147483647, %v9541_v25  ;;  %v7422_v46 = vadd.s32 4294967294, %v1863_v32  ;;  %v1526_v49 = vsel %vm1516_vm6, %v1523_v0, %v1525_v43 }
 0x263   : > { %v1528_v45 = vsel %vm1518_vm3, %v1514_v10, 1326507024  ;;  %v1667_v50 = vand.u32 2147483647, %v1666_v27  ;;  %v9820_v51 = vmul.u32.u64.low %v9759_v63, %v1526_v49  ;;  %v9821_v55 = vmul.u32.u64.high %v9759_v63, %v1526_v49, %v9820_v51 }
 0x264   : > { %vm9811_vm8 = vcmp.le.f32.partialorder %v12151_v14, 0.7853982  ;;  %v1529_v56 = vsel %vm1517_vm7, %v1511_v28, %v1528_v45  ;;  %vm7423_vm9 = vcmp.lt.s32.totalorder %v7422_v46, 0  ;;  %v1522_v2 = vsel %vm1516_vm6, %v1519_v20, %v1521_v17 }
 0x265   : > { %v1530_v31 = vsel %vm1516_vm6, %v1527_v47, %v1529_v56  ;;  %v1305_v44 = vshrl.u32 %v12142_v33, %v9590_v40  ;;  %v1670_v19 = vmul.f32 %v1669_v38, %v1667_v50  ;;  %v1866_v42 = vsel %vm7423_vm9, 0, %v7422_v46 }
 0x266   : > { %v9831_v10 = vmul.u32.u64.low %v9759_v63, %v1530_v31  ;;  %v9832_v28 = vmul.u32.u64.high %v9759_v63, %v1530_v31, %v9831_v10  ;;  %v9834_v0 = vand.u32 3, %v1680_v53  ;;  %v9836_v21 = vand.u32 3, %v1676_v29 }
 0x267   : > { %v1867_v32 = vsub.s32 32, %v1866_v42  ;;  %v1871_v27 = vsub.s32 4294967266, %v1866_v42  ;;  %v1671_v43 = vxor.u32 2147483648, %v1670_v19  ;;  %v1882_v24 = vsel %vm1797_vm4, %v1881_v6, %v9766_v39 }
 0x268   : > { %v1538_v20 = vmul.u32 %v9759_v63, %v1522_v2  ;;  %v1541_v40 = vadd.s32 1, %v9821_v55  ;;  %v1868_v17 = vshll.u32 %v9786_v12, %v1866_v42  ;;  %v1306_v53 = vor.u32 %v1305_v44, %v9741_v48 }
 0x269   : > { %v1869_v47 = vshrl.u32 %v9780_v26, %v1867_v32  ;;  %v1872_v38 = vadd.s32 127, %v1871_v27  ;;  %v1672_v29 = vsel %vm1589_vm14, %v1671_v43, %v1670_v19  ;;  %vm1540_vm2 = vc.u32 %v9832_v28, %v9820_v51 }
 0x26a   : > { %vm1307_vm5 = vcmp.lt.s32.totalorder %v9600_v18, 1  ;;  %vm1310_vm10 = vcmp.lt.s32.totalorder %v9600_v18, 4  ;;  %v1675_v63 = vsel %vm9745_vm13, %v9531_v23, %v1672_v29  ;;  %v1542_v26 = vsel %vm1540_vm2, %v1541_v40, %v9821_v55 }
 0x26b   : > { %v1870_v39 = vor.u32 %v1869_v47, %v1868_v17  ;;  %v1873_v12 = vshll.u32 %v1872_v38, 23  ;;  %8612 = vcosq.f32 %v1675_v63  ;;  %v1884_v48 = vsel %vm9811_vm8, 0, %v1882_v24 }
 0x26c   : > { %v1543_v6 = vadd.s32 %v1542_v26, %v1538_v20  ;;  %vm1309_vm11 = vcmp.lt.s32.totalorder %v9600_v18, 3  ;;  %8614 = vsinq.f32 %v1675_v63  ;;  %vm1308_vm12 = vcmp.lt.s32.totalorder %v9600_v18, 2 }
 0x26d   : > { %v1874_v14 = vor.u32 4788187, %v1873_v12  ;;  %v1312_v13 = vsel %vm1310_vm10, %v9735_v22, 2102212464  ;;  %v1877_v46 = vcvt.s32.f32 %v1870_v39  ;;  %v1315_v45 = vsel %vm1307_vm5, %v9708_v9, %v9733_v57 }
 0x26e   : > { %v1544_v49 = vadd.s32 536870912, %v1543_v6  ;;  %v1316_v50 = vsel %vm1310_vm10, %v9737_v60, 920167782  ;;  %v1319_v2 = vsel %vm1307_vm5, %v9733_v57, %v9735_v22  ;;  %v1320_v31 = vsel %vm1310_vm10, %v1306_v53, 1326507024 }
 0x26f   : > { %v1875_v56 = vand.u32 2147483647, %v1874_v14  ;;  %v1317_v55 = vsel %vm1309_vm11, %v9735_v22, %v1316_v50  ;;  %v1311_v19 = vsel %vm1307_vm5, %v9614_v8, %v9708_v9  ;;  %v1321_v10 = vsel %vm1309_vm11, %v9737_v60, %v1320_v31 }
 0x270   : > { %v9879_v44 = vshrl.u32 %v1544_v49, 30  ;;  %v1318_v42 = vsel %vm1308_vm12, %v1315_v45, %v1317_v55  ;;  %vm3166_vm13 = vcmask 1041408   ;;  %v1322_v22 = vsel %vm1308_vm12, %v1319_v2, %v1321_v10  ;;  %v5917_v10 = vld [vmem:[%s12017_s1 + $0x3c0] sm:$0xff] }
 0x271   : > { %v1878_v32 = vmul.f32 %v1877_v46, %v1875_v56  ;;  %v9893_v27 = vmul.u32.u64.low %v9595_v16, %v1318_v42  ;;  %v9894_v43 = vmul.u32.u64.high %v9595_v16, %v1318_v42, %v9893_v27  ;;  %v1313_v8 = vsel %vm1309_vm11, %v9733_v57, %v1312_v13 }
 0x272   : > { %v1546_v24 = vshll.u32 %v9879_v44, 30  ;;  %v9902_v9 = vmul.u32.u64.low %v9595_v16, %v1322_v22  ;;  %v9903_v20 = vmul.u32.u64.high %v9595_v16, %v1322_v22, %v9902_v9  ;;  %vm1679_vm14 = vweird.f32 %v9531_v23 }
 0x273   : > { %v1879_v60 = vxor.u32 2147483648, %v1878_v32  ;;  %v1888_v40 = vadd.s32 3, %v1884_v48  ;;  %v9907_v17 = vmul.f32 2.0, %v9757_v58  ;;  %vm2509_vm15 = vcmp.eq.s32.totalorder %v9836_v21, 0 }
 0x274   : > { %v9910_v47 = vsub.s32 %v1543_v6, %v1546_v24  ;;  %v3899_v38 = vmul.f32 2.0, %v9772_v7  ;;  %v9914_v53 = vmul.f32 3.1415927, %v9523_v1  ;;  %vm1682_vm1 = vcmp.lt.s32.totalorder %v9834_v0, 2 }
 0x275   : > { %vm2512_vm3 = vcmp.eq.s32.totalorder %v9836_v21, 2  ;;  %v1880_v57 = vsel %vm1797_vm4, %v1879_v60, %v1878_v32  ;;  %v1314_v29 = vsel %vm1308_vm12, %v1311_v19, %v1313_v8  ;;  %v8613_v63 = vpop.eup %8612  ;;  %vm1683_vm6 = vcmp.eq.s32.totalorder %v9834_v0, 0 }
 0x276   : > { %vm1686_vm7 = vcmp.eq.s32.totalorder %v9834_v0, 2  ;;  %v1883_v1 = vsel %vm9811_vm8, %v9541_v25, %v1880_v57  ;;  %vm1485_vm9 = vcmp.lt.s32.totalorder %v9573_v15, 0  ;;  %v1549_v39 = vsub.s32 0, %v9910_v47  ;;  %v8615_v12 = vpop.eup %8614 }
 0x277   : > { %v1687_v26 = vxor.u32 2147483648, %v8613_v63  ;;  %8616 = vcosq.f32 %v1883_v1  ;;  %v9929_v6 = vand.u32 3, %v1888_v40  ;;  %v9931_v18 = vand.u32 3, %v1884_v48 }
 0x278   : > { %v1684_v14 = vxor.u32 2147483648, %v8615_v12  ;;  %8618 = vsinq.f32 %v1883_v1  ;;  %v7409_v13 = vmin.u32 %v1549_v39, %v9910_v47  ;;  %v1330_v46 = vmul.u32 %v9595_v16, %v1314_v29 }
 0x279   : > { %v1688_v49 = vsel %vm1686_vm7, %v1687_v26, %v8615_v12  ;;  %vm1332_vm4 = vc.u32 %v9903_v20, %v9893_v27  ;;  %v1333_v4 = vadd.s32 1, %v9894_v43  ;;  %v1694_v45 = vand.u32 2139095040, %v9914_v53 }
 0x27a   : > { %v1685_v50 = vsel %vm1683_vm6, %v8613_v63, %v1684_v14  ;;  %v2511_v48 = vsel %vm2509_vm15, %v8613_v63, %v1684_v14  ;;  %v2514_v56 = vsel %vm2512_vm3, %v1687_v26, %v8615_v12  ;;  %v12154_v55 = vand.u32 2147483647, %v9573_v15 }
 0x27b   : > { %v1551_v2 = vclz %v7409_v13  ;;  %v1689_v31 = vsel %vm1682_vm1, %v1685_v50, %v1688_v49  ;;  %vm2508_vm2 = vcmp.lt.s32.totalorder %v9836_v21, 2  ;;  %vm2718_vm5 = vcmp.eq.s32.totalorder %v9931_v18, 2 }
 0x27c   : > { %vm9947_vm8 = vcmp.le.f32.partialorder %v12154_v55, 0.7853982  ;;  %v1569_v19 = vsub.s32 4, %v9879_v44  ;;  %v9958_v42 = vsel %vm1679_vm14, nan, %v1689_v31  ;;  %vm8681_vm10 = vmmov 1  }
 0x27d   : > { %vm9961_vm11 = vmpackc.low %vm3166_vm13, %vm8681_vm10  ;;  %vm1891_vm12 = vcmp.eq.s32.totalorder %v9929_v6, 0  ;;  %vm2715_vm15 = vcmp.eq.s32.totalorder %v9931_v18, 0  ;;  %v7410_v0 = vadd.s32 4294967294, %v1551_v2  ;;  %v3907_v21 = vmul.f32 %v3899_v38, %v9772_v7 }
 0x27e   : > { %v2515_v32 = vsel %vm2508_vm2, %v2511_v48, %v2514_v56  ;;  %v7809_v22 = vpack.c.bf16 %v9958_v42, %v9440_v30  ;;  %vm1890_vm1 = vcmp.lt.s32.totalorder %v9929_v6, 2  ;;  %vm2714_vm3 = vcmp.lt.s32.totalorder %v9931_v18, 2 }
 0x27f   : > { %v1539_v24 = vadd.s32 %v9820_v51, %v9832_v28  ;;  %v1334_v8 = vsel %vm1332_vm4, %v1333_v4, %v9894_v43  ;;  %vm1887_vm13 = vweird.f32 %v9541_v25  ;;  %vm7411_vm6 = vcmp.lt.s32.totalorder %v7410_v0, 0 }
 0x280   : > { %v1335_v9 = vadd.s32 %v1334_v8, %v1330_v46  ;;  %v1691_v60 = vand.u32 2147483647, %v9914_v53  ;;  %v1695_v30 = vshrl.u32 %v1694_v45, 23  ;;  %7811 = vmatprep.subr.msk.bf16.mxu0 %vm9961_vm11, %v7809_v22  ;;  %v1554_v40 = vsel %vm7411_vm6, 0, %v7410_v0 }
 0x281   : > { %v1570_v51 = vsel %vm1485_vm9, %v1569_v19, %v9879_v44  ;;  %v7196_v28 = vrot.slane %v9329_v5, 4  ;;  %v7212_v43 = vrot.slane %v9325_v54, 6  ;;  %v9989_v38 = vsel %vm1679_vm14, nan, %v2515_v32  ;;  %v8617_v1 = vpop.eup %8616 }
 0x282   : > { %v1555_v57 = vsub.s32 32, %v1554_v40  ;;  %v1559_v29 = vsub.s32 4294967266, %v1554_v40  ;;  %v1336_v63 = vadd.s32 536870912, %v1335_v9  ;;  %vm1894_vm7 = vcmp.eq.s32.totalorder %v9929_v6, 2  ;;  %v8619_v5 = vpop.eup %8618 }
 0x283   : > { %v1556_v39 = vshll.u32 %v9910_v47, %v1554_v40  ;;  %v9993_v12 = vadd.f32 -1.0, %v3907_v21  ;;  %v7416_v26 = vadd.s32 4294967169, %v1695_v30  ;;  %7204 = vst [vmem:[%s9339_s9 + $0x70] ss:$-28 sps:$4 sm:$0x83] %v7196_v28   ;;  %v1895_v44 = vxor.u32 2147483648, %v8617_v1 }
 0x284   : > { %7220 = vst [vmem:[%s9339_s9 + $0x70] sm:$0x1c] %v7212_v43  ;;  %v1557_v54 = vshrl.u32 %v1539_v24, %v1555_v57  ;;  %v1560_v14 = vadd.s32 127, %v1559_v29  ;;  %v1337_v23 = vshrl.u32 %v1336_v63, 30  ;;  %v3904_v13 = vmul.f32 2.0, %v9989_v38 }
 0x285   : > { %12159 = vst [vmem:[#allocation27_spill] sm:$0xff] %v9993_v12  ;;  %v1892_v46 = vxor.u32 2147483648, %v8619_v5  ;;  %v1572_v49 = vsel %vm9947_vm8, 0, %v1570_v51  ;;  %v1698_v4 = vand.u32 8388607, %v1691_v60  ;;  %v1896_v47 = vsel %vm1894_vm7, %v1895_v44, %v8619_v5 }
 0x286   : > { %v2720_v45 = vsel %vm2718_vm5, %v1895_v44, %v8619_v5  ;;  %v1558_v50 = vor.u32 %v1557_v54, %v1556_v39  ;;  %v1561_v48 = vshll.u32 %v1560_v14, 23  ;;  %vm1277_vm14 = vcmp.lt.s32.totalorder %v9390_v61, 0 }
 0x287   : > { %v1893_v56 = vsel %vm1891_vm12, %v8617_v1, %v1892_v46  ;;  %v2717_v55 = vsel %vm2715_vm15, %v8617_v1, %v1892_v46  ;;  %v1338_v2 = vshll.u32 %v1337_v23, 30  ;;  %v1701_v31 = vadd.s32 1, %v7416_v26 }
 0x288   : > { %v1897_v19 = vsel %vm1890_vm1, %v1893_v56, %v1896_v47  ;;  %v2721_v0 = vsel %vm2714_vm3, %v2717_v55, %v2720_v45  ;;  %v1562_v21 = vor.u32 4788187, %v1561_v48  ;;  %v1576_v32 = vadd.s32 3, %v1572_v49 }
 0x289   : > { %v3912_v22 = vmul.f32 %v3904_v13, %v9989_v38  ;;  %v10016_v24 = vsel %vm1887_vm13, nan, %v1897_v19  ;;  %v10020_v8 = vsel %vm1887_vm13, nan, %v2721_v0  ;;  %v10022_v30 = vsub.s32 %v1335_v9, %v1338_v2 }
 0x28a   : > { %v7815_v6 = vpack.c.bf16 %v10016_v24, %v9565_v59  ;;  %v1563_v40 = vand.u32 2147483647, %v1562_v21  ;;  %v1565_v18 = vcvt.s32.f32 %v1558_v50  ;;  %v1699_v51 = vor.u32 8388608, %v1698_v4 }
 0x28b   : > { %v1341_v28 = vsub.s32 0, %v10022_v30  ;;  %v1361_v43 = vsub.s32 4, %v1337_v23  ;;  %vm1702_vm4 = vcmp.gt.s32.totalorder %v1701_v31, 0  ;;  %v3906_v25 = vmul.f32 2.0, %v10020_v8 }
 0x28c   : > { %7817 = vmatprep.subr.msk.bf16.mxu1 %vm9961_vm11, %v7815_v6  ;;  %v1566_v9 = vmul.f32 %v1565_v18, %v1563_v40  ;;  %v10032_v29 = vand.u32 3, %v1572_v49  ;;  %v1703_v63 = vsel %vm1702_vm4, %v1701_v31, 0  ;;  %v10034_v59 = vand.u32 3, %v1576_v32 }
 0x28d   : > { %v1331_v1 = vadd.s32 %v9893_v27, %v9903_v20  ;;  %v7401_v39 = vmin.u32 %v1341_v28, %v10022_v30  ;;  %v1705_v26 = vand.u32 31, %v1703_v63  ;;  %v10040_v5 = vmul.f32 2.0, %v9958_v42 }
 0x28e   : > { %v10042_v44 = vadd.f32 -1.0, %v3912_v22  ;;  %v1567_v54 = vxor.u32 2147483648, %v1566_v9  ;;  %v7821_v14 = vpack.c.bf16 %v9989_v38, %v9432_v11  ;;  %v10048_v46 = vsel %vm1277_vm14, %v1361_v43, %v1337_v23 }
 0x28f   : > { %v1343_v13 = vclz %v7401_v39  ;;  %v1706_v49 = vsub.s32 32, %v1705_v26  ;;  %v10050_v4 = vshll.u32 %v1699_v51, 8  ;;  %v10053_v27 = vmul.f32 %v3906_v25, %v10020_v8 }
 0x290   : > { %v1568_v20 = vsel %vm1485_vm9, %v1567_v54, %v1566_v9  ;;  %v1704_v42 = vshrl.u32 %v1703_v63, 5  ;;  %v1708_v47 = vshll.u32 %v12137_v52, %v1705_v26  ;;  %v1711_v48 = vshll.u32 %v12138_v36, %v1705_v26 }
 0x291   : > { %v1571_v45 = vsel %vm9947_vm8, %v9573_v15, %v1568_v20  ;;  %v7402_v50 = vadd.s32 4294967294, %v1343_v13  ;;  %v1709_v23 = vshrl.u32 %v12138_v36, %v1706_v49  ;;  %v1712_v56 = vshrl.u32 %v12139_v41, %v1706_v49 }
 0x292   : > { %8620 = vcosq.f32 %v1571_v45  ;;  %v1714_v55 = vshll.u32 %v12139_v41, %v1705_v26  ;;  %v1715_v2 = vshrl.u32 %v12140_v62, %v1706_v49  ;;  %v1717_v19 = vshll.u32 %v12140_v62, %v1705_v26 }
 0x293   : > { %8622 = vsinq.f32 %v1571_v45  ;;  %vm7403_vm9 = vcmp.lt.s32.totalorder %v7402_v50, 0  ;;  %v1710_v31 = vor.u32 %v1709_v23, %v1708_v47  ;;  %v1713_v16 = vor.u32 %v1712_v56, %v1711_v48 }
 0x294   : > { %v1346_v0 = vsel %vm7403_vm9, 0, %v7402_v50  ;;  %v1716_v21 = vor.u32 %v1715_v2, %v1714_v55  ;;  %v1718_v32 = vshrl.u32 %v12141_v34, %v1706_v49  ;;  %v12160_v22 = vand.u32 2147483647, %v9390_v61 }
 0x295   : > { %v1347_v6 = vsub.s32 32, %v1346_v0  ;;  %v1348_v41 = vshll.u32 %v10022_v30, %v1346_v0  ;;  %v1351_v40 = vsub.s32 4294967266, %v1346_v0  ;;  %v1707_v18 = vshrl.u32 %v12137_v52, %v1706_v49 }
 0x296   : > { %vm10070_vm8 = vcmp.le.f32.partialorder %v12160_v22, 0.7853982  ;;  %vm1582_vm2 = vcmp.eq.s32.totalorder %v10034_v59, 2  ;;  %vm2409_vm5 = vcmp.eq.s32.totalorder %v10032_v29, 2  ;;  %v1719_v62 = vor.u32 %v1718_v32, %v1717_v19 }
 0x297   : > { %v1720_v51 = vshll.u32 %v12141_v34, %v1705_v26  ;;  %v1721_v28 = vshrl.u32 %v12142_v33, %v1706_v49  ;;  %vm1723_vm10 = vcmp.lt.s32.totalorder %v1704_v42, 1  ;;  %vm1579_vm12 = vcmp.eq.s32.totalorder %v10034_v59, 0 }
 0x298   : > { %vm2406_vm15 = vcmp.eq.s32.totalorder %v10032_v29, 0  ;;  %v1349_v43 = vshrl.u32 %v1331_v1, %v1347_v6  ;;  %v1352_v25 = vadd.s32 127, %v1351_v40  ;;  %vm1725_vm1 = vcmp.lt.s32.totalorder %v1704_v42, 3 }
 0x299   : > { %vm1726_vm3 = vcmp.lt.s32.totalorder %v1704_v42, 4  ;;  %vm1578_vm13 = vcmp.lt.s32.totalorder %v10034_v59, 2  ;;  %vm2405_vm6 = vcmp.lt.s32.totalorder %v10032_v29, 2  ;;  %v1722_v52 = vor.u32 %v1721_v28, %v1720_v51 }
 0x29a   : > { %v1727_v30 = vsel %vm1723_vm10, %v1707_v18, %v1710_v31  ;;  %v1728_v9 = vsel %vm1726_vm3, %v1716_v21, 2102212464  ;;  %v1731_v34 = vsel %vm1723_vm10, %v1710_v31, %v1713_v16  ;;  %vm1575_vm7 = vweird.f32 %v9573_v15 }
 0x29b   : > { %v1350_v33 = vor.u32 %v1349_v43, %v1348_v41  ;;  %v1353_v63 = vshll.u32 %v1352_v25, 23  ;;  %v1729_v39 = vsel %vm1725_vm1, %v1713_v16, %v1728_v9  ;;  %v1732_v1 = vsel %vm1726_vm3, %v1719_v62, 920167782 }
 0x29c   : > { %vm1724_vm4 = vcmp.lt.s32.totalorder %v1704_v42, 2  ;;  %v1733_v26 = vsel %vm1725_vm1, %v1716_v21, %v1732_v1  ;;  %v1735_v54 = vsel %vm1723_vm10, %v1713_v16, %v1716_v21  ;;  %v1736_v13 = vsel %vm1726_vm3, %v1722_v52, 1326507024  ;;  %v8621_v50 = vpop.eup %8620 }
 0x29d   : > { %v1354_v49 = vor.u32 4788187, %v1353_v63  ;;  %v1357_v20 = vcvt.s32.f32 %v1350_v33  ;;  %v1734_v47 = vsel %vm1724_vm4, %v1731_v34, %v1733_v26  ;;  %v1737_v45 = vsel %vm1725_vm1, %v1719_v62, %v1736_v13  ;;  %v8623_v2 = vpop.eup %8622  ;;  %v10150_v63 = vld [vmem:[%s12017_s1 + $0x100] sm:$0xff] }
 0x29e   : > { %v1730_v23 = vsel %vm1724_vm4, %v1727_v30, %v1729_v39  ;;  %v1738_v48 = vsel %vm1724_vm4, %v1735_v54, %v1737_v45  ;;  %v10092_v56 = vmul.u32.u64.low %v10050_v4, %v1734_v47  ;;  %v10093_v55 = vmul.u32.u64.high %v10050_v4, %v1734_v47, %v10092_v56 }
 0x29f   : > { %v1583_v31 = vxor.u32 2147483648, %v8621_v50  ;;  %v1355_v19 = vand.u32 2147483647, %v1354_v49  ;;  %v10097_v0 = vmul.u32.u64.low %v10050_v4, %v1738_v48  ;;  %v10098_v16 = vmul.u32.u64.high %v10050_v4, %v1738_v48, %v10097_v0  ;;  %v12164_v49 = vld [vmem:[#allocation26_spill] sm:$0xff]  ;;  %v12167_v48 = vld [vmem:[#allocation24_spill] sm:$0xff] }
 0x2a0   : > { %vm3129_vm9 = vcmask 80896   ;;  %v3890_v21 = vmul.f32 2.0, %v10016_v24  ;;  %v10102_v42 = vadd.f32 -1.0, %v10053_v27  ;;  %v1580_v32 = vxor.u32 2147483648, %v8623_v2 }
 0x2a1   : > { %v1364_v22 = vsel %vm10070_vm8, 0, %v10048_v46  ;;  %v1584_v6 = vsel %vm1582_vm2, %v1583_v31, %v8623_v2  ;;  %v2411_v41 = vsel %vm2409_vm5, %v1583_v31, %v8623_v2  ;;  %v1358_v40 = vmul.f32 %v1357_v20, %v1355_v19 }
 0x2a2   : > { %12163 = vst [vmem:[#allocation28_spill] sm:$0xff] %v10102_v42  ;;  %v3892_v18 = vmul.f32 %v9453_v35, %v9432_v11  ;;  %v1581_v24 = vsel %vm1579_vm12, %v8621_v50, %v1580_v32  ;;  %v2408_v27 = vsel %vm2406_vm15, %v8621_v50, %v1580_v32  ;;  %v1746_v62 = vmul.u32 %v10050_v4, %v1730_v23  ;;  %v10181_v23 = vld [vmem:[%s12017_s1 + $0x108] sm:$0xff] }
 0x2a3   : > { %v1749_v46 = vadd.s32 1, %v10093_v55  ;;  %v1585_v51 = vsel %vm1578_vm13, %v1581_v24, %v1584_v6  ;;  %v2412_v28 = vsel %vm2405_vm6, %v2408_v27, %v2411_v41  ;;  %v1359_v43 = vxor.u32 2147483648, %v1358_v40 }
 0x2a4   : > { %v3896_v35 = vmul.f32 %v10040_v5, %v9989_v38  ;;  %v1586_v25 = vsel %vm1575_vm7, nan, %v1585_v51  ;;  %v2413_v52 = vsel %vm1575_vm7, nan, %v2412_v28  ;;  %vm1748_vm2 = vc.u32 %v10098_v16, %v10092_v56  ;;  %v10220_v51 = vld [vmem:[%s12017_s1 + $0x110] sm:$0xff] }
 0x2a5   : > { %v10133_v59 = vmul.f32 %v9583_v3, %v9394_v37  ;;  %v7812_v29 = vpack.c.bf16 %v1586_v25, %v9757_v58  ;;  %v3887_v4 = vmul.f32 2.0, %v1586_v25  ;;  %v3903_v30 = vmul.f32 2.0, %v2413_v52 }
 0x2a6   : > { %v1360_v5 = vsel %vm1277_vm14, %v1359_v43, %v1358_v40  ;;  %v1368_v15 = vadd.s32 3, %v1364_v22  ;;  %v1750_v34 = vsel %vm1748_vm2, %v1749_v46, %v10093_v55  ;;  %v10143_v33 = vmul.f32 %v3890_v21, %v10020_v8 }
 0x2a7   : > { %v1363_v9 = vsel %vm10070_vm8, %v9390_v61, %v1360_v5  ;;  %7814 = vmatpush1.bf16.msk.msra.mxu0 %vm9961_vm11, %v7812_v29  ;;  %v3911_v3 = vmul.f32 %v3903_v30, %v2413_v52  ;;  %v1751_v58 = vadd.s32 %v1750_v34, %v1746_v62  ;;  %v10154_v36 = vmul.f32 %v9907_v17, %v9772_v7 }
 0x2a8   : > { %8624 = vcosq.f32 %v1363_v9  ;;  %7823 = vmatprep.subr.msk.bf16.mxu0 %vm9961_vm11, %v7821_v14  ;;  %v7833_v39 = vpack.c.bf16 %v3896_v35, %v3892_v18  ;;  %v10163_v26 = vmul.f32 %v3887_v4, %v2413_v52  ;;  %v7824_v13 = vpack.c.bf16 %v2413_v52, %v9772_v7 }
 0x2a9   : > { %8626 = vsinq.f32 %v1363_v9  ;;  %v1752_v54 = vadd.s32 536870912, %v1751_v58  ;;  %v4688_v20 = vmul.f32 2.0, %v3892_v18  ;;  %v10168_v47 = vadd.f32 -1.0, %v3911_v3 }
 0x2aa   : > { %vm1693_vm14 = vcmp.lt.s32.totalorder %v9914_v53, 0  ;;  %7482 = vmatmul.mubr.msk.f32.vlgmr.msra.gmra.mrb[20].mxu0 %vm3129_vm9, %v10150_v63  ;;  %v4692_v11 = vmul.f32 2.0, %v3896_v35  ;;  %v4690_v38 = vmul.f32 2.0, %v10133_v59  ;;  %v4694_v14 = vmul.f32 2.0, %v10143_v33 }
 0x2ab   : > { %12165 = vst [vmem:[#allocation29_spill] sm:$0xff] %v10168_v47  ;;  %v1369_v45 = vand.u32 3, %v1368_v15  ;;  %v1753_v50 = vshrl.u32 %v1752_v54, 30  ;;  %7826 = vmatpush1.bf16.msk.msra.mxu0 %vm9961_vm11, %v7824_v13  ;;  %v12166_v7 = vmov 0.0   ;;  %v10184_v55 = vmul.f32 %v12167_v48, %v4688_v20 }
 0x2ac   : > { %3249 = vmatprep.mubr.f32.mxu0 %v12166_v7  ;;  %v4687_v2 = vmul.f32 2.0, %v10154_v36  ;;  %vm1367_vm8 = vweird.f32 %v9390_v61  ;;  %7835 = vmatprep.subr.msk.bf16.mxu0 %vm9961_vm11, %v7833_v39  ;;  %v10191_v31 = vmul.f32 %v10042_v44, %v4692_v11  ;;  %v10194_v19 = vmul.f32 %v12164_v49, %v4690_v38  ;;  %v10242_v39 = vld [vmem:[%s12017_s1 + $0x118] sm:$0xff] }
 0x2ad   : > { %12168 = vst [vmem:[#allocation24_spill] sm:$0xff] %v10184_v55  ;;  %v10197_v0 = vmul.f32 %v10102_v42, %v4694_v14  ;;  %v4691_v21 = vmul.f32 2.0, %v10163_v26  ;;  %v1754_v32 = vshll.u32 %v1753_v50, 30  ;;  %v2198_v6 = vand.u32 3, %v1364_v22 }
 0x2ae   : > { %12169 = vst [vmem:[#allocation30_spill] sm:$0xff] %v10191_v31  ;;  %12170 = vst [vmem:[#allocation31_spill] sm:$0xff] %v10194_v19  ;;  %v10201_v41 = vmul.f32 %v9993_v12, %v4687_v2  ;;  %v4704_v40 = vmul.f32 2.0, %v12167_v48  ;;  %7483 = vmatmul.mubr.msk.f32.gmra.mrb[22].mxu0 %vm3129_vm9, %v10181_v23  ;;  %v4708_v62 = vmul.f32 2.0, %v10042_v44  ;;  %v1777_v46 = vsub.s32 4, %v1753_v50 }
 0x2af   : > { %12171 = vst [vmem:[#allocation32_spill] sm:$0xff] %v10197_v0  ;;  %v10211_v27 = vmul.f32 %v10168_v47, %v4691_v21  ;;  %v10214_v22 = vsub.s32 %v1751_v58, %v1754_v32  ;;  %3255 = vmatprep.mubr.f32.mxu0 %v12166_v7  ;;  %v4706_v43 = vmul.f32 2.0, %v12164_v49  ;;  %vm1370_vm5 = vcmp.lt.s32.totalorder %v1369_v45, 2 }
 0x2b0   : > { %12172 = vst [vmem:[#allocation33_spill] sm:$0xff] %v10201_v41  ;;  %v4712_v28 = vmul.f32 %v12167_v48, %v4704_v40  ;;  %v4716_v25 = vmul.f32 %v10042_v44, %v4708_v62  ;;  %v4710_v52 = vmul.f32 2.0, %v10102_v42  ;;  %vm1371_vm10 = vcmp.eq.s32.totalorder %v1369_v45, 0 }
 0x2b1   : > { %12173 = vst [vmem:[#allocation34_spill] sm:$0xff] %v10211_v27  ;;  %vm1374_vm12 = vcmp.eq.s32.totalorder %v1369_v45, 2  ;;  %v1757_v4 = vsub.s32 0, %v10214_v22  ;;  %vm2203_vm15 = vcmp.eq.s32.totalorder %v2198_v6, 2  ;;  %vm2200_vm1 = vcmp.eq.s32.totalorder %v2198_v6, 0  ;;  %v10273_v45 = vld [vmem:[%s12017_s1 + $0x120] sm:$0xff] }
 0x2b2   : > { %v8625_v29 = vpop.eup %8624  ;;  %7484 = vmatmul.mubr.msk.f32.gmra.mrb[24].mxu0 %vm3129_vm9, %v10220_v51  ;;  %v10231_v9 = vadd.f32 -1.0, %v4712_v28  ;;  %v10233_v15 = vadd.f32 -1.0, %v4716_v25  ;;  %v1778_v58 = vsel %vm1693_vm14, %v1777_v46, %v1753_v50  ;;  %v4714_v54 = vmul.f32 %v12164_v49, %v4706_v43 }
 0x2b3   : > { %v8627_v30 = vpop.eup %8626  ;;  %v1375_v5 = vxor.u32 2147483648, %v8625_v29  ;;  %v7417_v3 = vmin.u32 %v1757_v4, %v10214_v22  ;;  %3261 = vmatprep.mubr.f32.mxu0 %v12166_v7  ;;  %vm2199_vm3 = vcmp.lt.s32.totalorder %v2198_v6, 2  ;;  %v4718_v11 = vmul.f32 %v10102_v42, %v4710_v52 }
 0x2b4   : > { %12174 = vst [vmem:[#allocation35_spill] sm:$0xff] %v10231_v9  ;;  %12175 = vst [vmem:[#allocation36_spill] sm:$0xff] %v10233_v15  ;;  %v1372_v34 = vxor.u32 2147483648, %v8627_v30  ;;  %vm10249_vm13 = vcmp.le.f32.partialorder %v1691_v60, 0.7853982  ;;  %v1747_v50 = vadd.s32 %v10092_v56, %v10098_v16  ;;  %v10275_v6 = vadd.f32 -1.0, %v4714_v54 }
 0x2b5   : > { %v1376_v13 = vsel %vm1374_vm12, %v1375_v5, %v8627_v30  ;;  %v2205_v20 = vsel %vm2203_vm15, %v1375_v5, %v8627_v30  ;;  %v1759_v2 = vclz %v7417_v3  ;;  %v10258_v32 = vsel %vm10249_vm13, 0, %v1778_v58 }
 0x2b6   : > { %v1373_v38 = vsel %vm1371_vm10, %v8625_v29, %v1372_v34  ;;  %v2202_v40 = vsel %vm2200_vm1, %v8625_v29, %v1372_v34  ;;  %7485 = vmatmul.mubr.msk.f32.gmra.mrb[26].mxu0 %vm3129_vm9, %v10242_v39  ;;  %12178 = vst [vmem:[#allocation37_spill] sm:$0xff] %v10275_v6  ;;  %v10282_v43 = vadd.f32 -1.0, %v4718_v11  ;;  %v4703_v25 = vmul.f32 2.0, %v9993_v12 }
 0x2b7   : > { %v1377_v21 = vsel %vm1370_vm5, %v1373_v38, %v1376_v13  ;;  %v7418_v56 = vadd.s32 4294967294, %v1759_v2  ;;  %v2206_v16 = vsel %vm2199_vm3, %v2202_v40, %v2205_v20  ;;  %3267 = vmatprep.mubr.f32.mxu0 %v12166_v7  ;;  %v4707_v29 = vmul.f32 2.0, %v10168_v47  ;;  %v10302_v20 = vld [vmem:[%s12017_s1 + $0x128] sm:$0xff] }
 0x2b8   : > { %v10267_v62 = vsel %vm1367_vm8, nan, %v1377_v21  ;;  %v10279_v46 = vsel %vm1367_vm8, nan, %v2206_v16  ;;  %12179 = vst [vmem:[#allocation38_spill] sm:$0xff] %v10282_v43  ;;  %v5492_v4 = vmul.f32 2.0, %v10184_v55  ;;  %v4711_v34 = vmul.f32 %v9993_v12, %v4703_v25 }
 0x2b9   : > { %v3885_v28 = vmul.f32 2.0, %v10267_v62  ;;  %vm7419_vm6 = vcmp.lt.s32.totalorder %v7418_v56, 0  ;;  %v3901_v52 = vmul.f32 2.0, %v10279_v46  ;;  %v4715_v38 = vmul.f32 %v10168_v47, %v4707_v29 }
 0x2ba   : > { %v1762_v30 = vsel %vm7419_vm6, 0, %v7418_v56  ;;  %7486 = vmatmul.mubr.msk.f32.gmra.mrb[28].mxu0 %vm3129_vm9, %v10273_v45  ;;  %v10306_v2 = vadd.f32 -1.0, %v4711_v34  ;;  %v5496_v21 = vmul.f32 2.0, %v10191_v31  ;;  %v10312_v16 = vmul.f32 %v10231_v9, %v5492_v4  ;;  %v10327_v4 = vld [vmem:[%s12017_s1 + $0x130] sm:$0xff] }
 0x2bb   : > { %v10291_v61 = vmul.f32 %v3885_v28, %v10279_v46  ;;  %v1763_v3 = vsub.s32 32, %v1762_v30  ;;  %v1764_v58 = vshll.u32 %v10214_v22, %v1762_v30  ;;  %v1767_v54 = vsub.s32 4294967266, %v1762_v30  ;;  %3273 = vmatprep.mubr.f32.mxu0 %v12166_v7 }
 0x2bc   : > { %v3909_v13 = vmul.f32 %v3901_v52, %v10279_v46  ;;  %12181 = vst [vmem:[#allocation40_spill] sm:$0xff] %v10306_v2  ;;  %12182 = vst [vmem:[#allocation41_spill] sm:$0xff] %v10312_v16  ;;  %v10316_v28 = vadd.f32 -1.0, %v4715_v38  ;;  %v10319_v25 = vmul.f32 %v10233_v15, %v5496_v21  ;;  %v5494_v52 = vmul.f32 2.0, %v10194_v19 }
 0x2bd   : > { %12180 = vst [vmem:[#allocation39_spill] sm:$0xff] %v10291_v61  ;;  %v4689_v11 = vmul.f32 2.0, %v10291_v61  ;;  %v1765_v40 = vshrl.u32 %v1747_v50, %v1763_v3  ;;  %v1768_v22 = vadd.s32 127, %v1767_v54  ;;  %v5498_v29 = vmul.f32 2.0, %v10197_v0  ;;  %v10485_v0 = vld [vmem:[%s12017_s1 + $0x158] sm:$0xff] }
 0x2be   : > { %v10309_v56 = vadd.f32 -1.0, %v3909_v13  ;;  %7487 = vmatmul.mubr.msk.f32.gmra.mrb[30].mxu0 %vm3129_vm9, %v10302_v20  ;;  %12183 = vst [vmem:[#allocation42_spill] sm:$0xff] %v10316_v28  ;;  %12184 = vst [vmem:[#allocation43_spill] sm:$0xff] %v10319_v25  ;;  %v5495_v13 = vmul.f32 2.0, %v10211_v27  ;;  %v5508_v54 = vmul.f32 2.0, %v10231_v9  ;;  %v5512_v5 = vmul.f32 2.0, %v10233_v15 }
 0x2bf   : > { %v1766_v30 = vor.u32 %v1765_v40, %v1764_v58  ;;  %v1769_v50 = vshll.u32 %v1768_v22, 23  ;;  %3279 = vmatprep.mubr.f32.mxu0 %v12166_v7  ;;  %v10338_v58 = vmul.f32 %v10275_v6, %v5494_v52  ;;  %v10341_v38 = vmul.f32 %v10282_v43, %v5498_v29 }
 0x2c0   : > { %v10330_v34 = vmul.f32 %v10309_v56, %v4689_v11  ;;  %v4705_v3 = vmul.f32 2.0, %v10309_v56  ;;  %v5491_v11 = vmul.f32 2.0, %v10201_v41  ;;  %v10365_v24 = vmul.f32 %v10316_v28, %v5495_v13 }
 0x2c1   : > { %12185 = vst [vmem:[#allocation44_spill] sm:$0xff] %v10338_v58  ;;  %12186 = vst [vmem:[#allocation45_spill] sm:$0xff] %v10341_v38  ;;  %v1770_v21 = vor.u32 4788187, %v1769_v50  ;;  %v1773_v40 = vcvt.s32.f32 %v1766_v30  ;;  %v10356_v30 = vld [vmem:[%s12017_s1 + $0x138] sm:$0xff]  ;;  %v5516_v60 = vmul.f32 %v10231_v9, %v5508_v54  ;;  %v5514_v35 = vmul.f32 2.0, %v10282_v43 }
 0x2c2   : > { %v4713_v22 = vmul.f32 %v10309_v56, %v4705_v3  ;;  %7488 = vmatmul.mubr.msk.f32.gmra.mrb[32].mxu0 %vm3129_vm9, %v10327_v4  ;;  %v5493_v52 = vmul.f32 2.0, %v10330_v34  ;;  %v10361_v3 = vmul.f32 %v10306_v2, %v5491_v11  ;;  %12188 = vst [vmem:[#allocation47_spill] sm:$0xff] %v10365_v24  ;;  %v5507_v11 = vmul.f32 2.0, %v10306_v2 }
 0x2c3   : > { %v1771_v29 = vand.u32 2147483647, %v1770_v21  ;;  %3285 = vmatprep.mubr.f32.mxu0 %v12166_v7  ;;  %v5510_v21 = vmul.f32 2.0, %v10275_v6  ;;  %v10379_v1 = vadd.f32 -1.0, %v5516_v60  ;;  %v5522_v57 = vmul.f32 %v10282_v43, %v5514_v35  ;;  %v12194_v35 = vld [vmem:[#allocation18_spill] sm:$0xff] }
 0x2c4   : > { %v10358_v50 = vadd.f32 -1.0, %v4713_v22  ;;  %12187 = vst [vmem:[#allocation46_spill] sm:$0xff] %v10361_v3  ;;  %v5520_v22 = vmul.f32 %v10233_v15, %v5512_v5  ;;  %v10387_v5 = vld [vmem:[%s12017_s1 + $0x140] sm:$0xff]  ;;  %v5515_v13 = vmul.f32 %v10306_v2, %v5507_v11  ;;  %v1784_v60 = vadd.s32 3, %v10258_v32 }
 0x2c5   : > { %v1774_v17 = vmul.f32 %v1773_v40, %v1771_v29  ;;  %12189 = vst [vmem:[#allocation48_spill] sm:$0xff] %v10379_v1  ;;  %v5518_v54 = vmul.f32 %v10275_v6, %v5510_v21  ;;  %12190 = vst [vmem:[#allocation49_spill] sm:$0xff] %v10387_v5  ;;  %v5511_v29 = vmul.f32 2.0, %v10316_v28  ;;  %v10396_v21 = vadd.f32 -1.0, %v5522_v57 }
 0x2c6   : > { %v10371_v18 = vmul.f32 %v10358_v50, %v5493_v52  ;;  %7489 = vmatmul.mubr.msk.f32.gmra.mrb[34].mxu0 %vm3129_vm9, %v10356_v30  ;;  %v10389_v52 = vadd.f32 -1.0, %v5520_v22  ;;  %v10399_v38 = vsub.f32 1.0, %v12194_v35  ;;  %v10406_v6 = vadd.f32 -1.0, %v5515_v13  ;;  %v10422_v13 = vld [vmem:[%s12017_s1 + $0x148] sm:$0xff] }
 0x2c7   : > { %v1775_v40 = vxor.u32 2147483648, %v1774_v17  ;;  %3291 = vmatprep.mubr.f32.mxu0 %v12166_v7  ;;  %v10394_v58 = vadd.f32 -1.0, %v5518_v54  ;;  %12193 = vst [vmem:[#allocation52_spill] sm:$0xff] %v10396_v21  ;;  %v5519_v24 = vmul.f32 %v10316_v28, %v5511_v29  ;;  %v10412_v57 = vand.u32 3, %v10258_v32  ;;  %12196 = vst [vmem:[#allocation53_spill] sm:$0xff] %v10422_v13 }
 0x2c8   : > { %12191 = vst [vmem:[#allocation50_spill] sm:$0xff] %v10389_v52  ;;  %12195 = vst [vmem:[#allocation18_spill] sm:$0xff] %v10406_v6  ;;  %v877_v14 = vlaneseq  ;;  %v874_v29 = vmul.f32 0.04, %v10399_v38  ;;  %v8682_v21 = vmov 1966171168   ;;  %vm1783_vm5 = vweird.f32 %v9914_v53 }
 0x2c9   : > { %12192 = vst [vmem:[#allocation51_spill] sm:$0xff] %v10394_v58  ;;  %v1776_v3 = vsel %vm1693_vm14, %v1775_v40, %v1774_v17  ;;  %v10424_v54 = vadd.f32 -1.0, %v5519_v24  ;;  %v10427_v40 = vand.u32 3, %v1784_v60  ;;  %v7105_v1 = vunpack.c.l.s4 %v8682_v21  ;;  %v12202_v52 = vld [vmem:[#allocation19_spill] sm:$0xff]  ;;  %v12204_v21 = vld [vmem:[#allocation16_spill] sm:$0xff] }
 0x2ca   : > { %v1779_v11 = vsel %vm10249_vm13, %v9914_v53, %v1776_v3  ;;  %7490 = vmatmul.mubr.msk.f32.gmra.mrb[36].mxu0 %vm3129_vm9, %v10387_v5  ;;  %v12198_v3 = vld [vmem:[#allocation25_spill] sm:$0xff]  ;;  %v10432_v22 = vshrl.u32 %v877_v14, 7  ;;  %v10441_v43 = vsub.f32 1.0, %v12202_v52  ;;  %vm2615_vm7 = vcmp.eq.s32.totalorder %v10412_v57, 2  ;;  %12207 = vst [vmem:[#allocation19_spill] sm:$0xff] %v10485_v0 }
 0x2cb   : > { %8628 = vcosq.f32 %v1779_v11  ;;  %3297 = vmatprep.mubr.f32.mxu0 %v12166_v7  ;;  %12197 = vst [vmem:[#allocation54_spill] sm:$0xff] %v10424_v54  ;;  %v918_v32 = vsub.f32 1.0, %v12198_v3  ;;  %v12200_v3 = vld [vmem:[#allocation4_spill] sm:$0xff]  ;;  %vm1787_vm4 = vcmp.eq.s32.totalorder %v10427_v40, 0  ;;  %vm2612_vm2 = vcmp.eq.s32.totalorder %v10412_v57, 0 }
 0x2cc   : > { %8630 = vsinq.f32 %v1779_v11  ;;  %12199 = vst [vmem:[#allocation55_spill] sm:$0xff] %v10432_v22  ;;  %v12201_v11 = vld [vmem:[#allocation5_spill] sm:$0xff]  ;;  %v10451_v17 = vsub.s32 1, %v10432_v22  ;;  %v7106_v54 = vunpack.c.0.s8 %v7105_v1  ;;  %v876_v25 = vmul.f32 0.04, %v10441_v43 }
 0x2cd   : > { %v922_v58 = vmax.f32 %v918_v32, 0.0  ;;  %v298_v60 = vmul.f32 %v12201_v11, %v12200_v3  ;;  %v10448_v32 = vld [vmem:[%s12017_s1 + $0x150] sm:$0xff]  ;;  %v7102_v3 = vcombine.low %v12204_v21, %v12194_v35  ;;  %v12205_v11 = vld [vmem:[#allocation17_spill] sm:$0xff]  ;;  %vm1786_vm14 = vcmp.lt.s32.totalorder %v10427_v40, 2 }
 0x2ce   : > { %7491 = vmatmul.mubr.msk.f32.gmra.mrb[38].mxu0 %vm3129_vm9, %v10422_v13  ;;  %12203 = vst [vmem:[#allocation4_spill] sm:$0xff] %v10448_v32  ;;  %v7103_v6 = vcombine.low %v12205_v11, %v12202_v52  ;;  %vm2611_vm8 = vcmp.lt.s32.totalorder %v10412_v57, 2  ;;  %v904_v2 = vrot.slane %v874_v29, %v10451_v17  ;;  %v10470_v19 = vsub.s32 0, %v10432_v22 }
 0x2cf   : > { %3303 = vmatprep.mubr.f32.mxu0 %v12166_v7  ;;  %v10453_v24 = vmin.f32 %v922_v58, 1.0  ;;  %v302_v16 = vmax.f32 %v298_v60, 0.0  ;;  %v884_v58 = vrot.slane %v12194_v35, %v10451_v17  ;;  %vm1790_vm10 = vcmp.eq.s32.totalorder %v10427_v40, 2 }
 0x2d0   : > { %v7109_v1 = vsub.s32 %v7106_v54, %v10432_v22  ;;  %v892_v29 = vrot.slane %v12202_v52, %v10451_v17  ;;  %v5509_v9 = vmul.f32 2.0, %v10358_v50  ;;  %vm10489_vm12 = vcmp.lt.s32.totalorder %v877_v14, 512  ;;  %v12211_v14 = vld [vmem:[#allocation7_spill] sm:$0xff] }
 0x2d1   : > { %v930_v28 = vmul.f32 %v10453_v24, %v10453_v24  ;;  %v10477_v60 = vmin.f32 %v302_v16, 1.0  ;;  %v894_v15 = vmul.f32 %v12194_v35, %v884_v58  ;;  %v912_v16 = vrot.slane %v876_v25, %v10451_v17  ;;  %v12210_v58 = vld [vmem:[#allocation6_spill] sm:$0xff] }
 0x2d2   : > { %7492 = vmatmul.mubr.msk.f32.gmra.mrb[40].mxu0 %vm3129_vm9, %v10448_v32  ;;  %v7110_v54 = vrot.slane %v7102_v3, %v7109_v1  ;;  %v7117_v22 = vrot.slane %v7103_v6, %v7109_v1  ;;  %v896_v27 = vmul.f32 %v12202_v52, %v892_v29  ;;  %v948_v31 = vrot.slane %v10399_v38, %v10470_v19 }
 0x2d3   : > { %12206 = vst [vmem:[#allocation5_spill] sm:$0xff] %v10477_v60  ;;  %3309 = vmatprep.mubr.f32.mxu0 %v12166_v7  ;;  %v920_v49 = vsub.f32 1.0, %v10477_v60  ;;  %v10496_v61 = vadd.f32 %v904_v2, %v894_v15  ;;  %v934_v55 = vmul.f32 %v930_v28, %v930_v28  ;;  %v295_v47 = vmul.f32 %v12211_v14, %v12210_v58  ;;  %v10510_v15 = vld [vmem:[%s12017_s1 + $0x160] sm:$0xff]  ;;  %v12212_v58 = vld [vmem:[#allocation10_spill] sm:$0xff] }
 0x2d4   : > { %v7118_v6 = vcombine.low %v7110_v54, %v7117_v22  ;;  %v7134_v25 = vcombine.high %v7110_v54, %v7117_v22  ;;  %v10504_v3 = vadd.f32 %v912_v16, %v896_v27  ;;  %v12213_v14 = vld [vmem:[#allocation14_spill] sm:$0xff]  ;;  %v12214_v57 = vpack.c.bf16 %v10163_v26, %v10154_v36 }
 0x2d5   : > { %v8629_v42 = vpop.eup %8628  ;;  %v7183_v2 = vrot.slane %v10496_v61, 6  ;;  %v924_v28 = vmax.f32 %v920_v49, 0.0  ;;  %v297_v60 = vmul.f32 %v12213_v14, %v12212_v58  ;;  %v958_v49 = vmax.f32 %v948_v31, %v10496_v61 }
 0x2d6   : > { %v8631_v12 = vpop.eup %8630  ;;  %v1791_v32 = vxor.u32 2147483648, %v8629_v42  ;;  %7493 = vmatmul.mubr.msk.f32.gmra.mrb[42].mxu0 %vm3129_vm9, %v10485_v0  ;;  %v7125_v16 = vrot.slane %v7118_v6, %v7109_v1  ;;  %v7141_v54 = vrot.slane %v7134_v25, %v7109_v1  ;;  %v956_v36 = vrot.slane %v10441_v43, %v10470_v19 }
 0x2d7   : > { %v1788_v29 = vxor.u32 2147483648, %v8631_v12  ;;  %3625 = vmatprep.mubr.f32.mxu0 %v12166_v7  ;;  %7191 = vst [vmem:[%s9339_s9 + $0x48] sm:$0x70] %v7183_v2  ;;  %v928_v5 = vmin.f32 %v924_v28, 1.0  ;;  %v938_v26 = vmul.f32 %v934_v55, %v10453_v24  ;;  %v299_v1 = vmax.f32 %v295_v47, 0.0 }
 0x2d8   : > { %v1792_v27 = vsel %vm1790_vm10, %v1791_v32, %v8631_v12  ;;  %v2617_v22 = vsel %vm2615_vm7, %v1791_v32, %v8631_v12  ;;  %v7845_v12 = vpack.c.bf16 %v10042_v44, %v12167_v48  ;;  %7752 = vst.msk [vmem:[%s9339_s9 + $0x24] ss:$8 sm:$0xf] %vm10489_vm12, %v7125_v16  ;;  %7753 = vst.msk [vmem:[%s9339_s9 + $0x25] ss:$8 sm:$0xf] %vm10489_vm12, %v7141_v54 }
 0x2d9   : > { %v1789_v0 = vsel %vm1787_vm4, %v8629_v42, %v1788_v29  ;;  %v2614_v13 = vsel %vm2612_vm2, %v8629_v42, %v1788_v29  ;;  %v7185_v42 = vrot.slane %v10504_v3, 6  ;;  %v10553_v44 = vld [vmem:[%s12017_s1 + $0x168] sm:$0xff]  ;;  %v10556_v48 = vmul.f32 %v10358_v50, %v5509_v9 }
 0x2da   : > { %v1793_v58 = vsel %vm1786_vm14, %v1789_v0, %v1792_v27  ;;  %v2618_v14 = vsel %vm2611_vm8, %v2614_v13, %v2617_v22  ;;  %7510 = vmatmul.mubr.msk.f32.vlgmr.msra.gmra.mrb[20].mxu0 %vm3129_vm9, %v10510_v15  ;;  %v932_v41 = vmul.f32 %v928_v5, %v928_v5  ;;  %v962_v32 = vsub.f32 %v958_v49, %v10496_v61 }
 0x2db   : > { %v1794_v31 = vsel %vm1783_vm5, nan, %v1793_v58  ;;  %v2619_v0 = vsel %vm1783_vm5, nan, %v2618_v14  ;;  %7838 = vmatpush1.bf16.msk.msra.mxu0 %vm9961_vm11, %v12214_v57  ;;  %3631 = vmatprep.mubr.f32.mxu0 %v12166_v7  ;;  %7193 = vst [vmem:[%s9339_s9 + $0x58] sm:$0x70] %v7185_v42  ;;  %v301_v6 = vmax.f32 %v297_v60, 0.0  ;;  %v10573_v25 = vsub.f32 1.0, %v12204_v21 }
 0x2dc   : > { %v7818_v53 = vpack.c.bf16 %v1794_v31, %v10267_v62  ;;  %v3889_v13 = vmul.f32 2.0, %v1794_v31  ;;  %v3905_v40 = vmul.f32 2.0, %v2619_v0  ;;  %7847 = vmatprep.subr.msk.bf16.mxu0 %vm9961_vm11, %v7845_v12  ;;  %v880_v29 = vrot.slane %v12204_v21, %v10451_v17 }
 0x2dd   : > { %v12215_v55 = vpack.c.bf16 %v10020_v8, %v9394_v37  ;;  %v936_v47 = vmul.f32 %v932_v41, %v932_v41  ;;  %v960_v24 = vmax.f32 %v956_v36, %v10504_v3  ;;  %v10584_v60 = vmin.f32 %v299_v1, 1.0  ;;  %v10594_v37 = vld [vmem:[%s12017_s1 + $0x170] sm:$0xff] }
 0x2de   : > { %7820 = vmatpush1.bf16.msk.msra.mxu1 %vm9961_vm11, %v7818_v53  ;;  %v3913_v9 = vmul.f32 %v3905_v40, %v2619_v0  ;;  %v10568_v62 = vmul.f32 %v3889_v13, %v2619_v0  ;;  %7511 = vmatmul.mubr.msk.f32.gmra.mrb[22].mxu0 %vm3129_vm9, %v10553_v44  ;;  %v10586_v2 = vmin.f32 %v301_v6, 1.0  ;;  %v7830_v27 = vpack.c.bf16 %v2619_v0, %v10279_v46  ;;  %v10625_v53 = vld [vmem:[%s12017_s1 + $0x178] sm:$0xff] }
 0x2df   : > { %7829 = vmatprep.subr.msk.bf16.mxu1 %vm9961_vm11, %v12215_v55  ;;  %3637 = vmatprep.mubr.f32.mxu0 %v12166_v7  ;;  %v873_v22 = vmul.f32 0.04, %v10573_v25  ;;  %v966_v16 = vmul.f32 %v962_v32, %v938_v26  ;;  %v917_v54 = vsub.f32 1.0, %v10584_v60  ;;  %v893_v58 = vmul.f32 %v12204_v21, %v880_v29 }
 0x2e0   : > { %v10588_v28 = vadd.f32 -1.0, %v3913_v9  ;;  %v4693_v8 = vmul.f32 2.0, %v10568_v62  ;;  %v919_v49 = vsub.f32 1.0, %v10586_v2  ;;  %v12216_v42 = vpack.c.bf16 %v10143_v33, %v10133_v59 }
 0x2e1   : > { %7496 = vmatmul.mubr.msk.f32.vlgmr.msra.gmra.mrb[20].mxu1 %vm3129_vm9, %v10150_v63  ;;  %v900_v12 = vrot.slane %v873_v22, %v10451_v17  ;;  %v940_v31 = vmul.f32 %v936_v47, %v928_v5  ;;  %v964_v0 = vsub.f32 %v960_v24, %v10504_v3  ;;  %v921_v57 = vmax.f32 %v917_v54, 0.0 }
 0x2e2   : > { %7832 = vmatpush1.bf16.msk.msra.mxu1 %vm9961_vm11, %v7830_v27  ;;  %3386 = vmatprep.mubr.f32.mxu1 %v12166_v7  ;;  %v7854_v46 = vpack.c.bf16 %v10588_v28, %v10309_v56  ;;  %v10609_v14 = vmul.f32 %v10588_v28, %v4693_v8  ;;  %v4709_v63 = vmul.f32 2.0, %v10588_v28  ;;  %v923_v41 = vmax.f32 %v919_v49, 0.0  ;;  %v10650_v27 = vld [vmem:[%s12017_s1 + $0x180] sm:$0xff]  ;;  %v11021_v56 = vld [vmem:[%s12017_s1 + $0x238] sm:$0xff] }
 0x2e3   : > { %7841 = vmatprep.subr.msk.bf16.mxu1 %vm9961_vm11, %v12216_v42  ;;  %7512 = vmatmul.mubr.msk.f32.gmra.mrb[24].mxu0 %vm3129_vm9, %v10594_v37  ;;  %v913_v13 = vadd.f32 %v900_v12, %v893_v58  ;;  %v944_v5 = vrot.slane %v10573_v25, %v10470_v19  ;;  %v925_v40 = vmin.f32 %v921_v57, 1.0  ;;  %v10635_v26 = vsub.f32 1.0, %v12205_v11 }
 0x2e4   : > { %3643 = vmatprep.mubr.f32.mxu0 %v12166_v7  ;;  %v7866_v59 = vpack.c.bf16 %v10609_v14, %v10330_v34  ;;  %v4717_v33 = vmul.f32 %v10588_v28, %v4709_v63  ;;  %v927_v36 = vmin.f32 %v923_v41, 1.0  ;;  %v888_v32 = vrot.slane %v12205_v11, %v10451_v17  ;;  %v11032_v28 = vld [vmem:[%s12017_s1 + $0x240] sm:$0xff]  ;;  %v11173_v34 = vld [vmem:[%s12017_s1 + $0x298] sm:$0xff] }
 0x2e5   : > { %7497 = vmatmul.mubr.msk.f32.gmra.mrb[22].mxu1 %vm3129_vm9, %v10181_v23  ;;  %v5497_v6 = vmul.f32 2.0, %v10609_v14  ;;  %v957_v9 = vmax.f32 %v944_v5, %v913_v13  ;;  %v7182_v29 = vrot.slane %v913_v13, 6  ;;  %v968_v23 = vmul.f32 %v964_v0, %v940_v31  ;;  %v11184_v14 = vld [vmem:[%s12017_s1 + $0x2a0] sm:$0xff] }
 0x2e6   : > { %3392 = vmatprep.mubr.f32.mxu1 %v12166_v7  ;;  %v10640_v1 = vadd.f32 -1.0, %v4717_v33  ;;  %v929_v55 = vmul.f32 %v925_v40, %v925_v40  ;;  %v931_v47 = vmul.f32 %v927_v36, %v927_v36  ;;  %v875_v24 = vmul.f32 0.04, %v10635_v26 }
 0x2e7   : > { %7513 = vmatmul.mubr.msk.f32.gmra.mrb[26].mxu0 %vm3129_vm9, %v10625_v53  ;;  %7190 = vst [vmem:[%s9339_s9 + $0x40] sm:$0x70] %v7182_v29  ;;  %v895_v49 = vmul.f32 %v12205_v11, %v888_v32  ;;  %v961_v12 = vsub.f32 %v957_v9, %v913_v13  ;;  %v10668_v57 = vadd.f32 -1.0, %v10556_v48  ;;  %v10671_v41 = vadd.f32 %v966_v16, %v10496_v61  ;;  %v10683_v48 = vld [vmem:[%s12017_s1 + $0x188] sm:$0xff] }
 0x2e8   : > { %3649 = vmatprep.mubr.f32.mxu0 %v12166_v7  ;;  %v7878_v8 = vpack.c.bf16 %v10640_v1, %v10358_v50  ;;  %v10655_v22 = vmul.f32 %v10640_v1, %v5497_v6  ;;  %v5513_v54 = vmul.f32 2.0, %v10640_v1  ;;  %v933_v58 = vmul.f32 %v929_v55, %v929_v55  ;;  %v11325_v50 = vld [vmem:[%s12017_s1 + $0x2f8] sm:$0xff] }
 0x2e9   : > { %7498 = vmatmul.mubr.msk.f32.gmra.mrb[24].mxu1 %vm3129_vm9, %v10220_v51  ;;  %v935_v63 = vmul.f32 %v931_v47, %v931_v47  ;;  %v908_v42 = vrot.slane %v875_v24, %v10451_v17  ;;  %v980_v33 = vrot.slane %v10573_v25, %v10451_v17  ;;  %v952_v32 = vrot.slane %v10635_v26, %v10470_v19 }
 0x2ea   : > { %3398 = vmatprep.mubr.f32.mxu1 %v12166_v7  ;;  %v7890_v31 = vpack.c.bf16 %v10655_v22, %v10371_v18  ;;  %v5521_v0 = vmul.f32 %v10640_v1, %v5513_v54  ;;  %v937_v51 = vmul.f32 %v933_v58, %v925_v40  ;;  %v974_v16 = vsub.f32 1.0, %v10671_v41  ;;  %v11336_v1 = vld [vmem:[%s12017_s1 + $0x300] sm:$0xff]  ;;  %v11472_v18 = vld [vmem:[%s12017_s1 + $0x358] sm:$0xff] }
 0x2eb   : > { %7514 = vmatmul.mubr.msk.f32.gmra.mrb[28].mxu0 %vm3129_vm9, %v10650_v27  ;;  %v915_v5 = vadd.f32 %v908_v42, %v895_v49  ;;  %v984_v40 = vrot.slane %v10399_v38, %v10451_v17  ;;  %v10691_v6 = vadd.f32 %v968_v23, %v10504_v3  ;;  %v939_v29 = vmul.f32 %v935_v63, %v927_v36  ;;  %v10712_v63 = vld [vmem:[%s12017_s1 + $0x190] sm:$0xff]  ;;  %v11483_v22 = vld [vmem:[%s12017_s1 + $0x360] sm:$0xff] }
 0x2ec   : > { %3655 = vmatprep.mubr.f32.mxu0 %v12166_v7  ;;  %v10685_v61 = vadd.f32 -1.0, %v5521_v0  ;;  %v965_v9 = vmul.f32 %v961_v12, %v937_v51  ;;  %v992_v58 = vrot.slane %v10441_v43, %v10451_v17  ;;  %v6591_v36 = vmul.f32 16.0, %v10573_v25 }
 0x2ed   : > { %7499 = vmatmul.mubr.msk.f32.gmra.mrb[26].mxu1 %vm3129_vm9, %v10242_v39  ;;  %v959_v55 = vmax.f32 %v952_v32, %v915_v5  ;;  %v7184_v47 = vrot.slane %v915_v5, 6  ;;  %v994_v54 = vmul.f32 %v984_v40, %v974_v16  ;;  %v976_v49 = vsub.f32 1.0, %v10691_v6 }
 0x2ee   : > { %3404 = vmatprep.mubr.f32.mxu1 %v12166_v7  ;;  %v7902_v24 = vpack.c.bf16 %v10685_v61, %v10668_v57  ;;  %v10703_v3 = vadd.f32 %v965_v9, %v913_v13  ;;  %v6593_v23 = vmul.f32 16.0, %v10635_v26  ;;  %v6592_v13 = vmul.f32 16.0, %v10399_v38  ;;  %v5918_v57 = vld [vmem:[%s12017_s1 + $0x3c8] sm:$0xff]  ;;  %v5919_v61 = vld [vmem:[%s12017_s1 + $0x3d0] sm:$0xff] }
 0x2ef   : > { %7515 = vmatmul.mubr.msk.f32.gmra.mrb[30].mxu0 %vm3129_vm9, %v10683_v48  ;;  %v963_v39 = vsub.f32 %v959_v55, %v915_v5  ;;  %7192 = vst [vmem:[%s9339_s9 + $0x50] sm:$0x70] %v7184_v47  ;;  %v10715_v12 = vmul.f32 %v12194_v35, %v994_v54  ;;  %v996_v42 = vmul.f32 %v992_v58, %v976_v49  ;;  %v6594_v0 = vmul.f32 16.0, %v10441_v43  ;;  %v10735_v54 = vld [vmem:[%s12017_s1 + $0x198] sm:$0xff] }
 0x2f0   : > { %3661 = vmatprep.mubr.f32.mxu0 %v12166_v7  ;;  %v973_v25 = vsub.f32 1.0, %v10703_v3  ;;  %v7736_v32 = vadd.f32 -0.5, %v6591_v36  ;;  %v7738_v16 = vadd.f32 -0.5, %v6593_v23  ;;  %v7737_v55 = vadd.f32 -0.5, %v6592_v13 }
 0x2f1   : > { %7500 = vmatmul.mubr.msk.f32.gmra.mrb[28].mxu1 %vm3129_vm9, %v10273_v45  ;;  %v967_v51 = vmul.f32 %v963_v39, %v939_v29  ;;  %v7167_v40 = vrot.slane %v10715_v12, 1  ;;  %v10725_v9 = vmul.f32 %v12202_v52, %v996_v42  ;;  %v7739_v38 = vadd.f32 -0.5, %v6594_v0 }
 0x2f2   : > { %3410 = vmatprep.mubr.f32.mxu1 %v12166_v7  ;;  %v993_v43 = vmul.f32 %v980_v33, %v973_v25  ;;  %v6599_v29 = vmax.f32 %v7736_v32, 0.0  ;;  %v6601_v47 = vmax.f32 %v7738_v16, 0.0  ;;  %v988_v49 = vrot.slane %v10635_v26, %v10451_v17 }
 0x2f3   : > { %7516 = vmatmul.mubr.msk.f32.gmra.mrb[32].mxu0 %vm3129_vm9, %v10712_v63  ;;  %v10729_v45 = vadd.f32 %v967_v51, %v915_v5  ;;  %7175 = vst [vmem:[%s9339_s9 + $0x48] sm:$0xe] %v7167_v40  ;;  %v7169_v58 = vrot.slane %v10725_v9, 1  ;;  %v6600_v39 = vmax.f32 %v7737_v55, 0.0  ;;  %v6602_v33 = vmax.f32 %v7739_v38, 0.0  ;;  %v10762_v51 = vld [vmem:[%s12017_s1 + $0x1a0] sm:$0xff] }
 0x2f4   : > { %3667 = vmatprep.mubr.f32.mxu0 %v12166_v7  ;;  %v10744_v5 = vmul.f32 %v12204_v21, %v993_v43  ;;  %v6603_v23 = vmin.f32 %v6599_v29, 15.0  ;;  %v6605_v42 = vmin.f32 %v6601_v47, 15.0  ;;  %v12217_v38 = vld [vmem:[#allocation49_spill] sm:$0xff]  ;;  %v10818_v29 = vld [vmem:[%s12017_s1 + $0x1c0] sm:$0xff] }
 0x2f5   : > { %7501 = vmatmul.mubr.msk.f32.gmra.mrb[30].mxu1 %vm3129_vm9, %v10302_v20  ;;  %v975_v36 = vsub.f32 1.0, %v10729_v45  ;;  %7177 = vst [vmem:[%s9339_s9 + $0x58] sm:$0xe] %v7169_v58  ;;  %v6604_v17 = vmin.f32 %v6600_v39, 15.0  ;;  %v6606_v26 = vmin.f32 %v6602_v33, 15.0  ;;  %v12218_v43 = vld [vmem:[#allocation53_spill] sm:$0xff] }
 0x2f6   : > { %3416 = vmatprep.mubr.f32.mxu1 %v12166_v7  ;;  %v7166_v13 = vrot.slane %v10744_v5, 1  ;;  %v10753_v20 = vrot.slane %v6603_v23, %v10470_v19  ;;  %v10756_v25 = vrot.slane %v6605_v42, %v10470_v19  ;;  %v12219_v47 = vld [vmem:[#allocation4_spill] sm:$0xff]  ;;  %v12221_v58 = vld [vmem:[#allocation29_spill] sm:$0xff]  ;;  %v12223_v23 = vld [vmem:[#allocation30_spill] sm:$0xff] }
 0x2f7   : > { %7517 = vmatmul.mubr.msk.f32.gmra.mrb[34].mxu0 %vm3129_vm9, %v10735_v54  ;;  %v995_v0 = vmul.f32 %v988_v49, %v975_v36  ;;  %v10765_v32 = vrot.slane %v6604_v17, %v10470_v19  ;;  %v10768_v16 = vrot.slane %v6606_v26, %v10470_v19  ;;  %v10784_v19 = vld [vmem:[%s12017_s1 + $0x1a8] sm:$0xff]  ;;  %v12220_v49 = vld [vmem:[#allocation27_spill] sm:$0xff]  ;;  %v12224_v42 = vld [vmem:[#allocation24_spill] sm:$0xff] }
 0x2f8   : > { %3673 = vmatprep.mubr.f32.mxu0 %v12166_v7  ;;  %7174 = vst [vmem:[%s9339_s9 + $0x40] sm:$0xe] %v7166_v13  ;;  %v7848_v39 = vpack.c.bf16 %v12221_v58, %v12220_v49  ;;  %v10833_v33 = vld [vmem:[%s12017_s1 + $0x1c8] sm:$0xff]  ;;  %v12222_v36 = vld [vmem:[#allocation19_spill] sm:$0xff]  ;;  %v12225_v17 = vpack.c.bf16 %v12223_v23, %v12224_v42  ;;  %v11000_v23 = vld [vmem:[%s12017_s1 + $0x230] sm:$0xff] }
 0x2f9   : > { %7502 = vmatmul.mubr.msk.f32.gmra.mrb[32].mxu1 %vm3129_vm9, %v10327_v4  ;;  %v10774_v40 = vmul.f32 %v12205_v11, %v995_v0  ;;  %v10796_v4 = vld [vmem:[%s12017_s1 + $0x1b0] sm:$0xff]  ;;  %v12226_v26 = vld [vmem:[#allocation39_spill] sm:$0xff]  ;;  %v10984_v58 = vld [vmem:[%s12017_s1 + $0x228] sm:$0xff] }
 0x2fa   : > { %3422 = vmatprep.mubr.f32.mxu1 %v12166_v7  ;;  %v7842_v13 = vpack.c.bf16 %v10568_v62, %v12226_v26  ;;  %v10851_v0 = vld [vmem:[%s12017_s1 + $0x1d0] sm:$0xff]  ;;  %v10880_v62 = vld [vmem:[%s12017_s1 + $0x1e0] sm:$0xff]  ;;  %v12237_v42 = vld [vmem:[#allocation31_spill] sm:$0xff] }
 0x2fb   : > { %7518 = vmatmul.mubr.msk.f32.gmra.mrb[36].mxu0 %vm3129_vm9, %v10762_v51  ;;  %v7168_v55 = vrot.slane %v10774_v40, 1  ;;  %v11076_v26 = vld [vmem:[%s12017_s1 + $0x260] sm:$0xff] }
 0x2fc   : > { %3679 = vmatprep.mubr.f32.mxu0 %v12166_v7 }
 0x2fd   : > { %7503 = vmatmul.mubr.msk.f32.gmra.mrb[34].mxu1 %vm3129_vm9, %v10356_v30  ;;  %7176 = vst [vmem:[%s9339_s9 + $0x50] sm:$0xe] %v7168_v55  ;;  %v10807_v30 = vld [vmem:[%s12017_s1 + $0x1b8] sm:$0xff]  ;;  %v12227_v55 = vld [vmem:[#allocation28_spill] sm:$0xff] }
 0x2fe   : > { %3428 = vmatprep.mubr.f32.mxu1 %v12166_v7 }
 0x2ff   : > { %7519 = vmatmul.mubr.msk.f32.gmra.mrb[38].mxu0 %vm3129_vm9, %v10784_v19 }
 0x300   : > { %3685 = vmatprep.mubr.f32.mxu0 %v12166_v7 }
 0x301   : > { %7504 = vmatmul.mubr.msk.f32.gmra.mrb[36].mxu1 %vm3129_vm9, %v12217_v38  ;;  %v12228_v38 = vld [vmem:[#allocation26_spill] sm:$0xff] }
 0x302   : > { %3434 = vmatprep.mubr.f32.mxu1 %v12166_v7 }
 0x303   : > { %7520 = vmatmul.mubr.msk.f32.gmra.mrb[40].mxu0 %vm3129_vm9, %v10796_v4 }
 0x304   : > { %3691 = vmatprep.mubr.f32.mxu0 %v12166_v7 }
 0x305   : > { %7505 = vmatmul.mubr.msk.f32.gmra.mrb[38].mxu1 %vm3129_vm9, %v12218_v43  ;;  %v12229_v43 = vpack.c.bf16 %v12227_v55, %v12228_v38  ;;  %v11109_v55 = vld [vmem:[%s12017_s1 + $0x278] sm:$0xff]  ;;  %v11120_v38 = vld [vmem:[%s12017_s1 + $0x280] sm:$0xff] }
 0x306   : > { %3440 = vmatprep.mubr.f32.mxu1 %v12166_v7 }
 0x307   : > { %7521 = vmatmul.mubr.msk.f32.gmra.mrb[42].mxu0 %vm3129_vm9, %v10807_v30 }
 0x308   : > { %4047 = vmatprep.mubr.f32.mxu0 %v12166_v7 }
 0x309   : > { %7506 = vmatmul.mubr.msk.f32.gmra.mrb[40].mxu1 %vm3129_vm9, %v12219_v47  ;;  %v12231_v47 = vld [vmem:[#allocation33_spill] sm:$0xff] }
 0x30a   : > { %3446 = vmatprep.mubr.f32.mxu1 %v12166_v7 }
 0x30b   : > { %7546 = vmatmul.mubr.msk.f32.vlgmr.msra.gmra.mrb[20].mxu0 %vm3129_vm9, %v10818_v29 }
 0x30c   : > { %7850 = vmatpush1.bf16.msk.msra.mxu0 %vm9961_vm11, %v7848_v39  ;;  %4053 = vmatprep.mubr.f32.mxu0 %v12166_v7  ;;  %v12234_v39 = vld [vmem:[#allocation35_spill] sm:$0xff] }
 0x30d   : > { %7507 = vmatmul.mubr.msk.f32.gmra.mrb[42].mxu1 %vm3129_vm9, %v12222_v36  ;;  %7859 = vmatprep.subr.msk.bf16.mxu0 %vm9961_vm11, %v12225_v17 }
 0x30e   : > { %3762 = vmatprep.mubr.f32.mxu1 %v12166_v7 }
 0x30f   : > { %7547 = vmatmul.mubr.msk.f32.gmra.mrb[22].mxu0 %vm3129_vm9, %v10833_v33 }
 0x310   : > { %4059 = vmatprep.mubr.f32.mxu0 %v12166_v7 }
 0x311   : > { %7524 = vmatmul.mubr.msk.f32.vlgmr.msra.gmra.mrb[20].mxu1 %vm3129_vm9, %v10510_v15  ;;  %v10869_v15 = vld [vmem:[%s12017_s1 + $0x1d8] sm:$0xff] }
 0x312   : > { %7844 = vmatpush1.bf16.msk.msra.mxu1 %vm9961_vm11, %v7842_v13  ;;  %3768 = vmatprep.mubr.f32.mxu1 %v12166_v7  ;;  %v11087_v13 = vld [vmem:[%s12017_s1 + $0x268] sm:$0xff] }
 0x313   : > { %7853 = vmatprep.subr.msk.bf16.mxu1 %vm9961_vm11, %v12229_v43  ;;  %7548 = vmatmul.mubr.msk.f32.gmra.mrb[24].mxu0 %vm3129_vm9, %v10851_v0  ;;  %v12239_v43 = vld [vmem:[#allocation42_spill] sm:$0xff] }
 0x314   : > { %4065 = vmatprep.mubr.f32.mxu0 %v12166_v7 }
 0x315   : > { %7525 = vmatmul.mubr.msk.f32.gmra.mrb[22].mxu1 %vm3129_vm9, %v10553_v44  ;;  %v10891_v44 = vld [vmem:[%s12017_s1 + $0x1e8] sm:$0xff] }
 0x316   : > { %3774 = vmatprep.mubr.f32.mxu1 %v12166_v7 }
 0x317   : > { %7549 = vmatmul.mubr.msk.f32.gmra.mrb[26].mxu0 %vm3129_vm9, %v10869_v15 }
 0x318   : > { %4071 = vmatprep.mubr.f32.mxu0 %v12166_v7 }
 0x319   : > { %7526 = vmatmul.mubr.msk.f32.gmra.mrb[24].mxu1 %vm3129_vm9, %v10594_v37  ;;  %v10902_v37 = vld [vmem:[%s12017_s1 + $0x1f0] sm:$0xff] }
 0x31a   : > { %3780 = vmatprep.mubr.f32.mxu1 %v12166_v7 }
 0x31b   : > { %7550 = vmatmul.mubr.msk.f32.gmra.mrb[28].mxu0 %vm3129_vm9, %v10880_v62 }
 0x31c   : > { %4077 = vmatprep.mubr.f32.mxu0 %v12166_v7 }
 0x31d   : > { %7527 = vmatmul.mubr.msk.f32.gmra.mrb[26].mxu1 %vm3129_vm9, %v10625_v53  ;;  %v10913_v53 = vld [vmem:[%s12017_s1 + $0x1f8] sm:$0xff] }
 0x31e   : > { %3786 = vmatprep.mubr.f32.mxu1 %v12166_v7 }
 0x31f   : > { %7551 = vmatmul.mubr.msk.f32.gmra.mrb[30].mxu0 %vm3129_vm9, %v10891_v44 }
 0x320   : > { %4083 = vmatprep.mubr.f32.mxu0 %v12166_v7 }
 0x321   : > { %7528 = vmatmul.mubr.msk.f32.gmra.mrb[28].mxu1 %vm3129_vm9, %v10650_v27  ;;  %v10924_v27 = vld [vmem:[%s12017_s1 + $0x200] sm:$0xff] }
 0x322   : > { %3792 = vmatprep.mubr.f32.mxu1 %v12166_v7 }
 0x323   : > { %7552 = vmatmul.mubr.msk.f32.gmra.mrb[32].mxu0 %vm3129_vm9, %v10902_v37 }
 0x324   : > { %4089 = vmatprep.mubr.f32.mxu0 %v12166_v7 }
 0x325   : > { %7529 = vmatmul.mubr.msk.f32.gmra.mrb[30].mxu1 %vm3129_vm9, %v10683_v48  ;;  %v10935_v48 = vld [vmem:[%s12017_s1 + $0x208] sm:$0xff] }
 0x326   : > { %3798 = vmatprep.mubr.f32.mxu1 %v12166_v7 }
 0x327   : > { %7553 = vmatmul.mubr.msk.f32.gmra.mrb[34].mxu0 %vm3129_vm9, %v10913_v53 }
 0x328   : > { %4095 = vmatprep.mubr.f32.mxu0 %v12166_v7 }
 0x329   : > { %7530 = vmatmul.mubr.msk.f32.gmra.mrb[32].mxu1 %vm3129_vm9, %v10712_v63  ;;  %v10946_v63 = vld [vmem:[%s12017_s1 + $0x210] sm:$0xff] }
 0x32a   : > { %3804 = vmatprep.mubr.f32.mxu1 %v12166_v7 }
 0x32b   : > { %7554 = vmatmul.mubr.msk.f32.gmra.mrb[36].mxu0 %vm3129_vm9, %v10924_v27 }
 0x32c   : > { %4101 = vmatprep.mubr.f32.mxu0 %v12166_v7 }
 0x32d   : > { %7531 = vmatmul.mubr.msk.f32.gmra.mrb[34].mxu1 %vm3129_vm9, %v10735_v54  ;;  %v10957_v54 = vld [vmem:[%s12017_s1 + $0x218] sm:$0xff] }
 0x32e   : > { %3810 = vmatprep.mubr.f32.mxu1 %v12166_v7 }
 0x32f   : > { %7555 = vmatmul.mubr.msk.f32.gmra.mrb[38].mxu0 %vm3129_vm9, %v10935_v48 }
 0x330   : > { %4107 = vmatprep.mubr.f32.mxu0 %v12166_v7 }
 0x331   : > { %7532 = vmatmul.mubr.msk.f32.gmra.mrb[36].mxu1 %vm3129_vm9, %v10762_v51  ;;  %v10968_v51 = vld [vmem:[%s12017_s1 + $0x220] sm:$0xff] }
 0x332   : > { %3816 = vmatprep.mubr.f32.mxu1 %v12166_v7 }
 0x333   : > { %7556 = vmatmul.mubr.msk.f32.gmra.mrb[40].mxu0 %vm3129_vm9, %v10946_v63 }
 0x334   : > { %4113 = vmatprep.mubr.f32.mxu0 %v12166_v7 }
 0x335   : > { %7533 = vmatmul.mubr.msk.f32.gmra.mrb[38].mxu1 %vm3129_vm9, %v10784_v19  ;;  %v12230_v19 = vld [vmem:[#allocation34_spill] sm:$0xff] }
 0x336   : > { %3822 = vmatprep.mubr.f32.mxu1 %v12166_v7  ;;  %v12232_v49 = vpack.c.bf16 %v12230_v19, %v12231_v47  ;;  %v11217_v47 = vld [vmem:[%s12017_s1 + $0x2b8] sm:$0xff] }
 0x337   : > { %7557 = vmatmul.mubr.msk.f32.gmra.mrb[42].mxu0 %vm3129_vm9, %v10957_v54 }
 0x338   : > { %4429 = vmatprep.mubr.f32.mxu0 %v12166_v7 }
 0x339   : > { %7534 = vmatmul.mubr.msk.f32.gmra.mrb[40].mxu1 %vm3129_vm9, %v10796_v4  ;;  %v12233_v4 = vld [vmem:[#allocation36_spill] sm:$0xff] }
 0x33a   : > { %3828 = vmatprep.mubr.f32.mxu1 %v12166_v7  ;;  %v12235_v36 = vpack.c.bf16 %v12233_v4, %v12234_v39  ;;  %v11250_v4 = vld [vmem:[%s12017_s1 + $0x2d0] sm:$0xff]  ;;  %v11261_v39 = vld [vmem:[%s12017_s1 + $0x2d8] sm:$0xff] }
 0x33b   : > { %7574 = vmatmul.mubr.msk.f32.vlgmr.msra.gmra.mrb[20].mxu0 %vm3129_vm9, %v10968_v51 }
 0x33c   : > { %7862 = vmatpush1.bf16.msk.msra.mxu0 %vm9961_vm11, %v12232_v49  ;;  %4435 = vmatprep.mubr.f32.mxu0 %v12166_v7  ;;  %v11228_v49 = vld [vmem:[%s12017_s1 + $0x2c0] sm:$0xff] }
 0x33d   : > { %7535 = vmatmul.mubr.msk.f32.gmra.mrb[42].mxu1 %vm3129_vm9, %v10807_v30  ;;  %7871 = vmatprep.subr.msk.bf16.mxu0 %vm9961_vm11, %v12235_v36  ;;  %v12236_v30 = vld [vmem:[#allocation32_spill] sm:$0xff] }
 0x33e   : > { %4184 = vmatprep.mubr.f32.mxu1 %v12166_v7  ;;  %v12238_v17 = vpack.c.bf16 %v12236_v30, %v12237_v42  ;;  %v11272_v36 = vld [vmem:[%s12017_s1 + $0x2e0] sm:$0xff]  ;;  %v12249_v30 = vld [vmem:[#allocation46_spill] sm:$0xff] }
 0x33f   : > { %7575 = vmatmul.mubr.msk.f32.gmra.mrb[22].mxu0 %vm3129_vm9, %v10984_v58 }
 0x340   : > { %4441 = vmatprep.mubr.f32.mxu0 %v12166_v7 }
 0x341   : > { %7560 = vmatmul.mubr.msk.f32.vlgmr.msra.gmra.mrb[20].mxu1 %vm3129_vm9, %v10818_v29  ;;  %v11054_v29 = vld [vmem:[%s12017_s1 + $0x250] sm:$0xff] }
 0x342   : > { %7856 = vmatpush1.bf16.msk.msra.mxu1 %vm9961_vm11, %v7854_v46  ;;  %4190 = vmatprep.mubr.f32.mxu1 %v12166_v7  ;;  %v11043_v46 = vld [vmem:[%s12017_s1 + $0x248] sm:$0xff] }
 0x343   : > { %7865 = vmatprep.subr.msk.bf16.mxu1 %vm9961_vm11, %v12238_v17  ;;  %7576 = vmatmul.mubr.msk.f32.gmra.mrb[24].mxu0 %vm3129_vm9, %v11000_v23  ;;  %v11288_v17 = vld [vmem:[%s12017_s1 + $0x2e8] sm:$0xff] }
 0x344   : > { %4447 = vmatprep.mubr.f32.mxu0 %v12166_v7 }
 0x345   : > { %7561 = vmatmul.mubr.msk.f32.gmra.mrb[22].mxu1 %vm3129_vm9, %v10833_v33  ;;  %v11065_v33 = vld [vmem:[%s12017_s1 + $0x258] sm:$0xff] }
 0x346   : > { %4196 = vmatprep.mubr.f32.mxu1 %v12166_v7 }
 0x347   : > { %7577 = vmatmul.mubr.msk.f32.gmra.mrb[26].mxu0 %vm3129_vm9, %v11021_v56 }
 0x348   : > { %4453 = vmatprep.mubr.f32.mxu0 %v12166_v7 }
 0x349   : > { %7562 = vmatmul.mubr.msk.f32.gmra.mrb[24].mxu1 %vm3129_vm9, %v10851_v0  ;;  %v11098_v0 = vld [vmem:[%s12017_s1 + $0x270] sm:$0xff] }
 0x34a   : > { %4202 = vmatprep.mubr.f32.mxu1 %v12166_v7 }
 0x34b   : > { %7578 = vmatmul.mubr.msk.f32.gmra.mrb[28].mxu0 %vm3129_vm9, %v11032_v28 }
 0x34c   : > { %4459 = vmatprep.mubr.f32.mxu0 %v12166_v7 }
 0x34d   : > { %7563 = vmatmul.mubr.msk.f32.gmra.mrb[26].mxu1 %vm3129_vm9, %v10869_v15  ;;  %v12240_v15 = vld [vmem:[#allocation40_spill] sm:$0xff] }
 0x34e   : > { %4208 = vmatprep.mubr.f32.mxu1 %v12166_v7 }
 0x34f   : > { %7579 = vmatmul.mubr.msk.f32.gmra.mrb[30].mxu0 %vm3129_vm9, %v11043_v46 }
 0x350   : > { %4465 = vmatprep.mubr.f32.mxu0 %v12166_v7 }
 0x351   : > { %7564 = vmatmul.mubr.msk.f32.gmra.mrb[28].mxu1 %vm3129_vm9, %v10880_v62  ;;  %v12241_v62 = vpack.c.bf16 %v12239_v43, %v12240_v15  ;;  %v11391_v43 = vld [vmem:[%s12017_s1 + $0x328] sm:$0xff]  ;;  %v11402_v15 = vld [vmem:[%s12017_s1 + $0x330] sm:$0xff] }
 0x352   : > { %4214 = vmatprep.mubr.f32.mxu1 %v12166_v7 }
 0x353   : > { %7580 = vmatmul.mubr.msk.f32.gmra.mrb[32].mxu0 %vm3129_vm9, %v11054_v29 }
 0x354   : > { %4471 = vmatprep.mubr.f32.mxu0 %v12166_v7 }
 0x355   : > { %7565 = vmatmul.mubr.msk.f32.gmra.mrb[30].mxu1 %vm3129_vm9, %v10891_v44  ;;  %v11136_v44 = vld [vmem:[%s12017_s1 + $0x288] sm:$0xff] }
 0x356   : > { %4220 = vmatprep.mubr.f32.mxu1 %v12166_v7 }
 0x357   : > { %7581 = vmatmul.mubr.msk.f32.gmra.mrb[34].mxu0 %vm3129_vm9, %v11065_v33 }
 0x358   : > { %4477 = vmatprep.mubr.f32.mxu0 %v12166_v7 }
 0x359   : > { %7566 = vmatmul.mubr.msk.f32.gmra.mrb[32].mxu1 %vm3129_vm9, %v10902_v37  ;;  %v12242_v37 = vld [vmem:[#allocation43_spill] sm:$0xff] }
 0x35a   : > { %4226 = vmatprep.mubr.f32.mxu1 %v12166_v7 }
 0x35b   : > { %7582 = vmatmul.mubr.msk.f32.gmra.mrb[36].mxu0 %vm3129_vm9, %v11076_v26 }
 0x35c   : > { %4483 = vmatprep.mubr.f32.mxu0 %v12166_v7 }
 0x35d   : > { %7567 = vmatmul.mubr.msk.f32.gmra.mrb[34].mxu1 %vm3129_vm9, %v10913_v53  ;;  %v12243_v53 = vld [vmem:[#allocation41_spill] sm:$0xff] }
 0x35e   : > { %4232 = vmatprep.mubr.f32.mxu1 %v12166_v7 }
 0x35f   : > { %7583 = vmatmul.mubr.msk.f32.gmra.mrb[38].mxu0 %vm3129_vm9, %v11087_v13 }
 0x360   : > { %4489 = vmatprep.mubr.f32.mxu0 %v12166_v7 }
 0x361   : > { %7568 = vmatmul.mubr.msk.f32.gmra.mrb[36].mxu1 %vm3129_vm9, %v10924_v27  ;;  %v12244_v27 = vpack.c.bf16 %v12242_v37, %v12243_v53  ;;  %v12257_v37 = vld [vmem:[#allocation54_spill] sm:$0xff] }
 0x362   : > { %4238 = vmatprep.mubr.f32.mxu1 %v12166_v7  ;;  %v12258_v53 = vld [vmem:[#allocation18_spill] sm:$0xff] }
 0x363   : > { %7584 = vmatmul.mubr.msk.f32.gmra.mrb[40].mxu0 %vm3129_vm9, %v11098_v0 }
 0x364   : > { %4495 = vmatprep.mubr.f32.mxu0 %v12166_v7 }
 0x365   : > { %7569 = vmatmul.mubr.msk.f32.gmra.mrb[38].mxu1 %vm3129_vm9, %v10935_v48  ;;  %v11152_v48 = vld [vmem:[%s12017_s1 + $0x290] sm:$0xff] }
 0x366   : > { %4244 = vmatprep.mubr.f32.mxu1 %v12166_v7 }
 0x367   : > { %7585 = vmatmul.mubr.msk.f32.gmra.mrb[42].mxu0 %vm3129_vm9, %v11109_v55 }
 0x368   : > { %4851 = vmatprep.mubr.f32.mxu0 %v12166_v7 }
 0x369   : > { %7570 = vmatmul.mubr.msk.f32.gmra.mrb[40].mxu1 %vm3129_vm9, %v10946_v63  ;;  %v12245_v63 = vld [vmem:[#allocation38_spill] sm:$0xff] }
 0x36a   : > { %4250 = vmatprep.mubr.f32.mxu1 %v12166_v7 }
 0x36b   : > { %7610 = vmatmul.mubr.msk.f32.vlgmr.msra.gmra.mrb[20].mxu0 %vm3129_vm9, %v11120_v38 }
 0x36c   : > { %7874 = vmatpush1.bf16.msk.msra.mxu0 %vm9961_vm11, %v12241_v62  ;;  %4857 = vmatprep.mubr.f32.mxu0 %v12166_v7  ;;  %v11413_v62 = vld [vmem:[%s12017_s1 + $0x338] sm:$0xff] }
 0x36d   : > { %7571 = vmatmul.mubr.msk.f32.gmra.mrb[42].mxu1 %vm3129_vm9, %v10957_v54  ;;  %7883 = vmatprep.subr.msk.bf16.mxu0 %vm9961_vm11, %v12244_v27  ;;  %v12246_v54 = vld [vmem:[#allocation37_spill] sm:$0xff]  ;;  %v12259_v27 = vpack.c.bf16 %v12257_v37, %v12258_v53 }
 0x36e   : > { %4566 = vmatprep.mubr.f32.mxu1 %v12166_v7  ;;  %v12247_v19 = vpack.c.bf16 %v12245_v63, %v12246_v54  ;;  %v11451_v63 = vld [vmem:[%s12017_s1 + $0x350] sm:$0xff]  ;;  %v12260_v54 = vld [vmem:[#allocation52_spill] sm:$0xff] }
 0x36f   : > { %7611 = vmatmul.mubr.msk.f32.gmra.mrb[22].mxu0 %vm3129_vm9, %v11136_v44 }
 0x370   : > { %4863 = vmatprep.mubr.f32.mxu0 %v12166_v7 }
 0x371   : > { %7588 = vmatmul.mubr.msk.f32.vlgmr.msra.gmra.mrb[20].mxu1 %vm3129_vm9, %v10968_v51  ;;  %v11206_v51 = vld [vmem:[%s12017_s1 + $0x2b0] sm:$0xff] }
 0x372   : > { %7868 = vmatpush1.bf16.msk.msra.mxu1 %vm9961_vm11, %v7866_v59  ;;  %4572 = vmatprep.mubr.f32.mxu1 %v12166_v7  ;;  %v11195_v59 = vld [vmem:[%s12017_s1 + $0x2a8] sm:$0xff] }
 0x373   : > { %7877 = vmatprep.subr.msk.bf16.mxu1 %vm9961_vm11, %v12247_v19  ;;  %7612 = vmatmul.mubr.msk.f32.gmra.mrb[24].mxu0 %vm3129_vm9, %v11152_v48  ;;  %v12261_v19 = vld [vmem:[#allocation51_spill] sm:$0xff] }
 0x374   : > { %4869 = vmatprep.mubr.f32.mxu0 %v12166_v7 }
 0x375   : > { %7589 = vmatmul.mubr.msk.f32.gmra.mrb[22].mxu1 %vm3129_vm9, %v10984_v58  ;;  %v11239_v58 = vld [vmem:[%s12017_s1 + $0x2c8] sm:$0xff] }
 0x376   : > { %4578 = vmatprep.mubr.f32.mxu1 %v12166_v7 }
 0x377   : > { %7613 = vmatmul.mubr.msk.f32.gmra.mrb[26].mxu0 %vm3129_vm9, %v11173_v34 }
 0x378   : > { %4875 = vmatprep.mubr.f32.mxu0 %v12166_v7 }
 0x379   : > { %7590 = vmatmul.mubr.msk.f32.gmra.mrb[24].mxu1 %vm3129_vm9, %v11000_v23  ;;  %v12248_v23 = vld [vmem:[#allocation47_spill] sm:$0xff] }
 0x37a   : > { %4584 = vmatprep.mubr.f32.mxu1 %v12166_v7  ;;  %v12250_v42 = vpack.c.bf16 %v12248_v23, %v12249_v30  ;;  %v5916_v23 = vld [vmem:[%s12017_s1 + $0x3b8] sm:$0xff]  ;;  %v5921_v30 = vld [vmem:[%s12017_s1 + $0x3e0] sm:$0xff] }
 0x37b   : > { %7614 = vmatmul.mubr.msk.f32.gmra.mrb[28].mxu0 %vm3129_vm9, %v11184_v14 }
 0x37c   : > { %4881 = vmatprep.mubr.f32.mxu0 %v12166_v7 }
 0x37d   : > { %7591 = vmatmul.mubr.msk.f32.gmra.mrb[26].mxu1 %vm3129_vm9, %v11021_v56  ;;  %v12251_v56 = vld [vmem:[#allocation50_spill] sm:$0xff] }
 0x37e   : > { %4590 = vmatprep.mubr.f32.mxu1 %v12166_v7 }
 0x37f   : > { %7615 = vmatmul.mubr.msk.f32.gmra.mrb[30].mxu0 %vm3129_vm9, %v11195_v59 }
 0x380   : > { %4887 = vmatprep.mubr.f32.mxu0 %v12166_v7 }
 0x381   : > { %7592 = vmatmul.mubr.msk.f32.gmra.mrb[28].mxu1 %vm3129_vm9, %v11032_v28  ;;  %v12252_v28 = vld [vmem:[#allocation48_spill] sm:$0xff] }
 0x382   : > { %4596 = vmatprep.mubr.f32.mxu1 %v12166_v7 }
 0x383   : > { %7616 = vmatmul.mubr.msk.f32.gmra.mrb[32].mxu0 %vm3129_vm9, %v11206_v51 }
 0x384   : > { %4893 = vmatprep.mubr.f32.mxu0 %v12166_v7 }
 0x385   : > { %7593 = vmatmul.mubr.msk.f32.gmra.mrb[30].mxu1 %vm3129_vm9, %v11043_v46  ;;  %v12253_v46 = vpack.c.bf16 %v12251_v56, %v12252_v28  ;;  %v5924_v56 = vld [vmem:[%s12017_s1 + $0x3f8] sm:$0xff] }
 0x386   : > { %4602 = vmatprep.mubr.f32.mxu1 %v12166_v7 }
 0x387   : > { %7617 = vmatmul.mubr.msk.f32.gmra.mrb[34].mxu0 %vm3129_vm9, %v11217_v47 }
 0x388   : > { %4899 = vmatprep.mubr.f32.mxu0 %v12166_v7 }
 0x389   : > { %7594 = vmatmul.mubr.msk.f32.gmra.mrb[32].mxu1 %vm3129_vm9, %v11054_v29  ;;  %v11304_v29 = vld [vmem:[%s12017_s1 + $0x2f0] sm:$0xff] }
 0x38a   : > { %4608 = vmatprep.mubr.f32.mxu1 %v12166_v7 }
 0x38b   : > { %7618 = vmatmul.mubr.msk.f32.gmra.mrb[36].mxu0 %vm3129_vm9, %v11228_v49 }
 0x38c   : > { %4905 = vmatprep.mubr.f32.mxu0 %v12166_v7 }
 0x38d   : > { %7595 = vmatmul.mubr.msk.f32.gmra.mrb[34].mxu1 %vm3129_vm9, %v11065_v33  ;;  %v12254_v33 = vld [vmem:[#allocation45_spill] sm:$0xff] }
 0x38e   : > { %4614 = vmatprep.mubr.f32.mxu1 %v12166_v7 }
 0x38f   : > { %7619 = vmatmul.mubr.msk.f32.gmra.mrb[38].mxu0 %vm3129_vm9, %v11239_v58 }
 0x390   : > { %4911 = vmatprep.mubr.f32.mxu0 %v12166_v7 }
 0x391   : > { %7596 = vmatmul.mubr.msk.f32.gmra.mrb[36].mxu1 %vm3129_vm9, %v11076_v26  ;;  %v12255_v26 = vld [vmem:[#allocation44_spill] sm:$0xff] }
 0x392   : > { %4620 = vmatprep.mubr.f32.mxu1 %v12166_v7 }
 0x393   : > { %7620 = vmatmul.mubr.msk.f32.gmra.mrb[40].mxu0 %vm3129_vm9, %v11250_v4 }
 0x394   : > { %4917 = vmatprep.mubr.f32.mxu0 %v12166_v7 }
 0x395   : > { %7597 = vmatmul.mubr.msk.f32.gmra.mrb[38].mxu1 %vm3129_vm9, %v11087_v13  ;;  %v12256_v13 = vpack.c.bf16 %v12254_v33, %v12255_v26  ;;  %v11704_v26 = vpop.permute.xlu0 %2754 }
 0x396   : > { %4626 = vmatprep.mubr.f32.mxu1 %v12166_v7 }
 0x397   : > { %7621 = vmatmul.mubr.msk.f32.gmra.mrb[42].mxu0 %vm3129_vm9, %v11261_v39 }
 0x398   : > { %5233 = vmatprep.mubr.f32.mxu0 %v12166_v7 }
 0x399   : > { %7598 = vmatmul.mubr.msk.f32.gmra.mrb[40].mxu1 %vm3129_vm9, %v11098_v0  ;;  %v11358_v0 = vld [vmem:[%s12017_s1 + $0x310] sm:$0xff] }
 0x39a   : > { %4632 = vmatprep.mubr.f32.mxu1 %v12166_v7 }
 0x39b   : > { %7638 = vmatmul.mubr.msk.f32.vlgmr.msra.gmra.mrb[20].mxu0 %vm3129_vm9, %v11272_v36 }
 0x39c   : > { %7886 = vmatpush1.bf16.msk.msra.mxu0 %vm9961_vm11, %v12250_v42  ;;  %5239 = vmatprep.mubr.f32.mxu0 %v12166_v7  ;;  %v5922_v42 = vld [vmem:[%s12017_s1 + $0x3e8] sm:$0xff] }
 0x39d   : > { %7599 = vmatmul.mubr.msk.f32.gmra.mrb[42].mxu1 %vm3129_vm9, %v11109_v55  ;;  %7895 = vmatprep.subr.msk.bf16.mxu0 %vm9961_vm11, %v12253_v46  ;;  %v11369_v55 = vld [vmem:[%s12017_s1 + $0x318] sm:$0xff] }
 0x39e   : > { %4988 = vmatprep.mubr.f32.mxu1 %v12166_v7 }
 0x39f   : > { %7639 = vmatmul.mubr.msk.f32.gmra.mrb[22].mxu0 %vm3129_vm9, %v11288_v17 }
 0x3a0   : > { %5245 = vmatprep.mubr.f32.mxu0 %v12166_v7 }
 0x3a1   : > { %7624 = vmatmul.mubr.msk.f32.vlgmr.msra.gmra.mrb[20].mxu1 %vm3129_vm9, %v11120_v38  ;;  %v11380_v38 = vld [vmem:[%s12017_s1 + $0x320] sm:$0xff] }
 0x3a2   : > { %7880 = vmatpush1.bf16.msk.msra.mxu1 %vm9961_vm11, %v7878_v8  ;;  %4994 = vmatprep.mubr.f32.mxu1 %v12166_v7  ;;  %v11347_v8 = vld [vmem:[%s12017_s1 + $0x308] sm:$0xff] }
 0x3a3   : > { %7889 = vmatprep.subr.msk.bf16.mxu1 %vm9961_vm11, %v12256_v13  ;;  %7640 = vmatmul.mubr.msk.f32.gmra.mrb[24].mxu0 %vm3129_vm9, %v11304_v29 }
 0x3a4   : > { %5251 = vmatprep.mubr.f32.mxu0 %v12166_v7 }
 0x3a5   : > { %7625 = vmatmul.mubr.msk.f32.gmra.mrb[22].mxu1 %vm3129_vm9, %v11136_v44  ;;  %v11424_v44 = vld [vmem:[%s12017_s1 + $0x340] sm:$0xff] }
 0x3a6   : > { %5000 = vmatprep.mubr.f32.mxu1 %v12166_v7 }
 0x3a7   : > { %7641 = vmatmul.mubr.msk.f32.gmra.mrb[26].mxu0 %vm3129_vm9, %v11325_v50 }
 0x3a8   : > { %5257 = vmatprep.mubr.f32.mxu0 %v12166_v7 }
 0x3a9   : > { %7626 = vmatmul.mubr.msk.f32.gmra.mrb[24].mxu1 %vm3129_vm9, %v11152_v48  ;;  %v11440_v48 = vld [vmem:[%s12017_s1 + $0x348] sm:$0xff] }
 0x3aa   : > { %5006 = vmatprep.mubr.f32.mxu1 %v12166_v7 }
 0x3ab   : > { %7642 = vmatmul.mubr.msk.f32.gmra.mrb[28].mxu0 %vm3129_vm9, %v11336_v1 }
 0x3ac   : > { %5263 = vmatprep.mubr.f32.mxu0 %v12166_v7 }
 0x3ad   : > { %7627 = vmatmul.mubr.msk.f32.gmra.mrb[26].mxu1 %vm3129_vm9, %v11173_v34  ;;  %v12262_v34 = vpack.c.bf16 %v12260_v54, %v12261_v19 }
 0x3ae   : > { %5012 = vmatprep.mubr.f32.mxu1 %v12166_v7 }
 0x3af   : > { %7643 = vmatmul.mubr.msk.f32.gmra.mrb[30].mxu0 %vm3129_vm9, %v11347_v8 }
 0x3b0   : > { %5269 = vmatprep.mubr.f32.mxu0 %v12166_v7 }
 0x3b1   : > { %7628 = vmatmul.mubr.msk.f32.gmra.mrb[28].mxu1 %vm3129_vm9, %v11184_v14  ;;  %v11505_v14 = vld [vmem:[%s12017_s1 + $0x370] sm:$0xff] }
 0x3b2   : > { %5018 = vmatprep.mubr.f32.mxu1 %v12166_v7 }
 0x3b3   : > { %7644 = vmatmul.mubr.msk.f32.gmra.mrb[32].mxu0 %vm3129_vm9, %v11358_v0 }
 0x3b4   : > { %5275 = vmatprep.mubr.f32.mxu0 %v12166_v7 }
 0x3b5   : > { %7629 = vmatmul.mubr.msk.f32.gmra.mrb[30].mxu1 %vm3129_vm9, %v11195_v59  ;;  %v11516_v59 = vld [vmem:[%s12017_s1 + $0x378] sm:$0xff] }
 0x3b6   : > { %5024 = vmatprep.mubr.f32.mxu1 %v12166_v7 }
 0x3b7   : > { %7645 = vmatmul.mubr.msk.f32.gmra.mrb[34].mxu0 %vm3129_vm9, %v11369_v55 }
 0x3b8   : > { %5281 = vmatprep.mubr.f32.mxu0 %v12166_v7 }
 0x3b9   : > { %7630 = vmatmul.mubr.msk.f32.gmra.mrb[32].mxu1 %vm3129_vm9, %v11206_v51  ;;  %v11527_v51 = vld [vmem:[%s12017_s1 + $0x380] sm:$0xff] }
 0x3ba   : > { %5030 = vmatprep.mubr.f32.mxu1 %v12166_v7 }
 0x3bb   : > { %7646 = vmatmul.mubr.msk.f32.gmra.mrb[36].mxu0 %vm3129_vm9, %v11380_v38 }
 0x3bc   : > { %5287 = vmatprep.mubr.f32.mxu0 %v12166_v7 }
 0x3bd   : > { %7631 = vmatmul.mubr.msk.f32.gmra.mrb[34].mxu1 %vm3129_vm9, %v11217_v47  ;;  %v11538_v47 = vld [vmem:[%s12017_s1 + $0x388] sm:$0xff] }
 0x3be   : > { %5036 = vmatprep.mubr.f32.mxu1 %v12166_v7 }
 0x3bf   : > { %7647 = vmatmul.mubr.msk.f32.gmra.mrb[38].mxu0 %vm3129_vm9, %v11391_v43 }
 0x3c0   : > { %5293 = vmatprep.mubr.f32.mxu0 %v12166_v7 }
 0x3c1   : > { %7632 = vmatmul.mubr.msk.f32.gmra.mrb[36].mxu1 %vm3129_vm9, %v11228_v49  ;;  %v11549_v49 = vld [vmem:[%s12017_s1 + $0x390] sm:$0xff] }
 0x3c2   : > { %5042 = vmatprep.mubr.f32.mxu1 %v12166_v7 }
 0x3c3   : > { %7648 = vmatmul.mubr.msk.f32.gmra.mrb[40].mxu0 %vm3129_vm9, %v11402_v15 }
 0x3c4   : > { %5299 = vmatprep.mubr.f32.mxu0 %v12166_v7 }
 0x3c5   : > { %7633 = vmatmul.mubr.msk.f32.gmra.mrb[38].mxu1 %vm3129_vm9, %v11239_v58  ;;  %v11560_v58 = vld [vmem:[%s12017_s1 + $0x398] sm:$0xff] }
 0x3c6   : > { %5048 = vmatprep.mubr.f32.mxu1 %v12166_v7 }
 0x3c7   : > { %7649 = vmatmul.mubr.msk.f32.gmra.mrb[42].mxu0 %vm3129_vm9, %v11413_v62 }
 0x3c8   : > { %5655 = vmatprep.mubr.f32.mxu0 %v12166_v7 }
 0x3c9   : > { %7634 = vmatmul.mubr.msk.f32.gmra.mrb[40].mxu1 %vm3129_vm9, %v11250_v4  ;;  %v11571_v4 = vld [vmem:[%s12017_s1 + $0x3a0] sm:$0xff] }
 0x3ca   : > { %5054 = vmatprep.mubr.f32.mxu1 %v12166_v7 }
 0x3cb   : > { %7674 = vmatmul.mubr.msk.f32.vlgmr.msra.gmra.mrb[20].mxu0 %vm3129_vm9, %v11424_v44 }
 0x3cc   : > { %7898 = vmatpush1.bf16.msk.msra.mxu0 %vm9961_vm11, %v12259_v27  ;;  %5661 = vmatprep.mubr.f32.mxu0 %v12166_v7  ;;  %v12264_v27 = vld [vmem:[#allocation9_spill] sm:$0xff] }
 0x3cd   : > { %7635 = vmatmul.mubr.msk.f32.gmra.mrb[42].mxu1 %vm3129_vm9, %v11261_v39  ;;  %v5914_v39 = vld [vmem:[%s12017_s1 + $0x3a8] sm:$0xff] }
 0x3ce   : > { %5370 = vmatprep.mubr.f32.mxu1 %v12166_v7 }
 0x3cf   : > { %7675 = vmatmul.mubr.msk.f32.gmra.mrb[22].mxu0 %vm3129_vm9, %v11440_v48 }
 0x3d0   : > { %5667 = vmatprep.mubr.f32.mxu0 %v12166_v7 }
 0x3d1   : > { %7652 = vmatmul.mubr.msk.f32.vlgmr.msra.gmra.mrb[20].mxu1 %vm3129_vm9, %v11272_v36  ;;  %v5915_v36 = vld [vmem:[%s12017_s1 + $0x3b0] sm:$0xff] }
 0x3d2   : > { %7892 = vmatpush1.bf16.msk.msra.mxu1 %vm9961_vm11, %v7890_v31  ;;  %5376 = vmatprep.mubr.f32.mxu1 %v12166_v7  ;;  %v11494_v31 = vld [vmem:[%s12017_s1 + $0x368] sm:$0xff] }
 0x3d3   : > { %7901 = vmatprep.subr.msk.bf16.mxu1 %vm9961_vm11, %v12262_v34  ;;  %7676 = vmatmul.mubr.msk.f32.gmra.mrb[24].mxu0 %vm3129_vm9, %v11451_v63 }
 0x3d4   : > { %5673 = vmatprep.mubr.f32.mxu0 %v12166_v7 }
 0x3d5   : > { %7653 = vmatmul.mubr.msk.f32.gmra.mrb[22].mxu1 %vm3129_vm9, %v11288_v17  ;;  %v5923_v17 = vld [vmem:[%s12017_s1 + $0x3f0] sm:$0xff] }
 0x3d6   : > { %5382 = vmatprep.mubr.f32.mxu1 %v12166_v7 }
 0x3d7   : > { %7677 = vmatmul.mubr.msk.f32.gmra.mrb[26].mxu0 %vm3129_vm9, %v11472_v18 }
 0x3d8   : > { %5679 = vmatprep.mubr.f32.mxu0 %v12166_v7 }
 0x3d9   : > { %7654 = vmatmul.mubr.msk.f32.gmra.mrb[24].mxu1 %vm3129_vm9, %v11304_v29  ;;  %v12263_v29 = vld [vmem:[#allocation8_spill] sm:$0xff] }
 0x3da   : > { %5388 = vmatprep.mubr.f32.mxu1 %v12166_v7 }
 0x3db   : > { %7678 = vmatmul.mubr.msk.f32.gmra.mrb[28].mxu0 %vm3129_vm9, %v11483_v22 }
 0x3dc   : > { %5685 = vmatprep.mubr.f32.mxu0 %v12166_v7 }
 0x3dd   : > { %7655 = vmatmul.mubr.msk.f32.gmra.mrb[26].mxu1 %vm3129_vm9, %v11325_v50 }
 0x3de   : > { %5394 = vmatprep.mubr.f32.mxu1 %v12166_v7 }
 0x3df   : > { %7679 = vmatmul.mubr.msk.f32.gmra.mrb[30].mxu0 %vm3129_vm9, %v11494_v31 }
 0x3e0   : > { %5691 = vmatprep.mubr.f32.mxu0 %v12166_v7 }
 0x3e1   : > { %7656 = vmatmul.mubr.msk.f32.gmra.mrb[28].mxu1 %vm3129_vm9, %v11336_v1 }
 0x3e2   : > { %5400 = vmatprep.mubr.f32.mxu1 %v12166_v7 }
 0x3e3   : > { %7680 = vmatmul.mubr.msk.f32.gmra.mrb[32].mxu0 %vm3129_vm9, %v11505_v14 }
 0x3e4   : > { %5697 = vmatprep.mubr.f32.mxu0 %v12166_v7 }
 0x3e5   : > { %7657 = vmatmul.mubr.msk.f32.gmra.mrb[30].mxu1 %vm3129_vm9, %v11347_v8 }
 0x3e6   : > { %5406 = vmatprep.mubr.f32.mxu1 %v12166_v7 }
 0x3e7   : > { %7681 = vmatmul.mubr.msk.f32.gmra.mrb[34].mxu0 %vm3129_vm9, %v11516_v59 }
 0x3e8   : > { %5703 = vmatprep.mubr.f32.mxu0 %v12166_v7 }
 0x3e9   : > { %7658 = vmatmul.mubr.msk.f32.gmra.mrb[32].mxu1 %vm3129_vm9, %v11358_v0 }
 0x3ea   : > { %5412 = vmatprep.mubr.f32.mxu1 %v12166_v7 }
 0x3eb   : > { %7682 = vmatmul.mubr.msk.f32.gmra.mrb[36].mxu0 %vm3129_vm9, %v11527_v51 }
 0x3ec   : > { %5709 = vmatprep.mubr.f32.mxu0 %v12166_v7 }
 0x3ed   : > { %7659 = vmatmul.mubr.msk.f32.gmra.mrb[34].mxu1 %vm3129_vm9, %v11369_v55 }
 0x3ee   : > { %5418 = vmatprep.mubr.f32.mxu1 %v12166_v7 }
 0x3ef   : > { %7683 = vmatmul.mubr.msk.f32.gmra.mrb[38].mxu0 %vm3129_vm9, %v11538_v47 }
 0x3f0   : > { %5715 = vmatprep.mubr.f32.mxu0 %v12166_v7 }
 0x3f1   : > { %7660 = vmatmul.mubr.msk.f32.gmra.mrb[36].mxu1 %vm3129_vm9, %v11380_v38 }
 0x3f2   : > { %5424 = vmatprep.mubr.f32.mxu1 %v12166_v7 }
 0x3f3   : > { %7684 = vmatmul.mubr.msk.f32.gmra.mrb[40].mxu0 %vm3129_vm9, %v11549_v49 }
 0x3f4   : > { %5721 = vmatprep.mubr.f32.mxu0 %v12166_v7 }
 0x3f5   : > { %7661 = vmatmul.mubr.msk.f32.gmra.mrb[38].mxu1 %vm3129_vm9, %v11391_v43 }
 0x3f6   : > { %5430 = vmatprep.mubr.f32.mxu1 %v12166_v7 }
 0x3f7   : > { %7685 = vmatmul.mubr.msk.f32.gmra.mrb[42].mxu0 %vm3129_vm9, %v11560_v58 }
 0x3f8   : > { %6037 = vmatprep.mubr.f32.mxu0 %v12166_v7 }
 0x3f9   : > { %7662 = vmatmul.mubr.msk.f32.gmra.mrb[40].mxu1 %vm3129_vm9, %v11402_v15 }
 0x3fa   : > { %5436 = vmatprep.mubr.f32.mxu1 %v12166_v7 }
 0x3fb   : > { %7702 = vmatmul.mubr.msk.f32.vlgmr.msra.gmra.mrb[20].mxu0 %vm3129_vm9, %v11571_v4 }
 0x3fc   : > { %6043 = vmatprep.mubr.f32.mxu0 %v12166_v7 }
 0x3fd   : > { %7663 = vmatmul.mubr.msk.f32.gmra.mrb[42].mxu1 %vm3129_vm9, %v11413_v62 }
 0x3fe   : > { %5792 = vmatprep.mubr.f32.mxu1 %v12166_v7 }
 0x3ff   : > { %7703 = vmatmul.mubr.msk.f32.gmra.mrb[22].mxu0 %vm3129_vm9, %v5914_v39 }
 0x400   : > { %6049 = vmatprep.mubr.f32.mxu0 %v12166_v7 }
 0x401   : > { %7688 = vmatmul.mubr.msk.f32.vlgmr.msra.gmra.mrb[20].mxu1 %vm3129_vm9, %v11424_v44 }
 0x402   : > { %7904 = vmatpush1.bf16.msk.msra.mxu1 %vm9961_vm11, %v7902_v24  ;;  %5798 = vmatprep.mubr.f32.mxu1 %v12166_v7  ;;  %v5920_v24 = vld [vmem:[%s12017_s1 + $0x3d8] sm:$0xff]  ;;  %vm6357_vm11 = vcmask 785408  }
 0x403   : > { %7704 = vmatmul.mubr.msk.f32.gmra.mrb[24].mxu0 %vm3129_vm9, %v5915_v36 }
 0x404   : > { %6055 = vmatprep.mubr.f32.mxu0 %v12166_v7 }
 0x405   : > { %7689 = vmatmul.mubr.msk.f32.gmra.mrb[22].mxu1 %vm3129_vm9, %v11440_v48 }
 0x406   : > { %5804 = vmatprep.mubr.f32.mxu1 %v12166_v7 }
 0x407   : > { %7705 = vmatmul.mubr.msk.f32.gmra.mrb[26].mxu0 %vm3129_vm9, %v5916_v23 }
 0x408   : > { %6061 = vmatprep.mubr.f32.mxu0 %v12166_v7 }
 0x409   : > { %7690 = vmatmul.mubr.msk.f32.gmra.mrb[24].mxu1 %vm3129_vm9, %v11451_v63  ;;  %v11710_v63 = vpop.permute.xlu0 %2764 }
 0x40a   : > { %5810 = vmatprep.mubr.f32.mxu1 %v12166_v7 }
 0x40b   : > { %7706 = vmatmul.mubr.msk.f32.gmra.mrb[28].mxu0 %vm3129_vm9, %v5917_v10 }
 0x40c   : > { %6067 = vmatprep.mubr.f32.mxu0 %v12166_v7 }
 0x40d   : > { %7691 = vmatmul.mubr.msk.f32.gmra.mrb[26].mxu1 %vm3129_vm9, %v11472_v18 }
 0x40e   : > { %5816 = vmatprep.mubr.f32.mxu1 %v12166_v7 }
 0x40f   : > { %7707 = vmatmul.mubr.msk.f32.gmra.mrb[30].mxu0 %vm3129_vm9, %v5918_v57 }
 0x410   : > { %6073 = vmatprep.mubr.f32.mxu0 %v12166_v7 }
 0x411   : > { %7692 = vmatmul.mubr.msk.f32.gmra.mrb[28].mxu1 %vm3129_vm9, %v11483_v22 }
 0x412   : > { %5822 = vmatprep.mubr.f32.mxu1 %v12166_v7 }
 0x413   : > { %7708 = vmatmul.mubr.msk.f32.gmra.mrb[32].mxu0 %vm3129_vm9, %v5919_v61 }
 0x414   : > { %6079 = vmatprep.mubr.f32.mxu0 %v12166_v7 }
 0x415   : > { %7693 = vmatmul.mubr.msk.f32.gmra.mrb[30].mxu1 %vm3129_vm9, %v11494_v31 }
 0x416   : > { %5828 = vmatprep.mubr.f32.mxu1 %v12166_v7 }
 0x417   : > { %7709 = vmatmul.mubr.msk.f32.gmra.mrb[34].mxu0 %vm3129_vm9, %v5920_v24 }
 0x418   : > { %6085 = vmatprep.mubr.f32.mxu0 %v12166_v7 }
 0x419   : > { %7694 = vmatmul.mubr.msk.f32.gmra.mrb[32].mxu1 %vm3129_vm9, %v11505_v14 }
 0x41a   : > { %5834 = vmatprep.mubr.f32.mxu1 %v12166_v7 }
 0x41b   : > { %7710 = vmatmul.mubr.msk.f32.gmra.mrb[36].mxu0 %vm3129_vm9, %v5921_v30 }
 0x41c   : > { %6091 = vmatprep.mubr.f32.mxu0 %v12166_v7 }
 0x41d   : > { %7695 = vmatmul.mubr.msk.f32.gmra.mrb[34].mxu1 %vm3129_vm9, %v11516_v59 }
 0x41e   : > { %5840 = vmatprep.mubr.f32.mxu1 %v12166_v7 }
 0x41f   : > { %7711 = vmatmul.mubr.msk.f32.gmra.mrb[38].mxu0 %vm3129_vm9, %v5922_v42 }
 0x420   : > { %6097 = vmatprep.mubr.f32.mxu0 %v12166_v7 }
 0x421   : > { %7696 = vmatmul.mubr.msk.f32.gmra.mrb[36].mxu1 %vm3129_vm9, %v11527_v51 }
 0x422   : > { %5846 = vmatprep.mubr.f32.mxu1 %v12166_v7 }
 0x423   : > { %7712 = vmatmul.mubr.msk.f32.gmra.mrb[40].mxu0 %vm3129_vm9, %v5923_v17 }
 0x424   : > { %6103 = vmatprep.mubr.f32.mxu0 %v12166_v7 }
 0x425   : > { %7697 = vmatmul.mubr.msk.f32.gmra.mrb[38].mxu1 %vm3129_vm9, %v11538_v47 }
 0x426   : > { %5852 = vmatprep.mubr.f32.mxu1 %v12166_v7 }
 0x427   : > { %7713 = vmatmul.mubr.msk.f32.gmra.mrb[42].mxu0 %vm3129_vm9, %v5924_v56 }
 0x428   : > { %6428 = vmatprep.mubr.f32.mxu0 %v12166_v7 }
 0x429   : > { %7698 = vmatmul.mubr.msk.f32.gmra.mrb[40].mxu1 %vm3129_vm9, %v11549_v49 }
 0x42a   : > { %5858 = vmatprep.mubr.f32.mxu1 %v12166_v7 }
 0x42d   : > { %7699 = vmatmul.mubr.msk.f32.gmra.mrb[42].mxu1 %vm3129_vm9, %v11560_v58 }
 0x42e   : > { %6174 = vmatprep.mubr.f32.mxu1 %v12166_v7 }
 0x431   : > { %7716 = vmatmul.mubr.msk.f32.vlgmr.msra.gmra.mrb[20].mxu1 %vm3129_vm9, %v11571_v4 }
 0x432   : > { %6180 = vmatprep.mubr.f32.mxu1 %v12166_v7 }
 0x435   : > { %7717 = vmatmul.mubr.msk.f32.gmra.mrb[22].mxu1 %vm3129_vm9, %v5914_v39  ;;  %v12265_v39 = vld [vmem:[#allocation25_spill] sm:$0xff] }
 0x436   : > { %6186 = vmatprep.mubr.f32.mxu1 %v12166_v7 }
 0x439   : > { %7718 = vmatmul.mubr.msk.f32.gmra.mrb[24].mxu1 %vm3129_vm9, %v5915_v36  ;;  %v6539_v36 = vmul.f32 16.0, %v12265_v39 }
 0x43a   : > { %6192 = vmatprep.mubr.f32.mxu1 %v12166_v7 }
 0x43d   : > { %7719 = vmatmul.mubr.msk.f32.gmra.mrb[26].mxu1 %vm3129_vm9, %v5916_v23  ;;  %v12266_v23 = vld [vmem:[#allocation11_spill] sm:$0xff] }
 0x43e   : > { %6198 = vmatprep.mubr.f32.mxu1 %v12166_v7 }
 0x441   : > { %7720 = vmatmul.mubr.msk.f32.gmra.mrb[28].mxu1 %vm3129_vm9, %v5917_v10 }
 0x442   : > { %6204 = vmatprep.mubr.f32.mxu1 %v12166_v7 }
 0x445   : > { %7721 = vmatmul.mubr.msk.f32.gmra.mrb[30].mxu1 %vm3129_vm9, %v5918_v57  ;;  %v11717_v57 = vpop.permute.xlu0 %2774 }
 0x446   : > { %6210 = vmatprep.mubr.f32.mxu1 %v12166_v7 }
 0x449   : > { %7722 = vmatmul.mubr.msk.f32.gmra.mrb[32].mxu1 %vm3129_vm9, %v5919_v61 }
 0x44a   : > { %6216 = vmatprep.mubr.f32.mxu1 %v12166_v7 }
 0x44d   : > { %7723 = vmatmul.mubr.msk.f32.gmra.mrb[34].mxu1 %vm3129_vm9, %v5920_v24 }
 0x44e   : > { %6222 = vmatprep.mubr.f32.mxu1 %v12166_v7 }
 0x451   : > { %7724 = vmatmul.mubr.msk.f32.gmra.mrb[36].mxu1 %vm3129_vm9, %v5921_v30 }
 0x452   : > { %6228 = vmatprep.mubr.f32.mxu1 %v12166_v7 }
 0x455   : > { %7725 = vmatmul.mubr.msk.f32.gmra.mrb[38].mxu1 %vm3129_vm9, %v5922_v42 }
 0x456   : > { %6234 = vmatprep.mubr.f32.mxu1 %v12166_v7 }
 0x459   : > { %7726 = vmatmul.mubr.msk.f32.gmra.mrb[40].mxu1 %vm3129_vm9, %v5923_v17  ;;  %v6538_v17 = vmul.f32 16.0, %v10584_v60 }
 0x45a   : > { %6240 = vmatprep.mubr.f32.mxu1 %v12166_v7 }
 0x45d   : > { %7727 = vmatmul.mubr.msk.f32.gmra.mrb[42].mxu1 %vm3129_vm9, %v5924_v56  ;;  %vm7222_vm9 = vcmask 1046528  }
 0x45e   : > { %6505 = vmatprep.mubr.f32.mxu1 %v12166_v7 }
 0x4ce   : > { %v6039_v28 = vpop.f32.mrb[20].mxu0 }
 0x4cf   : > { %v6041_v46 = vpop.f32.mrb[21].mxu0  ;;  %v7961_v33 = vadd.f32 %v6039_v28, %v12263_v29  ;;  %v7733_v28 = vadd.f32 -0.5, %v6539_v36 }
 0x4d0   : > { %v7962_v13 = vadd.f32 %v6041_v46, %v12263_v29 }
 0x4d1   : > { %v6295_v55 = vmax.f32 %v7961_v33, 0.0 }
 0x4d2   : > { %v6045_v50 = vpop.f32.mrb[22].mxu0  ;;  %v6296_v43 = vmax.f32 %v7962_v13, 0.0 }
 0x4d3   : > { %v7963_v1 = vadd.f32 %v6045_v50, %v11704_v26  ;;  %v6047_v8 = vpop.f32.mrb[23].mxu0 }
 0x4d4   : > { %v7964_v0 = vadd.f32 %v6047_v8, %v11704_v26 }
 0x4d5   : > { %v6299_v38 = vmax.f32 %v7963_v1, 0.0 }
 0x4d6   : > { %v6300_v15 = vmax.f32 %v7964_v0, 0.0  ;;  %v6051_v62 = vpop.f32.mrb[24].mxu0 }
 0x4d7   : > { %v7907_v44 = vpack.c.bf16 %v6299_v38, %v6295_v55  ;;  %v6053_v37 = vpop.f32.mrb[25].mxu0  ;;  %v7965_v48 = vadd.f32 %v6051_v62, %v12264_v27  ;;  %v7732_v55 = vadd.f32 -0.5, %v6538_v17 }
 0x4d8   : > { %v7905_v53 = vpack.c.bf16 %v6300_v15, %v6296_v43  ;;  %v7966_v54 = vadd.f32 %v6053_v37, %v12264_v27  ;;  %v6547_v43 = vmax.f32 %v7733_v28, 0.0  ;;  %v12267_v15 = vld [vmem:[#allocation12_spill] sm:$0xff] }
 0x4d9   : > { %v6303_v31 = vmax.f32 %v7965_v48, 0.0 }
 0x4da   : > { %v6057_v19 = vpop.f32.mrb[26].mxu0  ;;  %7906 = vmatprep.subr.bf16.mxu0 %v7905_v53  ;;  %v6304_v59 = vmax.f32 %v7966_v54, 0.0  ;;  %v12268_v53 = vld [vmem:[#allocation55_spill] sm:$0xff] }
 0x4db   : > { %v7967_v34 = vadd.f32 %v6057_v19, %v11710_v63  ;;  %v6059_v18 = vpop.f32.mrb[27].mxu0  ;;  %7908 = vmatpush1.bf16.msra.mxu0 %v7907_v44  ;;  %v11724_v44 = vpop.permute.xlu0 %2784  ;;  %v6556_v48 = vadd.s32 8, %v12268_v53 }
 0x4dc   : > { %v7968_v22 = vadd.f32 %v6059_v18, %v11710_v63 }
 0x4dd   : > { %v6307_v14 = vmax.f32 %v7967_v34, 0.0  ;;  %v6546_v34 = vmax.f32 %v7732_v55, 0.0 }
 0x4de   : > { %v6308_v51 = vmax.f32 %v7968_v22, 0.0  ;;  %v6063_v47 = vpop.f32.mrb[28].mxu0  ;;  %v6551_v22 = vmin.f32 %v6547_v43, 15.0 }
 0x4df   : > { %v7911_v49 = vpack.c.bf16 %v6307_v14, %v6303_v31  ;;  %v6065_v58 = vpop.f32.mrb[29].mxu0  ;;  %v7969_v10 = vadd.f32 %v6063_v47, %v12266_v23  ;;  %v6550_v36 = vmin.f32 %v6546_v34, 15.0  ;;  %v11738_v17 = vpop.permute.xlu0 %2794 }
 0x4e0   : > { %v7909_v4 = vpack.c.bf16 %v6308_v51, %v6304_v59  ;;  %v7970_v61 = vadd.f32 %v6065_v58, %v12266_v23  ;;  %v11733_v58 = vcvt.s32.f32 %v6556_v48 }
 0x4e1   : > { %v6311_v46 = vmax.f32 %v7969_v10, 0.0 }
 0x4e2   : > { %v6069_v24 = vpop.f32.mrb[30].mxu0  ;;  %7910 = vmatprep.subr.bf16.mxu0 %v7909_v4  ;;  %v6312_v13 = vmax.f32 %v7970_v61, 0.0 }
 0x4e3   : > { %v7971_v30 = vadd.f32 %v6069_v24, %v11717_v57  ;;  %v6071_v42 = vpop.f32.mrb[31].mxu0  ;;  %7912 = vmatpush1.bf16.msra.mxu0 %v7911_v49  ;;  %v11731_v49 = vcvt.s32.f32 %v12268_v53  ;;  %v6564_v24 = vsub.f32 %v6551_v22, %v11733_v58 }
 0x4e4   : > { %v7972_v56 = vadd.f32 %v6071_v42, %v11717_v57 }
 0x4e5   : > { %v6315_v33 = vmax.f32 %v7971_v30, 0.0  ;;  %v6560_v61 = vsub.f32 %v6551_v22, %v11731_v49  ;;  %v12269_v30 = vld [vmem:[#allocation13_spill] sm:$0xff]  ;;  %v12270_v22 = vld [vmem:[#allocation15_spill] sm:$0xff] }
 0x4e6   : > { %v6316_v50 = vmax.f32 %v7972_v56, 0.0  ;;  %v6075_v1 = vpop.f32.mrb[32].mxu0 }
 0x4e7   : > { %v7915_v8 = vpack.c.bf16 %v6315_v33, %v6311_v46  ;;  %v6077_v0 = vpop.f32.mrb[33].mxu0  ;;  %v7973_v62 = vadd.f32 %v6075_v1, %v12267_v15 }
 0x4e8   : > { %v7913_v38 = vpack.c.bf16 %v6316_v50, %v6312_v13  ;;  %v7974_v37 = vadd.f32 %v6077_v0, %v12267_v15  ;;  %v6559_v13 = vsub.f32 %v6550_v36, %v11731_v49  ;;  %v6563_v50 = vsub.f32 %v6550_v36, %v11733_v58 }
 0x4e9   : > { %v6319_v31 = vmax.f32 %v7973_v62, 0.0  ;;  %v6572_v0 = vand.u32 2147483647, %v6564_v24 }
 0x4ea   : > { %v6081_v60 = vpop.f32.mrb[34].mxu0  ;;  %7914 = vmatprep.subr.bf16.mxu0 %v7913_v38  ;;  %v6320_v59 = vmax.f32 %v7974_v37, 0.0  ;;  %v6567_v48 = vand.u32 2147483647, %v6559_v13 }
 0x4eb   : > { %v7975_v54 = vadd.f32 %v6081_v60, %v11724_v44  ;;  %v6083_v19 = vpop.f32.mrb[35].mxu0  ;;  %7916 = vmatpush1.bf16.msra.mxu0 %v7915_v8  ;;  %v6568_v8 = vand.u32 2147483647, %v6560_v61 }
 0x4ec   : > { %v7976_v18 = vadd.f32 %v6083_v19, %v11724_v44 }
 0x4ed   : > { %v6323_v14 = vmax.f32 %v7975_v54, 0.0  ;;  %v6571_v54 = vand.u32 2147483647, %v6563_v50  ;;  %v6576_v34 = vsub.f32 1.0, %v6568_v8 }
 0x4ee   : > { %v6324_v51 = vmax.f32 %v7976_v18, 0.0  ;;  %v6087_v47 = vpop.f32.mrb[36].mxu0  ;;  %v6580_v18 = vsub.f32 1.0, %v6572_v0  ;;  %v11754_v0 = vld [vmem:[%s12017_s1 + $0x460] sm:$0xff] }
 0x4ef   : > { %v7919_v4 = vpack.c.bf16 %v6323_v14, %v6319_v31  ;;  %v6089_v39 = vpop.f32.mrb[37].mxu0  ;;  %v7977_v42 = vadd.f32 %v6087_v47, %v12269_v30  ;;  %v11746_v14 = vpop.permute.xlu0 %2804  ;;  %v6579_v36 = vsub.f32 1.0, %v6571_v54  ;;  %v6584_v61 = vmax.f32 %v6576_v34, 0.0 }
 0x4f0   : > { %v7917_v10 = vpack.c.bf16 %v6324_v51, %v6320_v59  ;;  %v7978_v56 = vadd.f32 %v6089_v39, %v12269_v30  ;;  %v6575_v39 = vsub.f32 1.0, %v6567_v48  ;;  %v6588_v24 = vmax.f32 %v6580_v18, 0.0 }
 0x4f1   : > { %v6327_v55 = vmax.f32 %v7977_v42, 0.0  ;;  %v6587_v50 = vmax.f32 %v6579_v36, 0.0  ;;  %v11783_v36 = vld [vmem:[%s12017_s1 + $0x488] sm:$0xff] }
 0x4f2   : > { %v6093_v28 = vpop.f32.mrb[38].mxu0  ;;  %7918 = vmatprep.subr.bf16.mxu0 %v7917_v10  ;;  %v6328_v43 = vmax.f32 %v7978_v56, 0.0  ;;  %v6583_v13 = vmax.f32 %v6575_v39, 0.0  ;;  %v7953_v8 = vpack.c.bf16 %v6588_v24, %v6584_v61 }
 0x4f3   : > { %v7979_v46 = vadd.f32 %v6093_v28, %v11738_v17  ;;  %v6095_v33 = vpop.f32.mrb[39].mxu0  ;;  %7920 = vmatpush1.bf16.msra.mxu0 %v7919_v4 }
 0x4f4   : > { %v7980_v1 = vadd.f32 %v6095_v33, %v11738_v17 }
 0x4f5   : > { %v6331_v38 = vmax.f32 %v7979_v46, 0.0 }
 0x4f6   : > { %v6332_v62 = vmax.f32 %v7980_v1, 0.0  ;;  %v6099_v37 = vpop.f32.mrb[40].mxu0 }
 0x4f7   : > { %v7923_v60 = vpack.c.bf16 %v6331_v38, %v6327_v55  ;;  %v6101_v53 = vpop.f32.mrb[41].mxu0  ;;  %v7981_v31 = vadd.f32 %v6099_v37, %v12270_v22  ;;  %v7955_v55 = vpack.c.bf16 %v6587_v50, %v6583_v13  ;;  %v11763_v37 = vld [vmem:[%s12017_s1 + $0x468] sm:$0x1] }
 0x4f8   : > { %v7921_v19 = vpack.c.bf16 %v6332_v62, %v6328_v43  ;;  %v7982_v59 = vadd.f32 %v6101_v53, %v12270_v22 }
 0x4f9   : > { %v6335_v42 = vmax.f32 %v7981_v31, 0.0  ;;  %v11774_v31 = vld [vmem:[%s12017_s1 + $0x480] sm:$0xff] }
 0x4fa   : > { %v6105_v51 = vpop.f32.mrb[42].mxu0  ;;  %7922 = vmatprep.subr.bf16.mxu0 %v7921_v19  ;;  %v6336_v28 = vmax.f32 %v7982_v59, 0.0 }
 0x4fb   : > { %v7983_v47 = vadd.f32 %v6105_v51, %v11746_v14  ;;  %v6107_v4 = vpop.f32.mrb[43].mxu0  ;;  %7924 = vmatpush1.bf16.msra.mxu0 %v7923_v60 }
 0x4fc   : > { %v7984_v10 = vadd.f32 %v6107_v4, %v11746_v14 }
 0x4fd   : > { %v6339_v56 = vmax.f32 %v7983_v47, 0.0 }
 0x4fe   : > { %v6340_v46 = vmax.f32 %v7984_v10, 0.0 }
 0x4ff   : > { %v7927_v33 = vpack.c.bf16 %v6339_v56, %v6335_v42 }
 0x500   : > { %v7925_v1 = vpack.c.bf16 %v6340_v46, %v6336_v28 }
 0x502   : > { %7926 = vmatprep.subr.bf16.mxu0 %v7925_v1 }
 0x503   : > { %7928 = vmatpush1.bf16.msra.mxu0 %v7927_v33  ;;  %v11794_v33 = vld [vmem:[%s12017_s1 + $0x490] sm:$0xff] }
 0x504   : > { %v6176_v38 = vpop.f32.mrb[20].mxu1  ;;  %7954 = vmatprep.subr.bf16.mxu0 %v7953_v8 }
 0x505   : > { %v6178_v43 = vpop.f32.mrb[21].mxu1  ;;  %v7985_v62 = vadd.f32 %v6176_v38, %v12263_v29  ;;  %v12271_v38 = vld [vmem:[#allocation5_spill] sm:$0xff] }
 0x506   : > { %7728 = vmatmul.mubr.msk.f32.vlgmr.msra.gmra.mrb[44].mxu0 %vm6357_vm11, %v11754_v0  ;;  %v7986_v60 = vadd.f32 %v6178_v43, %v12263_v29 }
 0x507   : > { %6434 = vmatprep.mubr.f32.mxu0 %v12166_v7  ;;  %7956 = vmatpush1.bf16.msra.mxu0 %v7955_v55  ;;  %v6297_v34 = vmax.f32 %v7985_v62, 0.0  ;;  %v11804_v62 = vld [vmem:[%s12017_s1 + $0x498] sm:$0xff] }
 0x508   : > { %v6182_v53 = vpop.f32.mrb[22].mxu1  ;;  %v6298_v59 = vmax.f32 %v7986_v60, 0.0 }
 0x509   : > { %v7987_v48 = vadd.f32 %v6182_v53, %v11704_v26  ;;  %v6184_v54 = vpop.f32.mrb[23].mxu1 }
 0x50a   : > { %v7988_v19 = vadd.f32 %v6184_v54, %v11704_v26  ;;  %7729 = vmatmul.mubr.msk.f32.gmra.mrb[46].mxu0 %vm6357_vm11, %v11763_v37 }
 0x50b   : > { %v6301_v18 = vmax.f32 %v7987_v48, 0.0  ;;  %6735 = vmatprep.mubr.f32.mxu0 %v12166_v7 }
 0x50c   : > { %v6302_v29 = vmax.f32 %v7988_v19, 0.0  ;;  %v6188_v51 = vpop.f32.mrb[24].mxu1  ;;  %v6540_v19 = vmul.f32 16.0, %v10586_v2 }
 0x50d   : > { %v7931_v47 = vpack.c.bf16 %v6301_v18, %v6297_v34  ;;  %v6190_v4 = vpop.f32.mrb[25].mxu1  ;;  %v7989_v26 = vadd.f32 %v6188_v51, %v12264_v27 }
 0x50e   : > { %v7929_v39 = vpack.c.bf16 %v6302_v29, %v6298_v59  ;;  %7740 = vmatmul.mubr.msk.f32.vlgmr.msra.gmra.mrb[48].mxu0 %vm363_vm0, %v11774_v31  ;;  %v7990_v10 = vadd.f32 %v6190_v4, %v12264_v27 }
 0x50f   : > { %6741 = vmatprep.mubr.f32.mxu0 %v12166_v7  ;;  %v6305_v28 = vmax.f32 %v7989_v26, 0.0  ;;  %v7734_v26 = vadd.f32 -0.5, %v6540_v19 }
 0x510   : > { %v6194_v61 = vpop.f32.mrb[26].mxu1  ;;  %7930 = vmatprep.subr.bf16.mxu1 %v7929_v39  ;;  %v6306_v27 = vmax.f32 %v7990_v10, 0.0 }
 0x511   : > { %v7991_v24 = vadd.f32 %v6194_v61, %v11710_v63  ;;  %v6196_v42 = vpop.f32.mrb[27].mxu1  ;;  %7932 = vmatpush1.bf16.msra.mxu1 %v7931_v47 }
 0x512   : > { %v7992_v56 = vadd.f32 %v6196_v42, %v11710_v63  ;;  %7741 = vmatmul.mubr.msk.f32.gmra.mrb[50].mxu0 %vm363_vm0, %v11783_v36  ;;  %v6541_v63 = vmul.f32 16.0, %v12271_v38 }
 0x513   : > { %v6309_v46 = vmax.f32 %v7991_v24, 0.0  ;;  %6747 = vmatprep.mubr.f32.mxu0 %v12166_v7 }
 0x514   : > { %v6310_v13 = vmax.f32 %v7992_v56, 0.0  ;;  %v6200_v50 = vpop.f32.mrb[28].mxu1  ;;  %v7735_v18 = vadd.f32 -0.5, %v6541_v63 }
 0x515   : > { %v7935_v1 = vpack.c.bf16 %v6309_v46, %v6305_v28  ;;  %v6202_v8 = vpop.f32.mrb[29].mxu1  ;;  %v7993_v43 = vadd.f32 %v6200_v50, %v12266_v23  ;;  %v6548_v28 = vmax.f32 %v7734_v26, 0.0 }
 0x516   : > { %v7933_v55 = vpack.c.bf16 %v6310_v13, %v6306_v27  ;;  %7742 = vmatmul.mubr.msk.f32.gmra.mrb[52].mxu0 %vm363_vm0, %v11794_v33  ;;  %v7994_v60 = vadd.f32 %v6202_v8, %v12266_v23  ;;  %v6549_v61 = vmax.f32 %v7735_v18, 0.0 }
 0x517   : > { %6753 = vmatprep.mubr.f32.mxu0 %v12166_v7  ;;  %v6313_v59 = vmax.f32 %v7993_v43, 0.0  ;;  %v6552_v43 = vmin.f32 %v6548_v28, 15.0 }
 0x518   : > { %v6206_v53 = vpop.f32.mrb[30].mxu1  ;;  %7934 = vmatprep.subr.bf16.mxu1 %v7933_v55  ;;  %v6314_v51 = vmax.f32 %v7994_v60, 0.0  ;;  %v6553_v27 = vmin.f32 %v6549_v61, 15.0 }
 0x519   : > { %v7995_v48 = vadd.f32 %v6206_v53, %v11717_v57  ;;  %v6208_v54 = vpop.f32.mrb[31].mxu1  ;;  %7936 = vmatpush1.bf16.msra.mxu1 %v7935_v1  ;;  %v6561_v18 = vsub.f32 %v6552_v43, %v11731_v49 }
 0x51a   : > { %v7996_v34 = vadd.f32 %v6208_v54, %v11717_v57  ;;  %7743 = vmatmul.mubr.msk.f32.gmra.mrb[54].mxu0 %vm363_vm0, %v11804_v62  ;;  %v6566_v53 = vsub.f32 %v6553_v27, %v11733_v58 }
 0x51b   : > { %v6317_v29 = vmax.f32 %v7995_v48, 0.0 }
 0x51c   : > { %v6318_v47 = vmax.f32 %v7996_v34, 0.0  ;;  %v6212_v4 = vpop.f32.mrb[32].mxu1 }
 0x51d   : > { %v7939_v23 = vpack.c.bf16 %v6317_v29, %v6313_v59  ;;  %v6214_v39 = vpop.f32.mrb[33].mxu1  ;;  %v7997_v24 = vadd.f32 %v6212_v4, %v12267_v15  ;;  %v6565_v59 = vsub.f32 %v6552_v43, %v11733_v58 }
 0x51e   : > { %v7937_v10 = vpack.c.bf16 %v6318_v47, %v6314_v51  ;;  %v7998_v2 = vadd.f32 %v6214_v39, %v12267_v15  ;;  %v6562_v15 = vsub.f32 %v6553_v27, %v11731_v49  ;;  %v6574_v47 = vand.u32 2147483647, %v6566_v53 }
 0x51f   : > { %v6321_v13 = vmax.f32 %v7997_v24, 0.0  ;;  %v6569_v24 = vand.u32 2147483647, %v6561_v18 }
 0x520   : > { %v6218_v42 = vpop.f32.mrb[34].mxu1  ;;  %7938 = vmatprep.subr.bf16.mxu1 %v7937_v10  ;;  %v6322_v1 = vmax.f32 %v7998_v2, 0.0  ;;  %v6570_v51 = vand.u32 2147483647, %v6562_v15  ;;  %v6573_v2 = vand.u32 2147483647, %v6565_v59 }
 0x521   : > { %v7999_v57 = vadd.f32 %v6218_v42, %v11724_v44  ;;  %v6220_v56 = vpop.f32.mrb[35].mxu1  ;;  %7940 = vmatpush1.bf16.msra.mxu1 %v7939_v23 }
 0x522   : > { %v8000_v46 = vadd.f32 %v6220_v56, %v11724_v44  ;;  %v6582_v56 = vsub.f32 1.0, %v6574_v47 }
 0x523   : > { %v6325_v50 = vmax.f32 %v7999_v57, 0.0  ;;  %v6578_v57 = vsub.f32 1.0, %v6570_v51 }
 0x524   : > { %v6326_v8 = vmax.f32 %v8000_v46, 0.0  ;;  %v6224_v55 = vpop.f32.mrb[36].mxu1 }
 0x525   : > { %v7943_v38 = vpack.c.bf16 %v6325_v50, %v6321_v13  ;;  %v6226_v63 = vpop.f32.mrb[37].mxu1  ;;  %v8001_v48 = vadd.f32 %v6224_v55, %v12269_v30  ;;  %v6577_v50 = vsub.f32 1.0, %v6569_v24  ;;  %v6586_v55 = vmax.f32 %v6578_v57, 0.0 }
 0x526   : > { %v7941_v60 = vpack.c.bf16 %v6326_v8, %v6322_v1  ;;  %v8002_v54 = vadd.f32 %v6226_v63, %v12269_v30  ;;  %v6581_v1 = vsub.f32 1.0, %v6573_v2 }
 0x527   : > { %v6329_v4 = vmax.f32 %v8001_v48, 0.0  ;;  %v6585_v48 = vmax.f32 %v6577_v50, 0.0 }
 0x528   : > { %v6230_v19 = vpop.f32.mrb[38].mxu1  ;;  %7942 = vmatprep.subr.bf16.mxu1 %v7941_v60  ;;  %v6330_v39 = vmax.f32 %v8002_v54, 0.0  ;;  %v6589_v54 = vmax.f32 %v6581_v1, 0.0 }
 0x529   : > { %v8003_v44 = vadd.f32 %v6230_v19, %v11738_v17  ;;  %v6232_v34 = vpop.f32.mrb[39].mxu1  ;;  %7944 = vmatpush1.bf16.msra.mxu1 %v7943_v38  ;;  %v6590_v38 = vmax.f32 %v6582_v56, 0.0 }
 0x52a   : > { %v8004_v29 = vadd.f32 %v6232_v34, %v11738_v17 }
 0x52b   : > { %v6333_v23 = vmax.f32 %v8003_v44, 0.0  ;;  %v7957_v19 = vpack.c.bf16 %v6590_v38, %v6586_v55  ;;  %v7959_v44 = vpack.c.bf16 %v6589_v54, %v6585_v48 }
 0x52c   : > { %v6334_v26 = vmax.f32 %v8004_v29, 0.0  ;;  %v6236_v10 = vpop.f32.mrb[40].mxu1 }
 0x52d   : > { %v7947_v30 = vpack.c.bf16 %v6333_v23, %v6329_v4  ;;  %v6238_v61 = vpop.f32.mrb[41].mxu1  ;;  %v8005_v28 = vadd.f32 %v6236_v10, %v12270_v22  ;;  %v11858_v4 = vpop.permute.xlu1 %6354 }
 0x52e   : > { %v7945_v42 = vpack.c.bf16 %v6334_v26, %v6330_v39  ;;  %v8006_v46 = vadd.f32 %v6238_v61, %v12270_v22 }
 0x52f   : > { %v6337_v63 = vmax.f32 %v8005_v28, 0.0 }
 0x530   : > { %v6242_v27 = vpop.f32.mrb[42].mxu1  ;;  %7946 = vmatprep.subr.bf16.mxu1 %v7945_v42  ;;  %v6338_v60 = vmax.f32 %v8006_v46, 0.0 }
 0x531   : > { %v8007_v17 = vadd.f32 %v6242_v27, %v11746_v14  ;;  %v6244_v13 = vpop.f32.mrb[43].mxu1  ;;  %7948 = vmatpush1.bf16.msra.mxu1 %v7947_v30 }
 0x532   : > { %v8008_v8 = vadd.f32 %v6244_v13, %v11746_v14  ;;  %v6623_v14 = vsub.f32 %v10753_v20, %v11731_v49 }
 0x533   : > { %v6341_v43 = vmax.f32 %v8007_v17, 0.0 }
 0x534   : > { %v6342_v15 = vmax.f32 %v8008_v8, 0.0 }
 0x535   : > { %v7951_v53 = vpack.c.bf16 %v6341_v43, %v6337_v63 }
 0x536   : > { %v7949_v22 = vpack.c.bf16 %v6342_v15, %v6338_v60 }
 0x538   : > { %7950 = vmatprep.subr.bf16.mxu1 %v7949_v22 }
 0x539   : > { %7952 = vmatpush1.bf16.msra.mxu1 %v7951_v53 }
 0x53a   : > { %7958 = vmatprep.subr.bf16.mxu1 %v7957_v19 }
 0x53c   : > { %7730 = vmatmul.mubr.msk.f32.vlgmr.msra.gmra.mrb[44].mxu1 %vm6357_vm11, %v11754_v0  ;;  %v6624_v0 = vsub.f32 %v10765_v32, %v11731_v49 }
 0x53d   : > { %6511 = vmatprep.mubr.f32.mxu1 %v12166_v7  ;;  %7960 = vmatpush1.bf16.msra.mxu1 %v7959_v44 }
 0x53e   : > { %v6632_v34 = vand.u32 2147483647, %v6624_v0 }
 0x540   : > { %7731 = vmatmul.mubr.msk.f32.gmra.mrb[46].mxu1 %vm6357_vm11, %v11763_v37  ;;  %v6631_v37 = vand.u32 2147483647, %v6623_v14  ;;  %v6640_v51 = vsub.f32 1.0, %v6632_v34 }
 0x541   : > { %6824 = vmatprep.mubr.f32.mxu1 %v12166_v7 }
 0x542   : > { %v6648_v24 = vmax.f32 %v6640_v51, 0.0 }
 0x544   : > { %7744 = vmatmul.mubr.msk.f32.vlgmr.msra.gmra.mrb[48].mxu1 %vm363_vm0, %v11774_v31  ;;  %v6627_v31 = vsub.f32 %v10753_v20, %v11733_v58 }
 0x545   : > { %6830 = vmatprep.mubr.f32.mxu1 %v12166_v7 }
 0x546   : > { %v6635_v59 = vand.u32 2147483647, %v6627_v31 }
 0x548   : > { %7745 = vmatmul.mubr.msk.f32.gmra.mrb[50].mxu1 %vm363_vm0, %v11783_v36  ;;  %v6628_v36 = vsub.f32 %v10765_v32, %v11733_v58  ;;  %v6643_v10 = vsub.f32 1.0, %v6635_v59 }
 0x549   : > { %6836 = vmatprep.mubr.f32.mxu1 %v12166_v7 }
 0x54a   : > { %v6636_v29 = vand.u32 2147483647, %v6628_v36  ;;  %v6651_v60 = vmax.f32 %v6643_v10, 0.0 }
 0x54c   : > { %7746 = vmatmul.mubr.msk.f32.gmra.mrb[52].mxu1 %vm363_vm0, %v11794_v33  ;;  %v6644_v30 = vsub.f32 1.0, %v6636_v29 }
 0x54d   : > { %6842 = vmatprep.mubr.f32.mxu1 %v12166_v7  ;;  %v6639_v7 = vsub.f32 1.0, %v6631_v37 }
 0x54e   : > { %v6652_v53 = vmax.f32 %v6644_v30, 0.0 }
 0x54f   : > { %v6647_v26 = vmax.f32 %v6639_v7, 0.0 }
 0x550   : > { %7747 = vmatmul.mubr.msk.f32.gmra.mrb[54].mxu1 %vm363_vm0, %v11804_v62  ;;  %v11853_v62 = vpop.permute.xlu0 %6349  ;;  %vm6993_vm0 = vcmask 1043456  }
 0x5d9   : > { %v6430_v33 = vpop.f32.mrb[44].mxu0 }
 0x5da   : > { %v6432_v18 = vpop.f32.mrb[45].mxu0  ;;  %v11856_v47 = vadd.f32 %v6430_v33, %v11853_v62 }
 0x5db   : > { %v11861_v23 = vadd.f32 %v6432_v18, %v11853_v62 }
 0x5dc   : > { %v6994_v2 = vrot.slane %v11856_v47, 4  ;;  %v7223_v42 = vrot.slane %v11856_v47, 1 }
 0x5dd   : > { %v6436_v20 = vpop.f32.mrb[46].mxu0  ;;  %v6997_v28 = vrot.slane %v11861_v23, 4  ;;  %v7226_v46 = vrot.slane %v11861_v23, 1 }
 0x5de   : > { %v6437_v32 = vadd.f32 %v6436_v20, %v11858_v4  ;;  %v6438_v39 = vpop.f32.mrb[47].mxu0 }
 0x5df   : > { %v6439_v61 = vadd.f32 %v6438_v39, %v11858_v4 }
 0x5e0   : > { %v6995_v57 = vrot.slane %v6437_v32, 4  ;;  %v7224_v56 = vrot.slane %v6437_v32, 1 }
 0x5e1   : > { %v6998_v27 = vrot.slane %v6439_v61, 4  ;;  %v7227_v17 = vrot.slane %v6439_v61, 1  ;;  %v6737_v13 = vpop.f32.mrb[48].mxu0 }
 0x5e2   : > { %v11870_v50 = vsel %vm6993_vm0, %v6994_v2, %v6995_v57  ;;  %v7225_v1 = vsel %vm7222_vm9, %v7223_v42, %v7224_v56  ;;  %v6849_v8 = vmul.f32 %v6737_v13, %v6647_v26  ;;  %v6739_v55 = vpop.f32.mrb[49].mxu0 }
 0x5e3   : > { %7239 = vst [vmem:[%s9339_s9 + $0x60] sm:$0xe0] %v7225_v1  ;;  %v11875_v38 = vsel %vm6993_vm0, %v6997_v28, %v6998_v27  ;;  %v7228_v63 = vsel %vm7222_vm9, %v7226_v46, %v7227_v17  ;;  %v6850_v43 = vmul.f32 %v6739_v55, %v6648_v24 }
 0x5e4   : > { %7240 = vst [vmem:[%s9339_s9 + $0x68] sm:$0xe0] %v7228_v63 }
 0x5e5   : > { %v6743_v15 = vpop.f32.mrb[50].mxu0 }
 0x5e6   : > { %v6853_v48 = vmul.f32 %v6743_v15, %v6651_v60  ;;  %v6745_v54 = vpop.f32.mrb[51].mxu0 }
 0x5e7   : > { %v6854_v22 = vmul.f32 %v6745_v54, %v6652_v53  ;;  %v6527_v54 = vrot.slane %v11861_v23, 6 }
 0x5e8   : > { %v6857_v19 = vadd.f32 %v6853_v48, %v6849_v8 }
 0x5e9   : > { %v6864_v44 = vadd.f32 %v6854_v22, %v6850_v43  ;;  %v6749_v14 = vpop.f32.mrb[52].mxu0 }
 0x5ea   : > { %v6858_v0 = vrot.slane %v6857_v19, 4  ;;  %v6885_v37 = vmul.f32 %v6749_v14, %v6647_v26  ;;  %v6751_v31 = vpop.f32.mrb[53].mxu0  ;;  %v12272_v14 = vld [vmem:[#allocation20_spill] sm:$0xff] }
 0x5eb   : > { %v6865_v36 = vrot.slane %v6864_v44, 4  ;;  %v6886_v34 = vmul.f32 %v6751_v31, %v6648_v24 }
 0x5ec   : > { %v6859_v33 = vadd.f32 %v6858_v0, %v6857_v19  ;;  %v6961_v0 = vrot.slane %v12272_v14, 5 }
 0x5ed   : > { %v6866_v18 = vadd.f32 %v6865_v36, %v6864_v44  ;;  %v6755_v7 = vpop.f32.mrb[54].mxu0  ;;  %v12273_v36 = vld [vmem:[#allocation22_spill] sm:$0xff] }
 0x5ee   : > { %v6860_v59 = vrot.slane %v6859_v33, 2  ;;  %v6889_v29 = vmul.f32 %v6755_v7, %v6651_v60  ;;  %v6757_v51 = vpop.f32.mrb[55].mxu0  ;;  %v6946_v7 = vrot.slane %v12194_v35, 3 }
 0x5ef   : > { %v6867_v20 = vrot.slane %v6866_v18, 2  ;;  %v6890_v32 = vmul.f32 %v6757_v51, %v6652_v53  ;;  %v6526_v53 = vrot.slane %v11856_v47, 6 }
 0x5f0   : > { %v6861_v39 = vadd.f32 %v6860_v59, %v6859_v33  ;;  %v6893_v10 = vadd.f32 %v6889_v29, %v6885_v37  ;;  %v6945_v33 = vrot.slane %v12204_v21, 3 }
 0x5f1   : > { %v6868_v30 = vadd.f32 %v6867_v20, %v6866_v18  ;;  %v6900_v61 = vadd.f32 %v6890_v32, %v6886_v34  ;;  %v6534_v37 = vmul.f32 %v6526_v53, %v10744_v5  ;;  %v6535_v34 = vmul.f32 %v6527_v54, %v10715_v12 }
 0x5f2   : > { %v6894_v2 = vrot.slane %v6893_v10, 4  ;;  %v6862_v57 = vrot.slane %v6861_v39, 1  ;;  %v6625_v5 = vsub.f32 %v10756_v25, %v11731_v49  ;;  %v6626_v12 = vsub.f32 %v10768_v16, %v11731_v49 }
 0x5f3   : > { %v6901_v42 = vrot.slane %v6900_v61, 4  ;;  %v6869_v26 = vrot.slane %v6868_v30, 1  ;;  %v6953_v29 = vmul.f32 %v6945_v33, %v6534_v37  ;;  %v6954_v20 = vmul.f32 %v6946_v7, %v6535_v34 }
 0x5f4   : > { %v6895_v56 = vadd.f32 %v6894_v2, %v6893_v10  ;;  %v6863_v27 = vadd.f32 %v6862_v57, %v6861_v39  ;;  %v6633_v39 = vand.u32 2147483647, %v6625_v5  ;;  %v6629_v10 = vsub.f32 %v10756_v25, %v11733_v58 }
 0x5f5   : > { %v6902_v28 = vadd.f32 %v6901_v42, %v6900_v61  ;;  %v6870_v13 = vadd.f32 %v6869_v26, %v6868_v30  ;;  %v6634_v61 = vand.u32 2147483647, %v6626_v12  ;;  %v6630_v2 = vsub.f32 %v10768_v16, %v11733_v58 }
 0x5f6   : > { %v6896_v46 = vrot.slane %v6895_v56, 2  ;;  %v6921_v63 = vmul.f32 %v6863_v27, %v10703_v3  ;;  %v6962_v3 = vrot.slane %v12273_v36, 5  ;;  %v6637_v26 = vand.u32 2147483647, %v6629_v10 }
 0x5f7   : > { %v6903_v24 = vrot.slane %v6902_v28, 2  ;;  %v6922_v60 = vmul.f32 %v6870_v13, %v10671_v41  ;;  %v6638_v16 = vand.u32 2147483647, %v6630_v2 }
 0x5f8   : > { %v6897_v17 = vadd.f32 %v6896_v46, %v6895_v56  ;;  %v6641_v56 = vsub.f32 1.0, %v6633_v39 }
 0x5f9   : > { %v6904_v1 = vadd.f32 %v6903_v24, %v6902_v28  ;;  %v6642_v28 = vsub.f32 1.0, %v6634_v61 }
 0x5fa   : > { %v6898_v8 = vrot.slane %v6897_v17, 1 }
 0x5fb   : > { %v6905_v55 = vrot.slane %v6904_v1, 1 }
 0x5fc   : > { %v6899_v43 = vadd.f32 %v6898_v8, %v6897_v17 }
 0x5fd   : > { %v6906_v15 = vadd.f32 %v6905_v55, %v6904_v1  ;;  %v6649_v1 = vmax.f32 %v6641_v56, 0.0  ;;  %v6650_v55 = vmax.f32 %v6642_v28, 0.0 }
 0x5fe   : > { %v6925_v48 = vadd.f32 %v6921_v63, %v6899_v43  ;;  %v6645_v63 = vsub.f32 1.0, %v6637_v26  ;;  %v6646_v43 = vsub.f32 1.0, %v6638_v16 }
 0x5ff   : > { %v6926_v22 = vadd.f32 %v6922_v60, %v6906_v15 }
 0x600   : > { %v6933_v19 = vrot.slane %v6925_v48, 7 }
 0x601   : > { %v6934_v44 = vrot.slane %v6926_v22, 7 }
 0x602   : > { %v6941_v31 = vmul.f32 %v6933_v19, %v11856_v47 }
 0x603   : > { %v6942_v41 = vmul.f32 %v6934_v44, %v11861_v23 }
 0x604   : > { %v6969_v18 = vmul.f32 %v6961_v0, %v6941_v31 }
 0x605   : > { %v6970_v59 = vmul.f32 %v6962_v3, %v6942_v41  ;;  %v6653_v41 = vmax.f32 %v6645_v63, 0.0 }
 0x606   : > { %v6977_v51 = vrot.slane %v6969_v18, 1  ;;  %v6654_v18 = vmax.f32 %v6646_v43, 0.0 }
 0x607   : > { %v6978_v32 = vrot.slane %v6970_v59, 1 }
 0x608   : > { %v6985_v47 = vadd.f32 %v6977_v51, %v6953_v29 }
 0x609   : > { %v6986_v23 = vadd.f32 %v6978_v32, %v6954_v20 }
 0x60a   : > { %v11896_v21 = vadd.f32 %v11870_v50, %v6985_v47 }
 0x60b   : > { %v11899_v35 = vadd.f32 %v11875_v38, %v6986_v23 }
 0x60c   : > { %v11904_v30 = vmax.f32 %v11896_v21, 1e-08  ;;  %v7054_v49 = vrot.slane %v11896_v21, 2  ;;  %vm7014_vm5 = vcmp.le.f32.partialorder %v11896_v21, 0.0031308 }
 0x60d   : > { %v7055_v42 = vrot.slane %v11899_v35, 2  ;;  %v11913_v38 = vmax.f32 %v11899_v35, 1e-08  ;;  %vm7015_vm10 = vcmp.le.f32.partialorder %v11899_v35, 0.0031308 }
 0x60e   : > { %v8431_v50 = vand.u32 2147483647, %v11904_v30  ;;  %7062 = vst [vmem:[%s9339_s9] sm:$0x7] %v7054_v49  ;;  %vm8435_vm15 = vcmp.lt.f32.partialorder %v11904_v30, 0  ;;  %vm8436_vm1 = vcmp.eq.f32.partialorder %v11904_v30, 0  ;;  %vm8437_vm3 = vcmp.eq.f32.partialorder %v11904_v30, 1065353216 }
 0x60f   : > { %v6507_v57 = vpop.f32.mrb[44].mxu1  ;;  %7063 = vst [vmem:[%s9339_s9 + $0x8] sm:$0x7] %v7055_v42  ;;  %v8457_v58 = vand.u32 2147483647, %v11913_v38  ;;  %vm8448_vm13 = vcmp.ne.f32.partialorder %v11904_v30, %v11904_v30  ;;  %vm8461_vm7 = vcmp.lt.f32.partialorder %v11913_v38, 0  ;;  %vm8474_vm14 = vcmp.ne.f32.partialorder %v11913_v38, %v11913_v38 }
 0x610   : > { %v6509_v25 = vpop.f32.mrb[45].mxu1  ;;  %8632 = vlog2.f32 %v8431_v50  ;;  %v11920_v46 = vadd.f32 %v6507_v57, %v11853_v62  ;;  %vm8440_vm6 = vcmp.eq.f32.partialorder %v8431_v50, 2139095040  ;;  %vm8462_vm4 = vcmp.eq.f32.partialorder %v11913_v38, 0 }
 0x611   : > { %v11923_v24 = vadd.f32 %v6509_v25, %v11853_v62  ;;  %8634 = vlog2.f32 %v8457_v58  ;;  %vm8466_vm2 = vcmp.eq.f32.partialorder %v8457_v58, 2139095040  ;;  %vm8463_vm8 = vcmp.eq.f32.partialorder %v11913_v38, 1065353216 }
 0x612   : > { %v7000_v60 = vrot.slane %v11920_v46, 4  ;;  %v7229_v15 = vrot.slane %v11920_v46, 1 }
 0x613   : > { %v6513_v27 = vpop.f32.mrb[46].mxu1  ;;  %v7003_v48 = vrot.slane %v11923_v24, 4  ;;  %v7232_v54 = vrot.slane %v11923_v24, 1 }
 0x614   : > { %v6514_v17 = vadd.f32 %v6513_v27, %v11858_v4  ;;  %v6515_v13 = vpop.f32.mrb[47].mxu1 }
 0x615   : > { %v6516_v8 = vadd.f32 %v6515_v13, %v11858_v4 }
 0x616   : > { %v7001_v62 = vrot.slane %v6514_v17, 4  ;;  %v7230_v53 = vrot.slane %v6514_v17, 1  ;;  %v7018_v17 = vmul.f32 12.92, %v11896_v21 }
 0x617   : > { %v7004_v22 = vrot.slane %v6516_v8, 4  ;;  %v7233_v19 = vrot.slane %v6516_v8, 1  ;;  %v6826_v44 = vpop.f32.mrb[48].mxu1 }
 0x618   : > { %v11934_v4 = vsel %vm6993_vm0, %v7000_v60, %v7001_v62  ;;  %v7231_v14 = vsel %vm7222_vm9, %v7229_v15, %v7230_v53  ;;  %v6851_v0 = vmul.f32 %v6826_v44, %v6649_v1  ;;  %v6828_v37 = vpop.f32.mrb[49].mxu1 }
 0x619   : > { %7241 = vst [vmem:[%s9339_s9 + $0x70] sm:$0xe0] %v7231_v14  ;;  %v11939_v31 = vsel %vm6993_vm0, %v7003_v48, %v7004_v22  ;;  %v7234_v36 = vsel %vm7222_vm9, %v7232_v54, %v7233_v19  ;;  %v6852_v3 = vmul.f32 %v6828_v37, %v6650_v55 }
 0x61a   : > { %v8633_v34 = vpop.eup %8632  ;;  %7242 = vst [vmem:[%s9339_s9 + $0x78] sm:$0xe0] %v7234_v36 }
 0x61b   : > { %v6832_v33 = vpop.f32.mrb[50].mxu1  ;;  %v8433_v7 = vmul.f32 0.41666666, %v8633_v34  ;;  %v8635_v51 = vpop.eup %8634 }
 0x61c   : > { %v6855_v59 = vmul.f32 %v6832_v33, %v6653_v41  ;;  %v6834_v29 = vpop.f32.mrb[51].mxu1  ;;  %v8459_v5 = vmul.f32 0.41666666, %v8635_v51 }
 0x61d   : > { %v6856_v20 = vmul.f32 %v6834_v29, %v6654_v18  ;;  %8636 = vpow2.f32 %v8433_v7 }
 0x61e   : > { %v6871_v32 = vadd.f32 %v6855_v59, %v6851_v0  ;;  %8638 = vpow2.f32 %v8459_v5 }
 0x61f   : > { %v6878_v47 = vadd.f32 %v6856_v20, %v6852_v3  ;;  %v6838_v12 = vpop.f32.mrb[52].mxu1 }
 0x620   : > { %v6872_v23 = vrot.slane %v6871_v32, 4  ;;  %v6887_v39 = vmul.f32 %v6838_v12, %v6649_v1  ;;  %v6840_v10 = vpop.f32.mrb[53].mxu1 }
 0x621   : > { %v6879_v61 = vrot.slane %v6878_v47, 4  ;;  %v6888_v2 = vmul.f32 %v6840_v10, %v6650_v55 }
 0x622   : > { %v6873_v49 = vadd.f32 %v6872_v23, %v6871_v32  ;;  %v7019_v32 = vmul.f32 12.92, %v11899_v35 }
 0x623   : > { %v6880_v42 = vadd.f32 %v6879_v61, %v6878_v47  ;;  %v6844_v57 = vpop.f32.mrb[54].mxu1  ;;  %v6528_v61 = vrot.slane %v11920_v46, 6 }
 0x624   : > { %v6874_v25 = vrot.slane %v6873_v49, 2  ;;  %v6891_v56 = vmul.f32 %v6844_v57, %v6653_v41  ;;  %v6846_v26 = vpop.f32.mrb[55].mxu1 }
 0x625   : > { %v6881_v28 = vrot.slane %v6880_v42, 2  ;;  %v6892_v16 = vmul.f32 %v6846_v26, %v6654_v18 }
 0x626   : > { %v6875_v27 = vadd.f32 %v6874_v25, %v6873_v49  ;;  %v6907_v13 = vadd.f32 %v6891_v56, %v6887_v39 }
 0x627   : > { %v8637_v8 = vpop.eup %8636  ;;  %v6882_v63 = vadd.f32 %v6881_v28, %v6880_v42  ;;  %v6914_v1 = vadd.f32 %v6892_v16, %v6888_v2  ;;  %v6529_v42 = vrot.slane %v11923_v24, 6  ;;  %v12274_v16 = vld [vmem:[#allocation21_spill] sm:$0xff] }
 0x628   : > { %v8441_v55 = vsel %vm8435_vm15, 2143289344, %v8637_v8  ;;  %v6908_v43 = vrot.slane %v6907_v13, 4  ;;  %v8639_v62 = vpop.eup %8638  ;;  %v6876_v53 = vrot.slane %v6875_v27, 1 }
 0x629   : > { %v8442_v60 = vsel %vm8436_vm1, 0, %v8441_v55  ;;  %v6915_v15 = vrot.slane %v6914_v1, 4  ;;  %v6883_v22 = vrot.slane %v6882_v63, 1  ;;  %v8467_v44 = vsel %vm8461_vm7, 2143289344, %v8639_v62 }
 0x62a   : > { %v8447_v48 = vsel %vm8440_vm6, 2139095040, %v8442_v60  ;;  %v6909_v54 = vadd.f32 %v6908_v43, %v6907_v13  ;;  %v8468_v50 = vsel %vm8462_vm4, 0, %v8467_v44  ;;  %v6877_v41 = vadd.f32 %v6876_v53, %v6875_v27 }
 0x62b   : > { %v8451_v19 = vsel %vm8448_vm13, 2143289344, %v8447_v48  ;;  %v6916_v14 = vadd.f32 %v6915_v15, %v6914_v1  ;;  %v8473_v3 = vsel %vm8466_vm2, 2139095040, %v8468_v50  ;;  %v6884_v7 = vadd.f32 %v6883_v22, %v6882_v63 }
 0x62c   : > { %v8452_v0 = vsel %vm8437_vm3, 1065353216, %v8451_v19  ;;  %v6910_v37 = vrot.slane %v6909_v54, 2  ;;  %v8477_v18 = vsel %vm8474_vm14, 2143289344, %v8473_v3  ;;  %v6923_v47 = vmul.f32 %v6877_v41, %v10729_v45 }
 0x62d   : > { %v7030_v36 = vmul.f32 1.055, %v8452_v0  ;;  %v6917_v34 = vrot.slane %v6916_v14, 2  ;;  %v8478_v30 = vsel %vm8463_vm8, 1065353216, %v8477_v18  ;;  %v6924_v38 = vmul.f32 %v6884_v7, %v10691_v6 }
 0x62e   : > { %v6911_v33 = vadd.f32 %v6910_v37, %v6909_v54  ;;  %v7031_v58 = vmul.f32 1.055, %v8478_v30  ;;  %v6963_v6 = vrot.slane %v12274_v16, 5  ;;  %v6536_v27 = vmul.f32 %v6528_v61, %v10774_v40  ;;  %v7279_v16 = vld [vmem:[%s9339_s9 + $0x38] sm:$0xff] (%p8728_p5) }
 0x62f   : > { %v7748_v59 = vadd.f32 -0.055, %v7030_v36  ;;  %v6918_v29 = vadd.f32 %v6917_v34, %v6916_v14  ;;  %v6537_v8 = vmul.f32 %v6529_v42, %v10725_v9  ;;  %v6947_v55 = vrot.slane %v12205_v11, 3  ;;  %7280 = vst [vmem:[%s7252_s17 + $0x98] sm:$0xff] (%p8728_p5), %v7279_v16 }
 0x630   : > { %v6912_v51 = vrot.slane %v6911_v33, 1  ;;  %v7749_v39 = vadd.f32 -0.055, %v7031_v58  ;;  %v6948_v60 = vrot.slane %v12202_v52, 3 }
 0x631   : > { %v7038_v20 = vsel %vm7014_vm5, %v7018_v17, %v7748_v59  ;;  %v6919_v5 = vrot.slane %v6918_v29, 1  ;;  %v12275_v17 = vld [vmem:[#allocation23_spill] sm:$0xff]  ;;  %v6955_v40 = vmul.f32 %v6947_v55, %v6536_v27  ;;  %v7283_v27 = vld [vmem:[%s9339_s9 + $0x48] sm:$0xff] (%p8728_p5) }
 0x632   : > { %v7042_v12 = vmax.f32 %v7038_v20, 0.0  ;;  %v6913_v23 = vadd.f32 %v6912_v51, %v6911_v33  ;;  %v7039_v49 = vsel %vm7015_vm10, %v7019_v32, %v7749_v39  ;;  %v6964_v13 = vrot.slane %v12275_v17, 5  ;;  %v7287_v17 = vld [vmem:[%s9339_s9 + $0x58] sm:$0xff] (%p8728_p5)  ;;  %7284 = vst [vmem:[%s7252_s17 + $0x108] sm:$0xff] (%p8728_p5), %v7283_v27 }
 0x633   : > { %v6920_v10 = vadd.f32 %v6919_v5, %v6918_v29  ;;  %v7043_v57 = vmax.f32 %v7039_v49, 0.0  ;;  %v6956_v53 = vmul.f32 %v6948_v60, %v6537_v8  ;;  %7288 = vst [vmem:[%s7252_s17 + $0x118] sm:$0xff] (%p8728_p5), %v7287_v17  ;;  %v7291_v8 = vld [vmem:[%s9339_s9 + $0x68] sm:$0xff] (%p8728_p5) }
 0x634   : > { %v7046_v21 = vmin.f32 %v7042_v12, 1.0  ;;  %v6927_v2 = vadd.f32 %v6923_v47, %v6913_v23  ;;  %7292 = vst [vmem:[%s7252_s17 + $0x188] sm:$0xff] (%p8728_p5), %v7291_v8 }
 0x635   : > { %v6928_v25 = vadd.f32 %v6924_v38, %v6920_v10  ;;  %v7047_v26 = vmin.f32 %v7043_v57, 1.0 }
 0x636   : > { %v7070_v45 = vrot.slane %v7046_v21, 7  ;;  %v6935_v56 = vrot.slane %v6927_v2, 7 }
 0x637   : > { %v6936_v28 = vrot.slane %v6928_v25, 7  ;;  %v7071_v63 = vrot.slane %v7047_v26, 7  ;;  %v7275_v26 = vld [vmem:[%s9339_s9 + $0x28] sm:$0xff] (%p8728_p5) }
 0x638   : > { %7078 = vst [vmem:[%s9339_s9] sm:$0x38] %v7070_v45  ;;  %v6943_v35 = vmul.f32 %v6935_v56, %v11920_v46  ;;  %v7273_v56 = vld [vmem:[%s9339_s9 + $0x20] sm:$0xff] (%p8728_p5)  ;;  %7276 = vst [vmem:[%s7252_s17 + $0x88] sm:$0xff] (%p8728_p5), %v7275_v26 }
 0x639   : > { %v6944_v1 = vmul.f32 %v6936_v28, %v11923_v24  ;;  %7079 = vst [vmem:[%s9339_s9 + $0x8] sm:$0x38] %v7071_v63  ;;  %7274 = vst [vmem:[%s7252_s17 + $0x80] sm:$0xff] (%p8728_p5), %v7273_v56  ;;  %v7277_v28 = vld [vmem:[%s9339_s9 + $0x30] sm:$0xff] (%p8728_p5) }
 0x63a   : > { %v6971_v43 = vmul.f32 %v6963_v6, %v6943_v35  ;;  %v7281_v6 = vld [vmem:[%s9339_s9 + $0x40] sm:$0xff] (%p8728_p5)  ;;  %7278 = vst [vmem:[%s7252_s17 + $0x90] sm:$0xff] (%p8728_p5), %v7277_v28  ;;  %v7285_v35 = vld [vmem:[%s9339_s9 + $0x50] sm:$0xff] (%p8728_p5) }
 0x63b   : > { %v6972_v15 = vmul.f32 %v6964_v13, %v6944_v1  ;;  %7282 = vst [vmem:[%s7252_s17 + $0x100] sm:$0xff] (%p8728_p5), %v7281_v6  ;;  %7286 = vst [vmem:[%s7252_s17 + $0x110] sm:$0xff] (%p8728_p5), %v7285_v35  ;;  %v7289_v13 = vld [vmem:[%s9339_s9 + $0x60] sm:$0xff] (%p8728_p5)  ;;  %v7293_v63 = vld [vmem:[%s9339_s9 + $0x70] sm:$0xff] (%p8728_p5) }
 0x63c   : > { %v6979_v62 = vrot.slane %v6971_v43, 1  ;;  %7290 = vst [vmem:[%s7252_s17 + $0x180] sm:$0xff] (%p8728_p5), %v7289_v13  ;;  %7294 = vst [vmem:[%s7252_s17 + $0x190] sm:$0xff] (%p8728_p5), %v7293_v63  ;;  %v7295_v1 = vld [vmem:[%s9339_s9 + $0x78] sm:$0xff] (%p8728_p5) }
 0x63d   : > { %v6980_v46 = vrot.slane %v6972_v15, 1  ;;  %7296 = vst [vmem:[%s7252_s17 + $0x198] sm:$0xff] (%p8728_p5), %v7295_v1 }
 0x63e   : > { %v6987_v48 = vadd.f32 %v6979_v62, %v6955_v40 }
 0x63f   : > { %v6988_v54 = vadd.f32 %v6980_v46, %v6956_v53  ;;  %v7265_v42 = vld [vmem:[%s9339_s9] sm:$0xff] (%p8728_p5) }
 0x640   : > { %v7012_v9 = vadd.f32 %v11934_v4, %v6987_v48  ;;  %v7267_v57 = vld [vmem:[%s9339_s9 + $0x8] sm:$0xff] (%p8728_p5)  ;;  %7266 = vst [vmem:[%s7252_s17] sm:$0xff] (%p8728_p5), %v7265_v42 }
 0x641   : > { %v7013_v22 = vadd.f32 %v11939_v31, %v6988_v54  ;;  %7268 = vst [vmem:[%s7252_s17 + $0x8] sm:$0xff] (%p8728_p5), %v7267_v57 }
 0x642   : > { %v7024_v24 = vmax.f32 %v7012_v9, 1e-08  ;;  %v7056_v19 = vrot.slane %v7012_v9, 2  ;;  %v7020_v58 = vmul.f32 12.92, %v7012_v9 }
 0x643   : > { %v7057_v11 = vrot.slane %v7013_v22, 2  ;;  %v7025_v14 = vmax.f32 %v7013_v22, 1e-08  ;;  %vm7016_vm4 = vcmp.le.f32.partialorder %v7012_v9, 0.0031308 }
 0x644   : > { %v8483_v44 = vand.u32 2147483647, %v7024_v24  ;;  %7064 = vst [vmem:[%s9339_s9 + $0x10] sm:$0x7] %v7056_v19  ;;  %vm8487_vm12 = vcmp.lt.f32.partialorder %v7024_v24, 0  ;;  %vm8488_vm11 = vcmp.eq.f32.partialorder %v7024_v24, 0  ;;  %vm8500_vm9 = vcmp.ne.f32.partialorder %v7024_v24, %v7024_v24 }
 0x645   : > { %7065 = vst [vmem:[%s9339_s9 + $0x18] sm:$0x7] %v7057_v11  ;;  %v8509_v52 = vand.u32 2147483647, %v7025_v14  ;;  %vm8513_vm15 = vcmp.lt.f32.partialorder %v7025_v14, 0  ;;  %vm8489_vm1 = vcmp.eq.f32.partialorder %v7024_v24, 1065353216  ;;  %vm8526_vm6 = vcmp.ne.f32.partialorder %v7025_v14, %v7025_v14 }
 0x646   : > { %8640 = vlog2.f32 %v8483_v44  ;;  %vm8492_vm0 = vcmp.eq.f32.partialorder %v8483_v44, 2139095040  ;;  %vm8514_vm3 = vcmp.eq.f32.partialorder %v7025_v14, 0  ;;  %vm8515_vm7 = vcmp.eq.f32.partialorder %v7025_v14, 1065353216 }
 0x647   : > { %8642 = vlog2.f32 %v8509_v52  ;;  %vm8518_vm13 = vcmp.eq.f32.partialorder %v8509_v52, 2139095040  ;;  %v7021_v23 = vmul.f32 12.92, %v7013_v22  ;;  %vm7017_vm2 = vcmp.le.f32.partialorder %v7013_v22, 0.0031308 }
 0x650   : > { %v8641_v0 = vpop.eup %8640 }
 0x651   : > { %v8485_v37 = vmul.f32 0.41666666, %v8641_v0  ;;  %v8643_v50 = vpop.eup %8642 }
 0x652   : > { %v8511_v36 = vmul.f32 0.41666666, %v8643_v50 }
 0x653   : > { %8644 = vpow2.f32 %v8485_v37 }
 0x654   : > { %8646 = vpow2.f32 %v8511_v36 }
 0x65d   : > { %v8645_v3 = vpop.eup %8644 }
 0x65e   : > { %v8493_v4 = vsel %vm8487_vm12, 2143289344, %v8645_v3  ;;  %v8647_v34 = vpop.eup %8646 }
 0x65f   : > { %v8494_v31 = vsel %vm8488_vm11, 0, %v8493_v4  ;;  %v8519_v18 = vsel %vm8513_vm15, 2143289344, %v8647_v34 }
 0x660   : > { %v8499_v41 = vsel %vm8492_vm0, 2139095040, %v8494_v31  ;;  %v8520_v59 = vsel %vm8514_vm3, 0, %v8519_v18 }
 0x661   : > { %v8503_v33 = vsel %vm8500_vm9, 2143289344, %v8499_v41  ;;  %v8525_v29 = vsel %vm8518_vm13, 2139095040, %v8520_v59 }
 0x662   : > { %v8504_v7 = vsel %vm8489_vm1, 1065353216, %v8503_v33  ;;  %v8529_v51 = vsel %vm8526_vm6, 2143289344, %v8525_v29 }
 0x663   : > { %v7032_v30 = vmul.f32 1.055, %v8504_v7  ;;  %v8530_v32 = vsel %vm8515_vm7, 1065353216, %v8529_v51 }
 0x664   : > { %v7033_v5 = vmul.f32 1.055, %v8530_v32 }
 0x665   : > { %v7750_v20 = vadd.f32 -0.055, %v7032_v30 }
 0x666   : > { %v7751_v39 = vadd.f32 -0.055, %v7033_v5 }
 0x667   : > { %v7040_v47 = vsel %vm7016_vm4, %v7020_v58, %v7750_v20 }
 0x668   : > { %v7044_v12 = vmax.f32 %v7040_v47, 0.0  ;;  %v7041_v10 = vsel %vm7017_vm2, %v7021_v23, %v7751_v39 }
 0x669   : > { %v7045_v61 = vmax.f32 %v7041_v10, 0.0  ;;  %7249 = sbr.rel (!%p8728_p5) target bundleno = 1656 (0x678), region = 55 }
 0x66a   : > { %v7048_v38 = vmin.f32 %v7044_v12, 1.0 }
 0x66b   : > { %v7049_v2 = vmin.f32 %v7045_v61, 1.0 }
 0x66c   : > { %v7072_v21 = vrot.slane %v7048_v38, 7 }
 0x66d   : > { %v7073_v49 = vrot.slane %v7049_v2, 7 }
 0x66e   : > { %7080 = vst [vmem:[%s9339_s9 + $0x10] sm:$0x38] %v7072_v21 }
 0x66f   : > { %7081 = vst [vmem:[%s9339_s9 + $0x18] sm:$0x38] %v7073_v49 }
 0x675   : > { %v7269_v25 = vld [vmem:[%s9339_s9 + $0x10] sm:$0xff] }
 0x676   : > { %v7271_v45 = vld [vmem:[%s9339_s9 + $0x18] sm:$0xff]  ;;  %7270 = vst [vmem:[%s7252_s17 + $0x10] sm:$0xff] %v7269_v25 }
 0x677   : > { %7272 = vst [vmem:[%s7252_s17 + $0x18] sm:$0xff] %v7271_v45 }
 0x678 PF: > { %p9_p10 = scmp.ge.s32.totalorder %s8715_s13, 6   ;;  %s12276_s9 = smov %s8666_s10 }
 0x679   : > { %s12277_s10 = smov %s8726_s16  ;;  %s12278_s11 = smov %s8715_s13 }
 0x67a   :  { %11 = sbr.rel (!%p9_p10) target bundleno = 2 (0x2), region = 111 }

</bundles_post_ra>
